<compile_context>
chip_gen: v5e
topology: v5e:2x2
jax: 0.10.0
libtpu: 0.0.40
codegen_flags: <defaults>
</compile_context>

<pallas_src>
import functools

import jax
import jax.numpy as jnp
from jax.experimental import pallas as pl
from jax.experimental.pallas import tpu as pltpu

ALPHA = 0.2  # args.alpha (LeakyReLU negative slope)


def _leaky(x):
    return jnp.where(x > 0, x, ALPHA * x)


def _softmax_last(e):
    e = e - jnp.max(e, axis=-1, keepdims=True)
    p = jnp.exp(e)
    return p * pl.reciprocal(jnp.sum(p, axis=-1, keepdims=True), approx=True)


def _softmax_over_list(xs):
    """Stable softmax across a Python list of same-shaped [N,1] arrays.

    Stays on the VPU (max/exp/add/mul) + one EUP reciprocal; no concatenation of
    lane-width-1 pieces.
    """
    m = xs[0]
    for x in xs[1:]:
        m = jnp.maximum(m, x)
    es = [jnp.exp(x - m) for x in xs]
    tot = es[0]
    for e in es[1:]:
        tot = tot + e
    inv = pl.reciprocal(tot, approx=True)
    return [e * inv for e in es]


def gallat_kernel(feat_ref, gt28_ref, mask_ref,
                  wsp_cat_ref, wq_all_ref, bq_all_ref,
                  head_ref, bout_ref,
                  demand_ref, od_ref,
                  *, nchannel, p_steps, nhid):
    """One batch element per grid step; everything stays resident in VMEM."""
    H = nhid
    C = nchannel
    P = p_steps
    mask = mask_ref[...]                                   # [N, N]
    N = mask.shape[0]
    gt28 = gt28_ref[0]                                     # [N, 28]
    inv_sqrt_h = jnp.float32(1.0 / (H ** 0.5))

    # Mask bias hoisted: one compare+select total.
    mask_bias = jnp.where(mask > 0, jnp.float32(0.0), jnp.float32(-9e15))

    # ---- all temporal / channel queries in one matmul (dense folded in) ----
    q_all = jnp.dot(gt28, wq_all_ref[...],
                    preferred_element_type=jnp.float32) + bq_all_ref[...]   # [N, (C+1)H]
    qd = q_all[:, C * H:(C + 1) * H]                                        # [N, H]

    # ---- SpatialAttentionLayer projection + both attention vectors, one matmul ----
    x_all = feat_ref[0]                                    # [C*P*N, F] (pre-flattened in wrapper)
    he_all = jnp.dot(x_all, wsp_cat_ref[...],
                     preferred_element_type=jnp.float32)   # [C*P*N, H+2] = (h | h@a1 | h@a2)
    # Single relayout for every e2 column (was 12 tiny transposes).
    e2_row_flat = he_all[:, H + 1:H + 2].T                 # [1, C*P*N]

    # ---- per channel: P spatial slices -> temporal attention -> te_c ----
    te_list = []
    cscores = []
    for c in range(C):
        q_c = q_all[:, c * H:(c + 1) * H]                  # [N, H]
        sps = []
        tscores = []
        for p in range(P):
            cp = c * P + p
            lo = cp * N
            h_cp = he_all[lo:lo + N, 0:H]                  # [N, H]
            e1 = he_all[lo:lo + N, H:H + 1]                # [N, 1]
            e2 = e2_row_flat[:, lo:lo + N]                 # [1, N] (lane slice)
            e = _leaky(e1 + e2) + mask_bias                # [N, N]
            att = _softmax_last(e)
            s = jnp.dot(att, h_cp,
                        preferred_element_type=jnp.float32)               # [N, H]
            sps.append(s)
            tscores.append(jnp.sum(s * q_c, axis=-1, keepdims=True) * inv_sqrt_h)
        wts = _softmax_over_list(tscores)
        te_c = wts[0] * sps[0]
        for p in range(1, P):
            te_c = te_c + wts[p] * sps[p]                  # [N, H]
        te_list.append(te_c)
        cscores.append(jnp.sum(te_c * qd, axis=-1, keepdims=True) * inv_sqrt_h)

    # ---- DotProductAttentionLayer: attend over channels ----
    wcs = _softmax_over_list(cscores)
    fused = wcs[0] * te_list[0]
    for c in range(1, C):
        fused = fused + wcs[c] * te_list[c]                # [N, H]

    # ---- folded head: [d_raw | t1 | t2] = fused @ (wo_dpa @ [wout | wtr@atr_pair]) ----
    dt3 = jnp.dot(fused, head_ref[...],
                  preferred_element_type=jnp.float32)      # [N, 3]
    # self.outlayer + LeakyReLU (F.dropout is identity in eval mode); bout is SMEM scalar.
    d_col = _leaky(dt3[:, 0:1] + bout_ref[0])              # [N, 1]

    # ---- TransferringAttentionLayer: od[i, j] = demand[i] * softmax_j(att[i, j]) ----
    t2_row = dt3[:, 2:3].T                                 # [1, N]
    att_od = _softmax_last(_leaky(dt3[:, 1:2] + t2_row))   # [N, N]
    od = d_col * att_od                                    # [N, N]

    demand_ref[0] = d_col                                  # (N, 1) — no relayout
    od_ref[0] = od


def gallat_forward(feat_emb, gt28, geo_mask, params, *, nchannel, p_steps, nhid):
    B, C, P, N, F = feat_emb.shape
    H = nhid
    CPN = C * P * N
    E = gt28.shape[-1]

    # ---- wrapper-side weight folding (exact algebra, done once per call) ----
    feat2d = feat_emb.reshape(B, CPN, F)                               # tall lhs for one big matmul
    asp_pair = jnp.concatenate([params["asp"][:H], params["asp"][H:]], axis=1)   # [H, 2]
    atr_pair = jnp.concatenate([params["atr"][:H], params["atr"][H:]], axis=1)   # [H, 2]
    # GAT projection + both attention vectors share one weight:
    wsp_cat = jnp.concatenate([params["wsp"], params["wsp"] @ asp_pair], axis=1)  # [F, H+2]
    # dense folded into every query projection:
    wq_cat = jnp.concatenate([params["wq_te"][c] for c in range(C)]
                             + [params["wq_dpa"]], axis=1)             # [4H, (C+1)H]
    wq_all = params["wd"] @ wq_cat                                     # [28, (C+1)H]
    bq_all = params["bd"] @ wq_cat                                     # [1, (C+1)H]
    # dpa output projection folded into outlayer + transfer head:
    head = params["wo_dpa"] @ jnp.concatenate(
        [params["wout"], params["wtr"] @ atr_pair], axis=1)            # [H, 3]
    bout_flat = params["bout"].reshape(-1)                             # (1,) -> SMEM scalar

    kern = functools.partial(gallat_kernel,
                             nchannel=nchannel, p_steps=p_steps, nhid=nhid)

    def full(shape):
        return pl.BlockSpec(shape, lambda b, _n=len(shape): (0,) * _n)

    in_specs = [
        pl.BlockSpec((1, CPN, F), lambda b: (b, 0, 0)),                # feat (pre-flattened)
        pl.BlockSpec((1, N, E), lambda b: (b, 0, 0)),                  # gt embedding
        full(geo_mask.shape),
        full(wsp_cat.shape),
        full(wq_all.shape), full(bq_all.shape),
        full(head.shape),
        pl.BlockSpec(memory_space=pltpu.MemorySpace.SMEM),             # bout scalar
    ]
    out_shape = (jax.ShapeDtypeStruct((B, N, 1), jnp.float32),         # demand column
                 jax.ShapeDtypeStruct((B, N, N), jnp.float32))
    out_specs = (pl.BlockSpec((1, N, 1), lambda b: (b, 0, 0)),
                 pl.BlockSpec((1, N, N), lambda b: (b, 0, 0)))

    demand, od = pl.pallas_call(
        kern,
        grid=(B,),
        in_specs=in_specs,
        out_specs=out_specs,
        out_shape=out_shape,
        compiler_params=pltpu.CompilerParams(
            dimension_semantics=("parallel",)),
    )(feat2d, gt28, geo_mask,
      wsp_cat, wq_all, bq_all, head, bout_flat)
    return demand[:, :, 0], od


if __name__ == "__main__":
    key = jax.random.PRNGKey(0)
    B, C, P, N, H = 2, 3, 4, 16, 8       # batch, nchannel, p, ngrid, nhid
    nfeat_raw = 5                        # 2 real features + (grid_id, dow, hour)
    F = (nfeat_raw - 3) + 16 + 4 + 8     # args.nfeat = 30 (post-embedding)
    H4 = 4 * H

    keys = jax.random.split(key, 12)
    emb_grid = jax.random.normal(keys[0], (400, 16), jnp.float32) * 0.1
    emb_dow = jax.random.normal(keys[1], (7, 4), jnp.float32) * 0.1
    emb_hour = jax.random.normal(keys[2], (24, 8), jnp.float32) * 0.1

    feat_real = jax.random.normal(keys[3], (B, C, P, N, nfeat_raw - 3), jnp.float32)
    grid_ids = jax.random.randint(keys[4], (B, C, P, N), 0, 400)
    dow_ids = jax.random.randint(keys[5], (B, C, P, N), 0, 7)
    hour_ids = jax.random.randint(keys[6], (B, C, P, N), 0, 24)
    gt_grid = jax.random.randint(keys[7], (B, N), 0, 400)
    gt_dow = jax.random.randint(keys[8], (B, N), 0, 7)
    gt_hour = jax.random.randint(keys[9], (B, N), 0, 24)
    geo_mask = (jax.random.uniform(keys[10], (N, N)) > 0.5).astype(jnp.float32)
    geo_mask = jnp.maximum(geo_mask, jnp.eye(N, dtype=jnp.float32))

    # Embedding lookup + concat (glue; matches the embed/cat lines of Gallat.forward).
    feat_emb = jnp.concatenate([
        feat_real,
        jnp.take(emb_grid, grid_ids, axis=0),
        jnp.take(emb_dow, dow_ids, axis=0),
        jnp.take(emb_hour, hour_ids, axis=0),
    ], axis=-1)                                            # [B, C, P, N, 30]
    gt28 = jnp.concatenate([
        jnp.take(emb_grid, gt_grid, axis=0),
        jnp.take(emb_dow, gt_dow, axis=0),
        jnp.take(emb_hour, gt_hour, axis=0),
    ], axis=-1)                                            # [B, N, 28]

    def init(k, shape, scale=0.1):
        return jax.random.normal(k, shape, jnp.float32) * scale

    pkeys = jax.random.split(keys[11], 9)
    params = dict(
        wd=init(pkeys[0], (28, H4)), bd=jnp.zeros((1, H4), jnp.float32),
        wsp=init(pkeys[1], (F, H)), asp=init(pkeys[2], (2 * H, 1)),
        wq_te=init(pkeys[3], (C, H4, H)),
        wq_dpa=init(pkeys[4], (H4, H)), wo_dpa=init(pkeys[5], (H, H4)),
        wout=init(pkeys[6], (H4, 1)), bout=jnp.zeros((1, 1), jnp.float32),
        wtr=init(pkeys[7], (H4, H)), atr=init(pkeys[8], (2 * H, 1)),
    )

    demand, od_matrix = gallat_forward(feat_emb, gt28, geo_mask, params,
                                       nchannel=C, p_steps=P, nhid=H)
    jax.block_until_ready((demand, od_matrix))
    assert demand.shape == (B, N)
    assert od_matrix.shape == (B, N, N)
    assert bool(jnp.all(jnp.isfinite(demand))) and bool(jnp.all(jnp.isfinite(od_matrix)))
    print("KERNEL_OK")
</pallas_src>

<mosaic_0001>
module attributes {stable_mosaic.version = 11 : i64} {
  func.func @gallat_kernel(%arg0: i32, %arg1: memref<1x192x30xf32, #tpu.memory_space<vmem>>, %arg2: memref<1x16x28xf32, #tpu.memory_space<vmem>>, %arg3: memref<16x16xf32, #tpu.memory_space<vmem>>, %arg4: memref<30x10xf32, #tpu.memory_space<vmem>>, %arg5: memref<28x32xf32, #tpu.memory_space<vmem>>, %arg6: memref<1x32xf32, #tpu.memory_space<vmem>>, %arg7: memref<8x3xf32, #tpu.memory_space<vmem>>, %arg8: memref<1xf32, #tpu.memory_space<smem>>, %arg9: memref<1x16x1xf32, #tpu.memory_space<vmem>>, %arg10: memref<1x16x16xf32, #tpu.memory_space<vmem>>) attributes {dimension_semantics = [#tpu.dimension_semantics<parallel>], iteration_bounds = array<i64: 2>, scalar_prefetch = 0 : i64, scratch_operands = 0 : i64, tpu.core_type = #tpu.core_type<tc>, window_params = [{transform_indices = @transform_0, window_bounds = array<i64: 1, 192, 30>}, {transform_indices = @transform_1, window_bounds = array<i64: 1, 16, 28>}, {pipeline_mode = #tpu.pipeline_mode<synchronous>, transform_indices = @transform_2, window_bounds = array<i64: 16, 16>}, {pipeline_mode = #tpu.pipeline_mode<synchronous>, transform_indices = @transform_3, window_bounds = array<i64: 30, 10>}, {pipeline_mode = #tpu.pipeline_mode<synchronous>, transform_indices = @transform_4, window_bounds = array<i64: 28, 32>}, {pipeline_mode = #tpu.pipeline_mode<synchronous>, transform_indices = @transform_5, window_bounds = array<i64: 1, 32>}, {pipeline_mode = #tpu.pipeline_mode<synchronous>, transform_indices = @transform_6, window_bounds = array<i64: 8, 3>}, {transform_indices = @transform_7, window_bounds = array<i64: 1>}, {transform_indices = @transform_8, window_bounds = array<i64: 1, 16, 1>}, {transform_indices = @transform_9, window_bounds = array<i64: 1, 16, 16>}]} {
    %c0 = arith.constant 0 : index
    %c0_0 = arith.constant 0 : index
    %0 = vector.load %arg3[%c0, %c0_0] : memref<16x16xf32, #tpu.memory_space<vmem>>, vector<16x16xf32>
    %c0_1 = arith.constant 0 : index
    %c0_2 = arith.constant 0 : index
    %c0_3 = arith.constant 0 : index
    %1 = vector.load %arg2[%c0_1, %c0_2, %c0_3] : memref<1x16x28xf32, #tpu.memory_space<vmem>>, vector<1x16x28xf32>
    %2 = vector.shape_cast %1 : vector<1x16x28xf32> to vector<16x28xf32>
    %cst = arith.constant 0.000000e+00 : f32
    %3 = vector.broadcast %cst : f32 to vector<16x16xf32>
    %4 = arith.cmpf ogt, %0, %3 : vector<16x16xf32>
    %cst_4 = arith.constant 0.000000e+00 : f32
    %cst_5 = arith.constant -9.000000e+15 : f32
    %5 = vector.broadcast %cst_4 : f32 to vector<16x16xf32>
    %6 = vector.broadcast %cst_5 : f32 to vector<16x16xf32>
    %7 = arith.select %4, %5, %6 : vector<16x16xi1>, vector<16x16xf32>
    %c0_6 = arith.constant 0 : index
    %c0_7 = arith.constant 0 : index
    %8 = vector.load %arg5[%c0_6, %c0_7] : memref<28x32xf32, #tpu.memory_space<vmem>>, vector<28x32xf32>
    %cst_8 = arith.constant dense<0.000000e+00> : vector<16x32xf32>
    %9 = tpu.matmul %2, %8, %cst_8 {dimension_numbers = #tpu.dot_dimension_numbers<[1], [0], [0], [1], [0, 0, 1, 1], [], []>} : vector<16x28xf32>, vector<28x32xf32>, vector<16x32xf32> -> vector<16x32xf32>
    %c0_9 = arith.constant 0 : index
    %c0_10 = arith.constant 0 : index
    %10 = vector.load %arg6[%c0_9, %c0_10] : memref<1x32xf32, #tpu.memory_space<vmem>>, vector<1x32xf32>
    %11 = vector.broadcast %10 : vector<1x32xf32> to vector<16x32xf32>
    %12 = arith.addf %9, %11 : vector<16x32xf32>
    %13 = vector.extract_strided_slice %12 {offsets = [0, 24], sizes = [16, 8], strides = [1, 1]} : vector<16x32xf32> to vector<16x8xf32>
    %c0_11 = arith.constant 0 : index
    %c0_12 = arith.constant 0 : index
    %c0_13 = arith.constant 0 : index
    %14 = vector.load %arg1[%c0_11, %c0_12, %c0_13] : memref<1x192x30xf32, #tpu.memory_space<vmem>>, vector<1x192x30xf32>
    %15 = vector.shape_cast %14 : vector<1x192x30xf32> to vector<192x30xf32>
    %c0_14 = arith.constant 0 : index
    %c0_15 = arith.constant 0 : index
    %16 = vector.load %arg4[%c0_14, %c0_15] : memref<30x10xf32, #tpu.memory_space<vmem>>, vector<30x10xf32>
    %cst_16 = arith.constant dense<0.000000e+00> : vector<192x10xf32>
    %17 = tpu.matmul %15, %16, %cst_16 {dimension_numbers = #tpu.dot_dimension_numbers<[1], [0], [0], [1], [0, 0, 1, 1], [], []>} : vector<192x30xf32>, vector<30x10xf32>, vector<192x10xf32> -> vector<192x10xf32>
    %18 = vector.extract_strided_slice %17 {offsets = [0, 9], sizes = [192, 1], strides = [1, 1]} : vector<192x10xf32> to vector<192x1xf32>
    %19 = tpu.transpose %18, [1, 0] : vector<192x1xf32> -> vector<1x192xf32>
    %20 = vector.extract_strided_slice %12 {offsets = [0, 0], sizes = [16, 8], strides = [1, 1]} : vector<16x32xf32> to vector<16x8xf32>
    %21 = vector.extract_strided_slice %17 {offsets = [0, 0], sizes = [16, 8], strides = [1, 1]} : vector<192x10xf32> to vector<16x8xf32>
    %22 = vector.extract_strided_slice %17 {offsets = [0, 8], sizes = [16, 1], strides = [1, 1]} : vector<192x10xf32> to vector<16x1xf32>
    %23 = vector.extract_strided_slice %19 {offsets = [0, 0], sizes = [1, 16], strides = [1, 1]} : vector<1x192xf32> to vector<1x16xf32>
    %24 = vector.broadcast %22 : vector<16x1xf32> to vector<16x16xf32>
    %25 = vector.broadcast %23 : vector<1x16xf32> to vector<16x16xf32>
    %26 = arith.addf %24, %25 : vector<16x16xf32>
    %cst_17 = arith.constant 0.000000e+00 : f32
    %27 = vector.broadcast %cst_17 : f32 to vector<16x16xf32>
    %28 = arith.cmpf ogt, %26, %27 : vector<16x16xf32>
    %cst_18 = arith.constant 2.000000e-01 : f32
    %29 = vector.broadcast %cst_18 : f32 to vector<16x16xf32>
    %30 = arith.mulf %29, %26 : vector<16x16xf32>
    %31 = arith.select %28, %26, %30 : vector<16x16xi1>, vector<16x16xf32>
    %32 = arith.addf %31, %7 : vector<16x16xf32>
    %cst_19 = arith.constant dense<0xFF800000> : vector<16xf32>
    %33 = vector.multi_reduction <maximumf>, %32, %cst_19 [1] : vector<16x16xf32> to vector<16xf32>
    %34 = vector.shape_cast %33 : vector<16xf32> to vector<16x1xf32>
    %35 = vector.broadcast %34 : vector<16x1xf32> to vector<16x16xf32>
    %36 = arith.subf %32, %35 : vector<16x16xf32>
    %37 = math.exp %36 : vector<16x16xf32>
    %cst_20 = arith.constant dense<0.000000e+00> : vector<16xf32>
    %38 = vector.multi_reduction <add>, %37, %cst_20 [1] : vector<16x16xf32> to vector<16xf32>
    %39 = vector.shape_cast %38 : vector<16xf32> to vector<16x1xf32>
    %40 = tpu.reciprocal %39 {approx = true} : vector<16x1xf32> -> vector<16x1xf32>
    %41 = vector.broadcast %40 : vector<16x1xf32> to vector<16x16xf32>
    %42 = arith.mulf %37, %41 : vector<16x16xf32>
    %cst_21 = arith.constant dense<0.000000e+00> : vector<16x8xf32>
    %43 = tpu.matmul %42, %21, %cst_21 {dimension_numbers = #tpu.dot_dimension_numbers<[1], [0], [0], [1], [0, 0, 1, 1], [], []>} : vector<16x16xf32>, vector<16x8xf32>, vector<16x8xf32> -> vector<16x8xf32>
    %44 = arith.mulf %43, %20 : vector<16x8xf32>
    %cst_22 = arith.constant dense<0.000000e+00> : vector<16xf32>
    %45 = vector.multi_reduction <add>, %44, %cst_22 [1] : vector<16x8xf32> to vector<16xf32>
    %46 = vector.shape_cast %45 : vector<16xf32> to vector<16x1xf32>
    %cst_23 = arith.constant 0.353553385 : f32
    %47 = vector.broadcast %cst_23 : f32 to vector<16x1xf32>
    %48 = arith.mulf %46, %47 : vector<16x1xf32>
    %49 = vector.extract_strided_slice %17 {offsets = [16, 0], sizes = [16, 8], strides = [1, 1]} : vector<192x10xf32> to vector<16x8xf32>
    %50 = vector.extract_strided_slice %17 {offsets = [16, 8], sizes = [16, 1], strides = [1, 1]} : vector<192x10xf32> to vector<16x1xf32>
    %51 = vector.extract_strided_slice %19 {offsets = [0, 16], sizes = [1, 16], strides = [1, 1]} : vector<1x192xf32> to vector<1x16xf32>
    %52 = vector.broadcast %50 : vector<16x1xf32> to vector<16x16xf32>
    %53 = vector.broadcast %51 : vector<1x16xf32> to vector<16x16xf32>
    %54 = arith.addf %52, %53 : vector<16x16xf32>
    %cst_24 = arith.constant 0.000000e+00 : f32
    %55 = vector.broadcast %cst_24 : f32 to vector<16x16xf32>
    %56 = arith.cmpf ogt, %54, %55 : vector<16x16xf32>
    %cst_25 = arith.constant 2.000000e-01 : f32
    %57 = vector.broadcast %cst_25 : f32 to vector<16x16xf32>
    %58 = arith.mulf %57, %54 : vector<16x16xf32>
    %59 = arith.select %56, %54, %58 : vector<16x16xi1>, vector<16x16xf32>
    %60 = arith.addf %59, %7 : vector<16x16xf32>
    %cst_26 = arith.constant dense<0xFF800000> : vector<16xf32>
    %61 = vector.multi_reduction <maximumf>, %60, %cst_26 [1] : vector<16x16xf32> to vector<16xf32>
    %62 = vector.shape_cast %61 : vector<16xf32> to vector<16x1xf32>
    %63 = vector.broadcast %62 : vector<16x1xf32> to vector<16x16xf32>
    %64 = arith.subf %60, %63 : vector<16x16xf32>
    %65 = math.exp %64 : vector<16x16xf32>
    %cst_27 = arith.constant dense<0.000000e+00> : vector<16xf32>
    %66 = vector.multi_reduction <add>, %65, %cst_27 [1] : vector<16x16xf32> to vector<16xf32>
    %67 = vector.shape_cast %66 : vector<16xf32> to vector<16x1xf32>
    %68 = tpu.reciprocal %67 {approx = true} : vector<16x1xf32> -> vector<16x1xf32>
    %69 = vector.broadcast %68 : vector<16x1xf32> to vector<16x16xf32>
    %70 = arith.mulf %65, %69 : vector<16x16xf32>
    %cst_28 = arith.constant dense<0.000000e+00> : vector<16x8xf32>
    %71 = tpu.matmul %70, %49, %cst_28 {dimension_numbers = #tpu.dot_dimension_numbers<[1], [0], [0], [1], [0, 0, 1, 1], [], []>} : vector<16x16xf32>, vector<16x8xf32>, vector<16x8xf32> -> vector<16x8xf32>
    %72 = arith.mulf %71, %20 : vector<16x8xf32>
    %cst_29 = arith.constant dense<0.000000e+00> : vector<16xf32>
    %73 = vector.multi_reduction <add>, %72, %cst_29 [1] : vector<16x8xf32> to vector<16xf32>
    %74 = vector.shape_cast %73 : vector<16xf32> to vector<16x1xf32>
    %cst_30 = arith.constant 0.353553385 : f32
    %75 = vector.broadcast %cst_30 : f32 to vector<16x1xf32>
    %76 = arith.mulf %74, %75 : vector<16x1xf32>
    %77 = vector.extract_strided_slice %17 {offsets = [32, 0], sizes = [16, 8], strides = [1, 1]} : vector<192x10xf32> to vector<16x8xf32>
    %78 = vector.extract_strided_slice %17 {offsets = [32, 8], sizes = [16, 1], strides = [1, 1]} : vector<192x10xf32> to vector<16x1xf32>
    %79 = vector.extract_strided_slice %19 {offsets = [0, 32], sizes = [1, 16], strides = [1, 1]} : vector<1x192xf32> to vector<1x16xf32>
    %80 = vector.broadcast %78 : vector<16x1xf32> to vector<16x16xf32>
    %81 = vector.broadcast %79 : vector<1x16xf32> to vector<16x16xf32>
    %82 = arith.addf %80, %81 : vector<16x16xf32>
    %cst_31 = arith.constant 0.000000e+00 : f32
    %83 = vector.broadcast %cst_31 : f32 to vector<16x16xf32>
    %84 = arith.cmpf ogt, %82, %83 : vector<16x16xf32>
    %cst_32 = arith.constant 2.000000e-01 : f32
    %85 = vector.broadcast %cst_32 : f32 to vector<16x16xf32>
    %86 = arith.mulf %85, %82 : vector<16x16xf32>
    %87 = arith.select %84, %82, %86 : vector<16x16xi1>, vector<16x16xf32>
    %88 = arith.addf %87, %7 : vector<16x16xf32>
    %cst_33 = arith.constant dense<0xFF800000> : vector<16xf32>
    %89 = vector.multi_reduction <maximumf>, %88, %cst_33 [1] : vector<16x16xf32> to vector<16xf32>
    %90 = vector.shape_cast %89 : vector<16xf32> to vector<16x1xf32>
    %91 = vector.broadcast %90 : vector<16x1xf32> to vector<16x16xf32>
    %92 = arith.subf %88, %91 : vector<16x16xf32>
    %93 = math.exp %92 : vector<16x16xf32>
    %cst_34 = arith.constant dense<0.000000e+00> : vector<16xf32>
    %94 = vector.multi_reduction <add>, %93, %cst_34 [1] : vector<16x16xf32> to vector<16xf32>
    %95 = vector.shape_cast %94 : vector<16xf32> to vector<16x1xf32>
    %96 = tpu.reciprocal %95 {approx = true} : vector<16x1xf32> -> vector<16x1xf32>
    %97 = vector.broadcast %96 : vector<16x1xf32> to vector<16x16xf32>
    %98 = arith.mulf %93, %97 : vector<16x16xf32>
    %cst_35 = arith.constant dense<0.000000e+00> : vector<16x8xf32>
    %99 = tpu.matmul %98, %77, %cst_35 {dimension_numbers = #tpu.dot_dimension_numbers<[1], [0], [0], [1], [0, 0, 1, 1], [], []>} : vector<16x16xf32>, vector<16x8xf32>, vector<16x8xf32> -> vector<16x8xf32>
    %100 = arith.mulf %99, %20 : vector<16x8xf32>
    %cst_36 = arith.constant dense<0.000000e+00> : vector<16xf32>
    %101 = vector.multi_reduction <add>, %100, %cst_36 [1] : vector<16x8xf32> to vector<16xf32>
    %102 = vector.shape_cast %101 : vector<16xf32> to vector<16x1xf32>
    %cst_37 = arith.constant 0.353553385 : f32
    %103 = vector.broadcast %cst_37 : f32 to vector<16x1xf32>
    %104 = arith.mulf %102, %103 : vector<16x1xf32>
    %105 = vector.extract_strided_slice %17 {offsets = [48, 0], sizes = [16, 8], strides = [1, 1]} : vector<192x10xf32> to vector<16x8xf32>
    %106 = vector.extract_strided_slice %17 {offsets = [48, 8], sizes = [16, 1], strides = [1, 1]} : vector<192x10xf32> to vector<16x1xf32>
    %107 = vector.extract_strided_slice %19 {offsets = [0, 48], sizes = [1, 16], strides = [1, 1]} : vector<1x192xf32> to vector<1x16xf32>
    %108 = vector.broadcast %106 : vector<16x1xf32> to vector<16x16xf32>
    %109 = vector.broadcast %107 : vector<1x16xf32> to vector<16x16xf32>
    %110 = arith.addf %108, %109 : vector<16x16xf32>
    %cst_38 = arith.constant 0.000000e+00 : f32
    %111 = vector.broadcast %cst_38 : f32 to vector<16x16xf32>
    %112 = arith.cmpf ogt, %110, %111 : vector<16x16xf32>
    %cst_39 = arith.constant 2.000000e-01 : f32
    %113 = vector.broadcast %cst_39 : f32 to vector<16x16xf32>
    %114 = arith.mulf %113, %110 : vector<16x16xf32>
    %115 = arith.select %112, %110, %114 : vector<16x16xi1>, vector<16x16xf32>
    %116 = arith.addf %115, %7 : vector<16x16xf32>
    %cst_40 = arith.constant dense<0xFF800000> : vector<16xf32>
    %117 = vector.multi_reduction <maximumf>, %116, %cst_40 [1] : vector<16x16xf32> to vector<16xf32>
    %118 = vector.shape_cast %117 : vector<16xf32> to vector<16x1xf32>
    %119 = vector.broadcast %118 : vector<16x1xf32> to vector<16x16xf32>
    %120 = arith.subf %116, %119 : vector<16x16xf32>
    %121 = math.exp %120 : vector<16x16xf32>
    %cst_41 = arith.constant dense<0.000000e+00> : vector<16xf32>
    %122 = vector.multi_reduction <add>, %121, %cst_41 [1] : vector<16x16xf32> to vector<16xf32>
    %123 = vector.shape_cast %122 : vector<16xf32> to vector<16x1xf32>
    %124 = tpu.reciprocal %123 {approx = true} : vector<16x1xf32> -> vector<16x1xf32>
    %125 = vector.broadcast %124 : vector<16x1xf32> to vector<16x16xf32>
    %126 = arith.mulf %121, %125 : vector<16x16xf32>
    %cst_42 = arith.constant dense<0.000000e+00> : vector<16x8xf32>
    %127 = tpu.matmul %126, %105, %cst_42 {dimension_numbers = #tpu.dot_dimension_numbers<[1], [0], [0], [1], [0, 0, 1, 1], [], []>} : vector<16x16xf32>, vector<16x8xf32>, vector<16x8xf32> -> vector<16x8xf32>
    %128 = arith.mulf %127, %20 : vector<16x8xf32>
    %cst_43 = arith.constant dense<0.000000e+00> : vector<16xf32>
    %129 = vector.multi_reduction <add>, %128, %cst_43 [1] : vector<16x8xf32> to vector<16xf32>
    %130 = vector.shape_cast %129 : vector<16xf32> to vector<16x1xf32>
    %cst_44 = arith.constant 0.353553385 : f32
    %131 = vector.broadcast %cst_44 : f32 to vector<16x1xf32>
    %132 = arith.mulf %130, %131 : vector<16x1xf32>
    %133 = arith.maximumf %48, %76 : vector<16x1xf32>
    %134 = arith.maximumf %133, %104 : vector<16x1xf32>
    %135 = arith.maximumf %134, %132 : vector<16x1xf32>
    %136 = arith.subf %48, %135 : vector<16x1xf32>
    %137 = math.exp %136 : vector<16x1xf32>
    %138 = arith.subf %76, %135 : vector<16x1xf32>
    %139 = math.exp %138 : vector<16x1xf32>
    %140 = arith.subf %104, %135 : vector<16x1xf32>
    %141 = math.exp %140 : vector<16x1xf32>
    %142 = arith.subf %132, %135 : vector<16x1xf32>
    %143 = math.exp %142 : vector<16x1xf32>
    %144 = arith.addf %137, %139 : vector<16x1xf32>
    %145 = arith.addf %144, %141 : vector<16x1xf32>
    %146 = arith.addf %145, %143 : vector<16x1xf32>
    %147 = tpu.reciprocal %146 {approx = true} : vector<16x1xf32> -> vector<16x1xf32>
    %148 = arith.mulf %137, %147 : vector<16x1xf32>
    %149 = arith.mulf %139, %147 : vector<16x1xf32>
    %150 = arith.mulf %141, %147 : vector<16x1xf32>
    %151 = arith.mulf %143, %147 : vector<16x1xf32>
    %152 = vector.broadcast %148 : vector<16x1xf32> to vector<16x8xf32>
    %153 = arith.mulf %152, %43 : vector<16x8xf32>
    %154 = vector.broadcast %149 : vector<16x1xf32> to vector<16x8xf32>
    %155 = arith.mulf %154, %71 : vector<16x8xf32>
    %156 = arith.addf %153, %155 : vector<16x8xf32>
    %157 = vector.broadcast %150 : vector<16x1xf32> to vector<16x8xf32>
    %158 = arith.mulf %157, %99 : vector<16x8xf32>
    %159 = arith.addf %156, %158 : vector<16x8xf32>
    %160 = vector.broadcast %151 : vector<16x1xf32> to vector<16x8xf32>
    %161 = arith.mulf %160, %127 : vector<16x8xf32>
    %162 = arith.addf %159, %161 : vector<16x8xf32>
    %163 = arith.mulf %162, %13 : vector<16x8xf32>
    %cst_45 = arith.constant dense<0.000000e+00> : vector<16xf32>
    %164 = vector.multi_reduction <add>, %163, %cst_45 [1] : vector<16x8xf32> to vector<16xf32>
    %165 = vector.shape_cast %164 : vector<16xf32> to vector<16x1xf32>
    %cst_46 = arith.constant 0.353553385 : f32
    %166 = vector.broadcast %cst_46 : f32 to vector<16x1xf32>
    %167 = arith.mulf %165, %166 : vector<16x1xf32>
    %168 = vector.extract_strided_slice %12 {offsets = [0, 8], sizes = [16, 8], strides = [1, 1]} : vector<16x32xf32> to vector<16x8xf32>
    %169 = vector.extract_strided_slice %17 {offsets = [64, 0], sizes = [16, 8], strides = [1, 1]} : vector<192x10xf32> to vector<16x8xf32>
    %170 = vector.extract_strided_slice %17 {offsets = [64, 8], sizes = [16, 1], strides = [1, 1]} : vector<192x10xf32> to vector<16x1xf32>
    %171 = vector.extract_strided_slice %19 {offsets = [0, 64], sizes = [1, 16], strides = [1, 1]} : vector<1x192xf32> to vector<1x16xf32>
    %172 = vector.broadcast %170 : vector<16x1xf32> to vector<16x16xf32>
    %173 = vector.broadcast %171 : vector<1x16xf32> to vector<16x16xf32>
    %174 = arith.addf %172, %173 : vector<16x16xf32>
    %cst_47 = arith.constant 0.000000e+00 : f32
    %175 = vector.broadcast %cst_47 : f32 to vector<16x16xf32>
    %176 = arith.cmpf ogt, %174, %175 : vector<16x16xf32>
    %cst_48 = arith.constant 2.000000e-01 : f32
    %177 = vector.broadcast %cst_48 : f32 to vector<16x16xf32>
    %178 = arith.mulf %177, %174 : vector<16x16xf32>
    %179 = arith.select %176, %174, %178 : vector<16x16xi1>, vector<16x16xf32>
    %180 = arith.addf %179, %7 : vector<16x16xf32>
    %cst_49 = arith.constant dense<0xFF800000> : vector<16xf32>
    %181 = vector.multi_reduction <maximumf>, %180, %cst_49 [1] : vector<16x16xf32> to vector<16xf32>
    %182 = vector.shape_cast %181 : vector<16xf32> to vector<16x1xf32>
    %183 = vector.broadcast %182 : vector<16x1xf32> to vector<16x16xf32>
    %184 = arith.subf %180, %183 : vector<16x16xf32>
    %185 = math.exp %184 : vector<16x16xf32>
    %cst_50 = arith.constant dense<0.000000e+00> : vector<16xf32>
    %186 = vector.multi_reduction <add>, %185, %cst_50 [1] : vector<16x16xf32> to vector<16xf32>
    %187 = vector.shape_cast %186 : vector<16xf32> to vector<16x1xf32>
    %188 = tpu.reciprocal %187 {approx = true} : vector<16x1xf32> -> vector<16x1xf32>
    %189 = vector.broadcast %188 : vector<16x1xf32> to vector<16x16xf32>
    %190 = arith.mulf %185, %189 : vector<16x16xf32>
    %cst_51 = arith.constant dense<0.000000e+00> : vector<16x8xf32>
    %191 = tpu.matmul %190, %169, %cst_51 {dimension_numbers = #tpu.dot_dimension_numbers<[1], [0], [0], [1], [0, 0, 1, 1], [], []>} : vector<16x16xf32>, vector<16x8xf32>, vector<16x8xf32> -> vector<16x8xf32>
    %192 = arith.mulf %191, %168 : vector<16x8xf32>
    %cst_52 = arith.constant dense<0.000000e+00> : vector<16xf32>
    %193 = vector.multi_reduction <add>, %192, %cst_52 [1] : vector<16x8xf32> to vector<16xf32>
    %194 = vector.shape_cast %193 : vector<16xf32> to vector<16x1xf32>
    %cst_53 = arith.constant 0.353553385 : f32
    %195 = vector.broadcast %cst_53 : f32 to vector<16x1xf32>
    %196 = arith.mulf %194, %195 : vector<16x1xf32>
    %197 = vector.extract_strided_slice %17 {offsets = [80, 0], sizes = [16, 8], strides = [1, 1]} : vector<192x10xf32> to vector<16x8xf32>
    %198 = vector.extract_strided_slice %17 {offsets = [80, 8], sizes = [16, 1], strides = [1, 1]} : vector<192x10xf32> to vector<16x1xf32>
    %199 = vector.extract_strided_slice %19 {offsets = [0, 80], sizes = [1, 16], strides = [1, 1]} : vector<1x192xf32> to vector<1x16xf32>
    %200 = vector.broadcast %198 : vector<16x1xf32> to vector<16x16xf32>
    %201 = vector.broadcast %199 : vector<1x16xf32> to vector<16x16xf32>
    %202 = arith.addf %200, %201 : vector<16x16xf32>
    %cst_54 = arith.constant 0.000000e+00 : f32
    %203 = vector.broadcast %cst_54 : f32 to vector<16x16xf32>
    %204 = arith.cmpf ogt, %202, %203 : vector<16x16xf32>
    %cst_55 = arith.constant 2.000000e-01 : f32
    %205 = vector.broadcast %cst_55 : f32 to vector<16x16xf32>
    %206 = arith.mulf %205, %202 : vector<16x16xf32>
    %207 = arith.select %204, %202, %206 : vector<16x16xi1>, vector<16x16xf32>
    %208 = arith.addf %207, %7 : vector<16x16xf32>
    %cst_56 = arith.constant dense<0xFF800000> : vector<16xf32>
    %209 = vector.multi_reduction <maximumf>, %208, %cst_56 [1] : vector<16x16xf32> to vector<16xf32>
    %210 = vector.shape_cast %209 : vector<16xf32> to vector<16x1xf32>
    %211 = vector.broadcast %210 : vector<16x1xf32> to vector<16x16xf32>
    %212 = arith.subf %208, %211 : vector<16x16xf32>
    %213 = math.exp %212 : vector<16x16xf32>
    %cst_57 = arith.constant dense<0.000000e+00> : vector<16xf32>
    %214 = vector.multi_reduction <add>, %213, %cst_57 [1] : vector<16x16xf32> to vector<16xf32>
    %215 = vector.shape_cast %214 : vector<16xf32> to vector<16x1xf32>
    %216 = tpu.reciprocal %215 {approx = true} : vector<16x1xf32> -> vector<16x1xf32>
    %217 = vector.broadcast %216 : vector<16x1xf32> to vector<16x16xf32>
    %218 = arith.mulf %213, %217 : vector<16x16xf32>
    %cst_58 = arith.constant dense<0.000000e+00> : vector<16x8xf32>
    %219 = tpu.matmul %218, %197, %cst_58 {dimension_numbers = #tpu.dot_dimension_numbers<[1], [0], [0], [1], [0, 0, 1, 1], [], []>} : vector<16x16xf32>, vector<16x8xf32>, vector<16x8xf32> -> vector<16x8xf32>
    %220 = arith.mulf %219, %168 : vector<16x8xf32>
    %cst_59 = arith.constant dense<0.000000e+00> : vector<16xf32>
    %221 = vector.multi_reduction <add>, %220, %cst_59 [1] : vector<16x8xf32> to vector<16xf32>
    %222 = vector.shape_cast %221 : vector<16xf32> to vector<16x1xf32>
    %cst_60 = arith.constant 0.353553385 : f32
    %223 = vector.broadcast %cst_60 : f32 to vector<16x1xf32>
    %224 = arith.mulf %222, %223 : vector<16x1xf32>
    %225 = vector.extract_strided_slice %17 {offsets = [96, 0], sizes = [16, 8], strides = [1, 1]} : vector<192x10xf32> to vector<16x8xf32>
    %226 = vector.extract_strided_slice %17 {offsets = [96, 8], sizes = [16, 1], strides = [1, 1]} : vector<192x10xf32> to vector<16x1xf32>
    %227 = vector.extract_strided_slice %19 {offsets = [0, 96], sizes = [1, 16], strides = [1, 1]} : vector<1x192xf32> to vector<1x16xf32>
    %228 = vector.broadcast %226 : vector<16x1xf32> to vector<16x16xf32>
    %229 = vector.broadcast %227 : vector<1x16xf32> to vector<16x16xf32>
    %230 = arith.addf %228, %229 : vector<16x16xf32>
    %cst_61 = arith.constant 0.000000e+00 : f32
    %231 = vector.broadcast %cst_61 : f32 to vector<16x16xf32>
    %232 = arith.cmpf ogt, %230, %231 : vector<16x16xf32>
    %cst_62 = arith.constant 2.000000e-01 : f32
    %233 = vector.broadcast %cst_62 : f32 to vector<16x16xf32>
    %234 = arith.mulf %233, %230 : vector<16x16xf32>
    %235 = arith.select %232, %230, %234 : vector<16x16xi1>, vector<16x16xf32>
    %236 = arith.addf %235, %7 : vector<16x16xf32>
    %cst_63 = arith.constant dense<0xFF800000> : vector<16xf32>
    %237 = vector.multi_reduction <maximumf>, %236, %cst_63 [1] : vector<16x16xf32> to vector<16xf32>
    %238 = vector.shape_cast %237 : vector<16xf32> to vector<16x1xf32>
    %239 = vector.broadcast %238 : vector<16x1xf32> to vector<16x16xf32>
    %240 = arith.subf %236, %239 : vector<16x16xf32>
    %241 = math.exp %240 : vector<16x16xf32>
    %cst_64 = arith.constant dense<0.000000e+00> : vector<16xf32>
    %242 = vector.multi_reduction <add>, %241, %cst_64 [1] : vector<16x16xf32> to vector<16xf32>
    %243 = vector.shape_cast %242 : vector<16xf32> to vector<16x1xf32>
    %244 = tpu.reciprocal %243 {approx = true} : vector<16x1xf32> -> vector<16x1xf32>
    %245 = vector.broadcast %244 : vector<16x1xf32> to vector<16x16xf32>
    %246 = arith.mulf %241, %245 : vector<16x16xf32>
    %cst_65 = arith.constant dense<0.000000e+00> : vector<16x8xf32>
    %247 = tpu.matmul %246, %225, %cst_65 {dimension_numbers = #tpu.dot_dimension_numbers<[1], [0], [0], [1], [0, 0, 1, 1], [], []>} : vector<16x16xf32>, vector<16x8xf32>, vector<16x8xf32> -> vector<16x8xf32>
    %248 = arith.mulf %247, %168 : vector<16x8xf32>
    %cst_66 = arith.constant dense<0.000000e+00> : vector<16xf32>
    %249 = vector.multi_reduction <add>, %248, %cst_66 [1] : vector<16x8xf32> to vector<16xf32>
    %250 = vector.shape_cast %249 : vector<16xf32> to vector<16x1xf32>
    %cst_67 = arith.constant 0.353553385 : f32
    %251 = vector.broadcast %cst_67 : f32 to vector<16x1xf32>
    %252 = arith.mulf %250, %251 : vector<16x1xf32>
    %253 = vector.extract_strided_slice %17 {offsets = [112, 0], sizes = [16, 8], strides = [1, 1]} : vector<192x10xf32> to vector<16x8xf32>
    %254 = vector.extract_strided_slice %17 {offsets = [112, 8], sizes = [16, 1], strides = [1, 1]} : vector<192x10xf32> to vector<16x1xf32>
    %255 = vector.extract_strided_slice %19 {offsets = [0, 112], sizes = [1, 16], strides = [1, 1]} : vector<1x192xf32> to vector<1x16xf32>
    %256 = vector.broadcast %254 : vector<16x1xf32> to vector<16x16xf32>
    %257 = vector.broadcast %255 : vector<1x16xf32> to vector<16x16xf32>
    %258 = arith.addf %256, %257 : vector<16x16xf32>
    %cst_68 = arith.constant 0.000000e+00 : f32
    %259 = vector.broadcast %cst_68 : f32 to vector<16x16xf32>
    %260 = arith.cmpf ogt, %258, %259 : vector<16x16xf32>
    %cst_69 = arith.constant 2.000000e-01 : f32
    %261 = vector.broadcast %cst_69 : f32 to vector<16x16xf32>
    %262 = arith.mulf %261, %258 : vector<16x16xf32>
    %263 = arith.select %260, %258, %262 : vector<16x16xi1>, vector<16x16xf32>
    %264 = arith.addf %263, %7 : vector<16x16xf32>
    %cst_70 = arith.constant dense<0xFF800000> : vector<16xf32>
    %265 = vector.multi_reduction <maximumf>, %264, %cst_70 [1] : vector<16x16xf32> to vector<16xf32>
    %266 = vector.shape_cast %265 : vector<16xf32> to vector<16x1xf32>
    %267 = vector.broadcast %266 : vector<16x1xf32> to vector<16x16xf32>
    %268 = arith.subf %264, %267 : vector<16x16xf32>
    %269 = math.exp %268 : vector<16x16xf32>
    %cst_71 = arith.constant dense<0.000000e+00> : vector<16xf32>
    %270 = vector.multi_reduction <add>, %269, %cst_71 [1] : vector<16x16xf32> to vector<16xf32>
    %271 = vector.shape_cast %270 : vector<16xf32> to vector<16x1xf32>
    %272 = tpu.reciprocal %271 {approx = true} : vector<16x1xf32> -> vector<16x1xf32>
    %273 = vector.broadcast %272 : vector<16x1xf32> to vector<16x16xf32>
    %274 = arith.mulf %269, %273 : vector<16x16xf32>
    %cst_72 = arith.constant dense<0.000000e+00> : vector<16x8xf32>
    %275 = tpu.matmul %274, %253, %cst_72 {dimension_numbers = #tpu.dot_dimension_numbers<[1], [0], [0], [1], [0, 0, 1, 1], [], []>} : vector<16x16xf32>, vector<16x8xf32>, vector<16x8xf32> -> vector<16x8xf32>
    %276 = arith.mulf %275, %168 : vector<16x8xf32>
    %cst_73 = arith.constant dense<0.000000e+00> : vector<16xf32>
    %277 = vector.multi_reduction <add>, %276, %cst_73 [1] : vector<16x8xf32> to vector<16xf32>
    %278 = vector.shape_cast %277 : vector<16xf32> to vector<16x1xf32>
    %cst_74 = arith.constant 0.353553385 : f32
    %279 = vector.broadcast %cst_74 : f32 to vector<16x1xf32>
    %280 = arith.mulf %278, %279 : vector<16x1xf32>
    %281 = arith.maximumf %196, %224 : vector<16x1xf32>
    %282 = arith.maximumf %281, %252 : vector<16x1xf32>
    %283 = arith.maximumf %282, %280 : vector<16x1xf32>
    %284 = arith.subf %196, %283 : vector<16x1xf32>
    %285 = math.exp %284 : vector<16x1xf32>
    %286 = arith.subf %224, %283 : vector<16x1xf32>
    %287 = math.exp %286 : vector<16x1xf32>
    %288 = arith.subf %252, %283 : vector<16x1xf32>
    %289 = math.exp %288 : vector<16x1xf32>
    %290 = arith.subf %280, %283 : vector<16x1xf32>
    %291 = math.exp %290 : vector<16x1xf32>
    %292 = arith.addf %285, %287 : vector<16x1xf32>
    %293 = arith.addf %292, %289 : vector<16x1xf32>
    %294 = arith.addf %293, %291 : vector<16x1xf32>
    %295 = tpu.reciprocal %294 {approx = true} : vector<16x1xf32> -> vector<16x1xf32>
    %296 = arith.mulf %285, %295 : vector<16x1xf32>
    %297 = arith.mulf %287, %295 : vector<16x1xf32>
    %298 = arith.mulf %289, %295 : vector<16x1xf32>
    %299 = arith.mulf %291, %295 : vector<16x1xf32>
    %300 = vector.broadcast %296 : vector<16x1xf32> to vector<16x8xf32>
    %301 = arith.mulf %300, %191 : vector<16x8xf32>
    %302 = vector.broadcast %297 : vector<16x1xf32> to vector<16x8xf32>
    %303 = arith.mulf %302, %219 : vector<16x8xf32>
    %304 = arith.addf %301, %303 : vector<16x8xf32>
    %305 = vector.broadcast %298 : vector<16x1xf32> to vector<16x8xf32>
    %306 = arith.mulf %305, %247 : vector<16x8xf32>
    %307 = arith.addf %304, %306 : vector<16x8xf32>
    %308 = vector.broadcast %299 : vector<16x1xf32> to vector<16x8xf32>
    %309 = arith.mulf %308, %275 : vector<16x8xf32>
    %310 = arith.addf %307, %309 : vector<16x8xf32>
    %311 = arith.mulf %310, %13 : vector<16x8xf32>
    %cst_75 = arith.constant dense<0.000000e+00> : vector<16xf32>
    %312 = vector.multi_reduction <add>, %311, %cst_75 [1] : vector<16x8xf32> to vector<16xf32>
    %313 = vector.shape_cast %312 : vector<16xf32> to vector<16x1xf32>
    %cst_76 = arith.constant 0.353553385 : f32
    %314 = vector.broadcast %cst_76 : f32 to vector<16x1xf32>
    %315 = arith.mulf %313, %314 : vector<16x1xf32>
    %316 = vector.extract_strided_slice %12 {offsets = [0, 16], sizes = [16, 8], strides = [1, 1]} : vector<16x32xf32> to vector<16x8xf32>
    %317 = vector.extract_strided_slice %17 {offsets = [128, 0], sizes = [16, 8], strides = [1, 1]} : vector<192x10xf32> to vector<16x8xf32>
    %318 = vector.extract_strided_slice %17 {offsets = [128, 8], sizes = [16, 1], strides = [1, 1]} : vector<192x10xf32> to vector<16x1xf32>
    %319 = vector.extract_strided_slice %19 {offsets = [0, 128], sizes = [1, 16], strides = [1, 1]} : vector<1x192xf32> to vector<1x16xf32>
    %320 = vector.broadcast %318 : vector<16x1xf32> to vector<16x16xf32>
    %321 = vector.broadcast %319 : vector<1x16xf32> to vector<16x16xf32>
    %322 = arith.addf %320, %321 : vector<16x16xf32>
    %cst_77 = arith.constant 0.000000e+00 : f32
    %323 = vector.broadcast %cst_77 : f32 to vector<16x16xf32>
    %324 = arith.cmpf ogt, %322, %323 : vector<16x16xf32>
    %cst_78 = arith.constant 2.000000e-01 : f32
    %325 = vector.broadcast %cst_78 : f32 to vector<16x16xf32>
    %326 = arith.mulf %325, %322 : vector<16x16xf32>
    %327 = arith.select %324, %322, %326 : vector<16x16xi1>, vector<16x16xf32>
    %328 = arith.addf %327, %7 : vector<16x16xf32>
    %cst_79 = arith.constant dense<0xFF800000> : vector<16xf32>
    %329 = vector.multi_reduction <maximumf>, %328, %cst_79 [1] : vector<16x16xf32> to vector<16xf32>
    %330 = vector.shape_cast %329 : vector<16xf32> to vector<16x1xf32>
    %331 = vector.broadcast %330 : vector<16x1xf32> to vector<16x16xf32>
    %332 = arith.subf %328, %331 : vector<16x16xf32>
    %333 = math.exp %332 : vector<16x16xf32>
    %cst_80 = arith.constant dense<0.000000e+00> : vector<16xf32>
    %334 = vector.multi_reduction <add>, %333, %cst_80 [1] : vector<16x16xf32> to vector<16xf32>
    %335 = vector.shape_cast %334 : vector<16xf32> to vector<16x1xf32>
    %336 = tpu.reciprocal %335 {approx = true} : vector<16x1xf32> -> vector<16x1xf32>
    %337 = vector.broadcast %336 : vector<16x1xf32> to vector<16x16xf32>
    %338 = arith.mulf %333, %337 : vector<16x16xf32>
    %cst_81 = arith.constant dense<0.000000e+00> : vector<16x8xf32>
    %339 = tpu.matmul %338, %317, %cst_81 {dimension_numbers = #tpu.dot_dimension_numbers<[1], [0], [0], [1], [0, 0, 1, 1], [], []>} : vector<16x16xf32>, vector<16x8xf32>, vector<16x8xf32> -> vector<16x8xf32>
    %340 = arith.mulf %339, %316 : vector<16x8xf32>
    %cst_82 = arith.constant dense<0.000000e+00> : vector<16xf32>
    %341 = vector.multi_reduction <add>, %340, %cst_82 [1] : vector<16x8xf32> to vector<16xf32>
    %342 = vector.shape_cast %341 : vector<16xf32> to vector<16x1xf32>
    %cst_83 = arith.constant 0.353553385 : f32
    %343 = vector.broadcast %cst_83 : f32 to vector<16x1xf32>
    %344 = arith.mulf %342, %343 : vector<16x1xf32>
    %345 = vector.extract_strided_slice %17 {offsets = [144, 0], sizes = [16, 8], strides = [1, 1]} : vector<192x10xf32> to vector<16x8xf32>
    %346 = vector.extract_strided_slice %17 {offsets = [144, 8], sizes = [16, 1], strides = [1, 1]} : vector<192x10xf32> to vector<16x1xf32>
    %347 = vector.extract_strided_slice %19 {offsets = [0, 144], sizes = [1, 16], strides = [1, 1]} : vector<1x192xf32> to vector<1x16xf32>
    %348 = vector.broadcast %346 : vector<16x1xf32> to vector<16x16xf32>
    %349 = vector.broadcast %347 : vector<1x16xf32> to vector<16x16xf32>
    %350 = arith.addf %348, %349 : vector<16x16xf32>
    %cst_84 = arith.constant 0.000000e+00 : f32
    %351 = vector.broadcast %cst_84 : f32 to vector<16x16xf32>
    %352 = arith.cmpf ogt, %350, %351 : vector<16x16xf32>
    %cst_85 = arith.constant 2.000000e-01 : f32
    %353 = vector.broadcast %cst_85 : f32 to vector<16x16xf32>
    %354 = arith.mulf %353, %350 : vector<16x16xf32>
    %355 = arith.select %352, %350, %354 : vector<16x16xi1>, vector<16x16xf32>
    %356 = arith.addf %355, %7 : vector<16x16xf32>
    %cst_86 = arith.constant dense<0xFF800000> : vector<16xf32>
    %357 = vector.multi_reduction <maximumf>, %356, %cst_86 [1] : vector<16x16xf32> to vector<16xf32>
    %358 = vector.shape_cast %357 : vector<16xf32> to vector<16x1xf32>
    %359 = vector.broadcast %358 : vector<16x1xf32> to vector<16x16xf32>
    %360 = arith.subf %356, %359 : vector<16x16xf32>
    %361 = math.exp %360 : vector<16x16xf32>
    %cst_87 = arith.constant dense<0.000000e+00> : vector<16xf32>
    %362 = vector.multi_reduction <add>, %361, %cst_87 [1] : vector<16x16xf32> to vector<16xf32>
    %363 = vector.shape_cast %362 : vector<16xf32> to vector<16x1xf32>
    %364 = tpu.reciprocal %363 {approx = true} : vector<16x1xf32> -> vector<16x1xf32>
    %365 = vector.broadcast %364 : vector<16x1xf32> to vector<16x16xf32>
    %366 = arith.mulf %361, %365 : vector<16x16xf32>
    %cst_88 = arith.constant dense<0.000000e+00> : vector<16x8xf32>
    %367 = tpu.matmul %366, %345, %cst_88 {dimension_numbers = #tpu.dot_dimension_numbers<[1], [0], [0], [1], [0, 0, 1, 1], [], []>} : vector<16x16xf32>, vector<16x8xf32>, vector<16x8xf32> -> vector<16x8xf32>
    %368 = arith.mulf %367, %316 : vector<16x8xf32>
    %cst_89 = arith.constant dense<0.000000e+00> : vector<16xf32>
    %369 = vector.multi_reduction <add>, %368, %cst_89 [1] : vector<16x8xf32> to vector<16xf32>
    %370 = vector.shape_cast %369 : vector<16xf32> to vector<16x1xf32>
    %cst_90 = arith.constant 0.353553385 : f32
    %371 = vector.broadcast %cst_90 : f32 to vector<16x1xf32>
    %372 = arith.mulf %370, %371 : vector<16x1xf32>
    %373 = vector.extract_strided_slice %17 {offsets = [160, 0], sizes = [16, 8], strides = [1, 1]} : vector<192x10xf32> to vector<16x8xf32>
    %374 = vector.extract_strided_slice %17 {offsets = [160, 8], sizes = [16, 1], strides = [1, 1]} : vector<192x10xf32> to vector<16x1xf32>
    %375 = vector.extract_strided_slice %19 {offsets = [0, 160], sizes = [1, 16], strides = [1, 1]} : vector<1x192xf32> to vector<1x16xf32>
    %376 = vector.broadcast %374 : vector<16x1xf32> to vector<16x16xf32>
    %377 = vector.broadcast %375 : vector<1x16xf32> to vector<16x16xf32>
    %378 = arith.addf %376, %377 : vector<16x16xf32>
    %cst_91 = arith.constant 0.000000e+00 : f32
    %379 = vector.broadcast %cst_91 : f32 to vector<16x16xf32>
    %380 = arith.cmpf ogt, %378, %379 : vector<16x16xf32>
    %cst_92 = arith.constant 2.000000e-01 : f32
    %381 = vector.broadcast %cst_92 : f32 to vector<16x16xf32>
    %382 = arith.mulf %381, %378 : vector<16x16xf32>
    %383 = arith.select %380, %378, %382 : vector<16x16xi1>, vector<16x16xf32>
    %384 = arith.addf %383, %7 : vector<16x16xf32>
    %cst_93 = arith.constant dense<0xFF800000> : vector<16xf32>
    %385 = vector.multi_reduction <maximumf>, %384, %cst_93 [1] : vector<16x16xf32> to vector<16xf32>
    %386 = vector.shape_cast %385 : vector<16xf32> to vector<16x1xf32>
    %387 = vector.broadcast %386 : vector<16x1xf32> to vector<16x16xf32>
    %388 = arith.subf %384, %387 : vector<16x16xf32>
    %389 = math.exp %388 : vector<16x16xf32>
    %cst_94 = arith.constant dense<0.000000e+00> : vector<16xf32>
    %390 = vector.multi_reduction <add>, %389, %cst_94 [1] : vector<16x16xf32> to vector<16xf32>
    %391 = vector.shape_cast %390 : vector<16xf32> to vector<16x1xf32>
    %392 = tpu.reciprocal %391 {approx = true} : vector<16x1xf32> -> vector<16x1xf32>
    %393 = vector.broadcast %392 : vector<16x1xf32> to vector<16x16xf32>
    %394 = arith.mulf %389, %393 : vector<16x16xf32>
    %cst_95 = arith.constant dense<0.000000e+00> : vector<16x8xf32>
    %395 = tpu.matmul %394, %373, %cst_95 {dimension_numbers = #tpu.dot_dimension_numbers<[1], [0], [0], [1], [0, 0, 1, 1], [], []>} : vector<16x16xf32>, vector<16x8xf32>, vector<16x8xf32> -> vector<16x8xf32>
    %396 = arith.mulf %395, %316 : vector<16x8xf32>
    %cst_96 = arith.constant dense<0.000000e+00> : vector<16xf32>
    %397 = vector.multi_reduction <add>, %396, %cst_96 [1] : vector<16x8xf32> to vector<16xf32>
    %398 = vector.shape_cast %397 : vector<16xf32> to vector<16x1xf32>
    %cst_97 = arith.constant 0.353553385 : f32
    %399 = vector.broadcast %cst_97 : f32 to vector<16x1xf32>
    %400 = arith.mulf %398, %399 : vector<16x1xf32>
    %401 = vector.extract_strided_slice %17 {offsets = [176, 0], sizes = [16, 8], strides = [1, 1]} : vector<192x10xf32> to vector<16x8xf32>
    %402 = vector.extract_strided_slice %17 {offsets = [176, 8], sizes = [16, 1], strides = [1, 1]} : vector<192x10xf32> to vector<16x1xf32>
    %403 = vector.extract_strided_slice %19 {offsets = [0, 176], sizes = [1, 16], strides = [1, 1]} : vector<1x192xf32> to vector<1x16xf32>
    %404 = vector.broadcast %402 : vector<16x1xf32> to vector<16x16xf32>
    %405 = vector.broadcast %403 : vector<1x16xf32> to vector<16x16xf32>
    %406 = arith.addf %404, %405 : vector<16x16xf32>
    %cst_98 = arith.constant 0.000000e+00 : f32
    %407 = vector.broadcast %cst_98 : f32 to vector<16x16xf32>
    %408 = arith.cmpf ogt, %406, %407 : vector<16x16xf32>
    %cst_99 = arith.constant 2.000000e-01 : f32
    %409 = vector.broadcast %cst_99 : f32 to vector<16x16xf32>
    %410 = arith.mulf %409, %406 : vector<16x16xf32>
    %411 = arith.select %408, %406, %410 : vector<16x16xi1>, vector<16x16xf32>
    %412 = arith.addf %411, %7 : vector<16x16xf32>
    %cst_100 = arith.constant dense<0xFF800000> : vector<16xf32>
    %413 = vector.multi_reduction <maximumf>, %412, %cst_100 [1] : vector<16x16xf32> to vector<16xf32>
    %414 = vector.shape_cast %413 : vector<16xf32> to vector<16x1xf32>
    %415 = vector.broadcast %414 : vector<16x1xf32> to vector<16x16xf32>
    %416 = arith.subf %412, %415 : vector<16x16xf32>
    %417 = math.exp %416 : vector<16x16xf32>
    %cst_101 = arith.constant dense<0.000000e+00> : vector<16xf32>
    %418 = vector.multi_reduction <add>, %417, %cst_101 [1] : vector<16x16xf32> to vector<16xf32>
    %419 = vector.shape_cast %418 : vector<16xf32> to vector<16x1xf32>
    %420 = tpu.reciprocal %419 {approx = true} : vector<16x1xf32> -> vector<16x1xf32>
    %421 = vector.broadcast %420 : vector<16x1xf32> to vector<16x16xf32>
    %422 = arith.mulf %417, %421 : vector<16x16xf32>
    %cst_102 = arith.constant dense<0.000000e+00> : vector<16x8xf32>
    %423 = tpu.matmul %422, %401, %cst_102 {dimension_numbers = #tpu.dot_dimension_numbers<[1], [0], [0], [1], [0, 0, 1, 1], [], []>} : vector<16x16xf32>, vector<16x8xf32>, vector<16x8xf32> -> vector<16x8xf32>
    %424 = arith.mulf %423, %316 : vector<16x8xf32>
    %cst_103 = arith.constant dense<0.000000e+00> : vector<16xf32>
    %425 = vector.multi_reduction <add>, %424, %cst_103 [1] : vector<16x8xf32> to vector<16xf32>
    %426 = vector.shape_cast %425 : vector<16xf32> to vector<16x1xf32>
    %cst_104 = arith.constant 0.353553385 : f32
    %427 = vector.broadcast %cst_104 : f32 to vector<16x1xf32>
    %428 = arith.mulf %426, %427 : vector<16x1xf32>
    %429 = arith.maximumf %344, %372 : vector<16x1xf32>
    %430 = arith.maximumf %429, %400 : vector<16x1xf32>
    %431 = arith.maximumf %430, %428 : vector<16x1xf32>
    %432 = arith.subf %344, %431 : vector<16x1xf32>
    %433 = math.exp %432 : vector<16x1xf32>
    %434 = arith.subf %372, %431 : vector<16x1xf32>
    %435 = math.exp %434 : vector<16x1xf32>
    %436 = arith.subf %400, %431 : vector<16x1xf32>
    %437 = math.exp %436 : vector<16x1xf32>
    %438 = arith.subf %428, %431 : vector<16x1xf32>
    %439 = math.exp %438 : vector<16x1xf32>
    %440 = arith.addf %433, %435 : vector<16x1xf32>
    %441 = arith.addf %440, %437 : vector<16x1xf32>
    %442 = arith.addf %441, %439 : vector<16x1xf32>
    %443 = tpu.reciprocal %442 {approx = true} : vector<16x1xf32> -> vector<16x1xf32>
    %444 = arith.mulf %433, %443 : vector<16x1xf32>
    %445 = arith.mulf %435, %443 : vector<16x1xf32>
    %446 = arith.mulf %437, %443 : vector<16x1xf32>
    %447 = arith.mulf %439, %443 : vector<16x1xf32>
    %448 = vector.broadcast %444 : vector<16x1xf32> to vector<16x8xf32>
    %449 = arith.mulf %448, %339 : vector<16x8xf32>
    %450 = vector.broadcast %445 : vector<16x1xf32> to vector<16x8xf32>
    %451 = arith.mulf %450, %367 : vector<16x8xf32>
    %452 = arith.addf %449, %451 : vector<16x8xf32>
    %453 = vector.broadcast %446 : vector<16x1xf32> to vector<16x8xf32>
    %454 = arith.mulf %453, %395 : vector<16x8xf32>
    %455 = arith.addf %452, %454 : vector<16x8xf32>
    %456 = vector.broadcast %447 : vector<16x1xf32> to vector<16x8xf32>
    %457 = arith.mulf %456, %423 : vector<16x8xf32>
    %458 = arith.addf %455, %457 : vector<16x8xf32>
    %459 = arith.mulf %458, %13 : vector<16x8xf32>
    %cst_105 = arith.constant dense<0.000000e+00> : vector<16xf32>
    %460 = vector.multi_reduction <add>, %459, %cst_105 [1] : vector<16x8xf32> to vector<16xf32>
    %461 = vector.shape_cast %460 : vector<16xf32> to vector<16x1xf32>
    %cst_106 = arith.constant 0.353553385 : f32
    %462 = vector.broadcast %cst_106 : f32 to vector<16x1xf32>
    %463 = arith.mulf %461, %462 : vector<16x1xf32>
    %464 = arith.maximumf %167, %315 : vector<16x1xf32>
    %465 = arith.maximumf %464, %463 : vector<16x1xf32>
    %466 = arith.subf %167, %465 : vector<16x1xf32>
    %467 = math.exp %466 : vector<16x1xf32>
    %468 = arith.subf %315, %465 : vector<16x1xf32>
    %469 = math.exp %468 : vector<16x1xf32>
    %470 = arith.subf %463, %465 : vector<16x1xf32>
    %471 = math.exp %470 : vector<16x1xf32>
    %472 = arith.addf %467, %469 : vector<16x1xf32>
    %473 = arith.addf %472, %471 : vector<16x1xf32>
    %474 = tpu.reciprocal %473 {approx = true} : vector<16x1xf32> -> vector<16x1xf32>
    %475 = arith.mulf %467, %474 : vector<16x1xf32>
    %476 = arith.mulf %469, %474 : vector<16x1xf32>
    %477 = arith.mulf %471, %474 : vector<16x1xf32>
    %478 = vector.broadcast %475 : vector<16x1xf32> to vector<16x8xf32>
    %479 = arith.mulf %478, %162 : vector<16x8xf32>
    %480 = vector.broadcast %476 : vector<16x1xf32> to vector<16x8xf32>
    %481 = arith.mulf %480, %310 : vector<16x8xf32>
    %482 = arith.addf %479, %481 : vector<16x8xf32>
    %483 = vector.broadcast %477 : vector<16x1xf32> to vector<16x8xf32>
    %484 = arith.mulf %483, %458 : vector<16x8xf32>
    %485 = arith.addf %482, %484 : vector<16x8xf32>
    %c0_107 = arith.constant 0 : index
    %c0_108 = arith.constant 0 : index
    %486 = vector.load %arg7[%c0_107, %c0_108] : memref<8x3xf32, #tpu.memory_space<vmem>>, vector<8x3xf32>
    %cst_109 = arith.constant dense<0.000000e+00> : vector<16x3xf32>
    %487 = tpu.matmul %485, %486, %cst_109 {dimension_numbers = #tpu.dot_dimension_numbers<[1], [0], [0], [1], [0, 0, 1, 1], [], []>} : vector<16x8xf32>, vector<8x3xf32>, vector<16x3xf32> -> vector<16x3xf32>
    %488 = vector.extract_strided_slice %487 {offsets = [0, 0], sizes = [16, 1], strides = [1, 1]} : vector<16x3xf32> to vector<16x1xf32>
    %c0_110 = arith.constant 0 : index
    %489 = memref.load %arg8[%c0_110] : memref<1xf32, #tpu.memory_space<smem>>
    %490 = vector.broadcast %489 : f32 to vector<16x1xf32>
    %491 = arith.addf %488, %490 : vector<16x1xf32>
    %cst_111 = arith.constant 0.000000e+00 : f32
    %492 = vector.broadcast %cst_111 : f32 to vector<16x1xf32>
    %493 = arith.cmpf ogt, %491, %492 : vector<16x1xf32>
    %cst_112 = arith.constant 2.000000e-01 : f32
    %494 = vector.broadcast %cst_112 : f32 to vector<16x1xf32>
    %495 = arith.mulf %494, %491 : vector<16x1xf32>
    %496 = arith.select %493, %491, %495 : vector<16x1xi1>, vector<16x1xf32>
    %497 = vector.extract_strided_slice %487 {offsets = [0, 2], sizes = [16, 1], strides = [1, 1]} : vector<16x3xf32> to vector<16x1xf32>
    %498 = tpu.transpose %497, [1, 0] : vector<16x1xf32> -> vector<1x16xf32>
    %499 = vector.extract_strided_slice %487 {offsets = [0, 1], sizes = [16, 1], strides = [1, 1]} : vector<16x3xf32> to vector<16x1xf32>
    %500 = vector.broadcast %499 : vector<16x1xf32> to vector<16x16xf32>
    %501 = vector.broadcast %498 : vector<1x16xf32> to vector<16x16xf32>
    %502 = arith.addf %500, %501 : vector<16x16xf32>
    %cst_113 = arith.constant 0.000000e+00 : f32
    %503 = vector.broadcast %cst_113 : f32 to vector<16x16xf32>
    %504 = arith.cmpf ogt, %502, %503 : vector<16x16xf32>
    %cst_114 = arith.constant 2.000000e-01 : f32
    %505 = vector.broadcast %cst_114 : f32 to vector<16x16xf32>
    %506 = arith.mulf %505, %502 : vector<16x16xf32>
    %507 = arith.select %504, %502, %506 : vector<16x16xi1>, vector<16x16xf32>
    %cst_115 = arith.constant dense<0xFF800000> : vector<16xf32>
    %508 = vector.multi_reduction <maximumf>, %507, %cst_115 [1] : vector<16x16xf32> to vector<16xf32>
    %509 = vector.shape_cast %508 : vector<16xf32> to vector<16x1xf32>
    %510 = vector.broadcast %509 : vector<16x1xf32> to vector<16x16xf32>
    %511 = arith.subf %507, %510 : vector<16x16xf32>
    %512 = math.exp %511 : vector<16x16xf32>
    %cst_116 = arith.constant dense<0.000000e+00> : vector<16xf32>
    %513 = vector.multi_reduction <add>, %512, %cst_116 [1] : vector<16x16xf32> to vector<16xf32>
    %514 = vector.shape_cast %513 : vector<16xf32> to vector<16x1xf32>
    %515 = tpu.reciprocal %514 {approx = true} : vector<16x1xf32> -> vector<16x1xf32>
    %516 = vector.broadcast %515 : vector<16x1xf32> to vector<16x16xf32>
    %517 = arith.mulf %512, %516 : vector<16x16xf32>
    %518 = vector.broadcast %496 : vector<16x1xf32> to vector<16x16xf32>
    %519 = arith.mulf %518, %517 : vector<16x16xf32>
    %c0_117 = arith.constant 0 : index
    %c0_118 = arith.constant 0 : index
    %c0_119 = arith.constant 0 : index
    %520 = vector.load %arg9[%c0_117, %c0_118, %c0_119] : memref<1x16x1xf32, #tpu.memory_space<vmem>>, vector<1x16x1xf32>
    %521 = vector.shape_cast %520 : vector<1x16x1xf32> to vector<16x1xf32>
    %522 = vector.shape_cast %496 : vector<16x1xf32> to vector<1x16x1xf32>
    tpu.vector_store %arg9[%c0_117, %c0_118, %c0_119], %522 {strides = array<i32>} : memref<1x16x1xf32, #tpu.memory_space<vmem>>, vector<1x16x1xf32>,
    %c0_120 = arith.constant 0 : index
    %c0_121 = arith.constant 0 : index
    %c0_122 = arith.constant 0 : index
    %523 = vector.load %arg10[%c0_120, %c0_121, %c0_122] : memref<1x16x16xf32, #tpu.memory_space<vmem>>, vector<1x16x16xf32>
    %524 = vector.shape_cast %523 : vector<1x16x16xf32> to vector<16x16xf32>
    %525 = vector.shape_cast %519 : vector<16x16xf32> to vector<1x16x16xf32>
    tpu.vector_store %arg10[%c0_120, %c0_121, %c0_122], %525 {strides = array<i32>} : memref<1x16x16xf32, #tpu.memory_space<vmem>>, vector<1x16x16xf32>,
    return
  }
  func.func @transform_0(%arg0: i32) -> (i32, i32, i32) {
    %c0_i32 = arith.constant 0 : i32
    %c0_i32_0 = arith.constant 0 : i32
    %c0_i32_1 = arith.constant 0 : i32
    return %arg0, %c0_i32, %c0_i32_0 : i32, i32, i32
  }
  func.func @transform_1(%arg0: i32) -> (i32, i32, i32) {
    %c0_i32 = arith.constant 0 : i32
    %c0_i32_0 = arith.constant 0 : i32
    %c0_i32_1 = arith.constant 0 : i32
    return %arg0, %c0_i32, %c0_i32_0 : i32, i32, i32
  }
  func.func @transform_2(%arg0: i32) -> (i32, i32) {
    %c0_i32 = arith.constant 0 : i32
    %c0_i32_0 = arith.constant 0 : i32
    %c0_i32_1 = arith.constant 0 : i32
    return %c0_i32, %c0_i32_0 : i32, i32
  }
  func.func @transform_3(%arg0: i32) -> (i32, i32) {
    %c0_i32 = arith.constant 0 : i32
    %c0_i32_0 = arith.constant 0 : i32
    %c0_i32_1 = arith.constant 0 : i32
    return %c0_i32, %c0_i32_0 : i32, i32
  }
  func.func @transform_4(%arg0: i32) -> (i32, i32) {
    %c0_i32 = arith.constant 0 : i32
    %c0_i32_0 = arith.constant 0 : i32
    %c0_i32_1 = arith.constant 0 : i32
    return %c0_i32, %c0_i32_0 : i32, i32
  }
  func.func @transform_5(%arg0: i32) -> (i32, i32) {
    %c0_i32 = arith.constant 0 : i32
    %c0_i32_0 = arith.constant 0 : i32
    %c0_i32_1 = arith.constant 0 : i32
    return %c0_i32, %c0_i32_0 : i32, i32
  }
  func.func @transform_6(%arg0: i32) -> (i32, i32) {
    %c0_i32 = arith.constant 0 : i32
    %c0_i32_0 = arith.constant 0 : i32
    %c0_i32_1 = arith.constant 0 : i32
    return %c0_i32, %c0_i32_0 : i32, i32
  }
  func.func @transform_7(%arg0: i32) -> i32 {
    %c0_i32 = arith.constant 0 : i32
    %c0_i32_0 = arith.constant 0 : i32
    return %c0_i32 : i32
  }
  func.func @transform_8(%arg0: i32) -> (i32, i32, i32) {
    %c0_i32 = arith.constant 0 : i32
    %c0_i32_0 = arith.constant 0 : i32
    %c0_i32_1 = arith.constant 0 : i32
    return %arg0, %c0_i32, %c0_i32_0 : i32, i32, i32
  }
  func.func @transform_9(%arg0: i32) -> (i32, i32, i32) {
    %c0_i32 = arith.constant 0 : i32
    %c0_i32_0 = arith.constant 0 : i32
    %c0_i32_1 = arith.constant 0 : i32
    return %arg0, %c0_i32, %c0_i32_0 : i32, i32, i32
  }
}

</mosaic_0001>

<bundles_post_ra>
// kernel: tpu_custom_call.1
= control target key start
LH: loop header
LB: loop body
LE: loop exit
PB: predicated region body
PF: predicated region fallthrough
CT: control target
= control target key end

     0   :  { %s3799_s0 = inlined_call_operand.vmem [shape: f32[2,192,30], index: 0, kind: input, shape index: {}]   ;;  %s3800_s1 = inlined_call_operand.vmem [shape: f32[2,16,28], index: 1, kind: input, shape index: {}]   ;;  %s3801_s2 = inlined_call_operand.vmem [shape: f32[16,16], index: 2, kind: input, shape index: {}]   ;;  %s3802_s3 = inlined_call_operand.vmem [shape: f32[30,10], index: 3, kind: input, shape index: {}]   ;;  %s3803_s4 = inlined_call_operand.vmem [shape: f32[28,32], index: 4, kind: input, shape index: {}]   ;;  %s3804_s5 = inlined_call_operand.vmem [shape: f32[1,32], index: 5, kind: input, shape index: {}]   ;;  %s3805_s6 = inlined_call_operand.vmem [shape: f32[8,3], index: 6, kind: input, shape index: {}]   ;;  %s3806_s7 = inlined_call_operand.<no memory space> [shape: f32[1], index: 7, kind: input, shape index: {}]   ;;  %s3807_s8 = inlined_call_operand.vmem [shape: f32[2,16,1], index: 8, kind: output, shape index: {0}]   ;;  %s3808_s9 = inlined_call_operand.hbm [shape: f32[2,16,16], index: 9, kind: output, shape index: {1}]  }
   0x1   :  { %15 = sst [smem:[#allocation2]] %s3806_s7 }
   0x2   :  { %16 = vsyncpa [#allocation4], 0 }
   0x3   :  { %18 = vsyncpa [#allocation4 + $0x1], 0  ;;  %s2889_s11 = smov 0   ;;  %s2891_s12 = smov 0  }
   0x4   :  { %s2893_s13 = smov 0   ;;  %s2895_s14 = smov 0  }
   0x5 LB: > { %s2910_s7 = sadd.s32 4294967295, %s2817_s14   ;;  %s2425_s15 = sadd.s32 4294967294, %s2817_s14   ;;  %s2817_s14 = sphi %s2895_s14, %s3814_s14   ;;  %s2813_s13 = sphi %s2893_s13, %s3813_s13   ;;  %s2809_s12 = sphi %s2891_s12, %s3812_s12   ;;  %s2805_s11 = sphi %s2889_s11, %s3811_s11  }
   0x6   : > { %s2914_s16 = sadd.s32 1, %s2817_s14   ;;  %s235_s17 = sadd.s32 1, %s2813_s13 }
   0x7   : > { %s232_s18 = ssub.s32 %s2817_s14, %s2914_s16  ;;  %p245_p0 = scmp.ne.s32.totalorder %s2813_s13, %s2809_s12 }
   0x8   : > { %p233_p1 = scmp.eq.s32.totalorder %s232_s18, 0  ;;  %p246_p2 = scmp.eq.s32.totalorder %s2910_s7, 1 }
   0x9   : > { %p251_p3 = scmp.ne.s32.totalorder %s2809_s12, %s2805_s11  ;;  %p252_p4 = scmp.eq.s32.totalorder %s2425_s15, 1 }
   0xa   : > { %s2925_s19 = scalar_select %p233_p1, %s2813_s13, %s235_s17  }
   0xb   : > { %p2927_p5 = por %p246_p2, %p245_p0  ;;  %p2931_p6 = por %p252_p4, %p251_p3 }
   0xc   : > { %p2428_p7 = scmp.ge.s32.totalorder %s2817_s14, 1  ;;  %p304_p8 = scmp.lt.s32.totalorder %s2817_s14, 3 }
   0xe   : > { %p305_p9 = pnand %p2428_p7, %p304_p8 }
   0xf   : > { %p350_p10 = scmp.lt.s32.totalorder (!%p305_p9), %s2910_s7, 1  ;;  %s2822_s28 = smov (!%p305_p9), 16  }
  0x10   : > { %308 = sbr.rel (%p305_p9) target bundleno = 2859 (0xb2b), region = 52  ;;  %s2823_s29 = smov (!%p305_p9), 48  }
  0x11   : > { %s2824_s15 = smov (!%p305_p9), 119   ;;  %s2826_s22 = smov (!%p305_p9), 80  }
  0x12   : > { %s2827_s23 = smov (!%p305_p9), 112   ;;  %s2828_s24 = smov (!%p305_p9), 64  }
  0x13   : > { %s2829_s25 = smov (!%p305_p9), 96   ;;  %s2832_s10 = smov (!%p305_p9), 126  }
  0x15   : > { %v376_v0 = vld [vmem:[%s3803_s4 + $0x18] sm:$0xf]  ;;  %vm388_vm0 = vcmask 1043456   ;;  %vm516_vm1 = vcmask 1045504   ;;  %v375_v2 = vld [vmem:[%s3803_s4 + $0x10] sm:$0xff]  ;;  %v374_v4 = vld [vmem:[%s3803_s4 + $0x8] sm:$0xff] }
  0x16   : > { %v442_v1 = vld [vmem:[%s3802_s3 + $0x18] sm:$0x3f]  ;;  %2435 = vmatpush.msk.msra.mxu0 %vm388_vm0, %v376_v0  ;;  %v441_v3 = vld [vmem:[%s3802_s3 + $0x10] sm:$0xff]  ;;  %v440_v5 = vld [vmem:[%s3802_s3 + $0x8] sm:$0xff]  ;;  %s2960_s18 = scalar_select %p350_p10, %s2910_s7, 1  ;;  %vm381_vm2 = vcmask 228352  }
  0x17   : > { %2497 = vmatpush.msk.msra.mxu1 %vm516_vm1, %v442_v1  ;;  %2498 = vmatpush.msk.msra.mxu2 %vm516_vm1, %v442_v1  ;;  %v373_v6 = vld [vmem:[%s3803_s4] sm:$0xff]  ;;  %vm443_vm3 = vcmask 244736   ;;  %v2819_v30 = vmov 8   ;;  %v2820_v31 = vmov -9e+15   ;;  %v366_v33 = vld [vmem:[%s3801_s2 + $0x8] sm:$0xff] }
  0x18   : > { %2499 = vmatpush.msk.msra.mxu3 %vm516_vm1, %v442_v1  ;;  %405 = vmatpush.msra.mxu0 %v375_v2  ;;  %v439_v7 = vld [vmem:[%s3802_s3] sm:$0xff]  ;;  %s2509_s26 = smul.u32 192, %s2960_s18  ;;  %s2494_s27 = sshll.u32 %s2960_s18, 4  ;;  %vm370_vm5 = vcmp.gt.f32.partialorder %v366_v33, 0.0  ;;  %vm788_vm7 = vcmask 130048   ;;  %vm877_vm10 = vcmask 261248  }
  0x19   : > { %2500 = vmatpush.msra.mxu1 %v441_v3  ;;  %2501 = vmatpush.msra.mxu2 %v441_v3  ;;  %s359_s30 = scalar_lea.vmem %s3800_s1, %s2494_s27  ;;  %v365_v29 = vld [vmem:[%s3801_s2] sm:$0xff]  ;;  %v3035_v35 = vsel %vm370_vm5, 0.0, %v2820_v31  ;;  %vm975_vm12 = vcmask 392448   ;;  %vm1073_vm14 = vcmask 523648   ;;  %vm1249_vm5 = vcmask 654848   ;;  %s347_s18 = sand.u32 1, %s2809_s12  }
  0x1a   : > { %2502 = vmatpush.msra.mxu3 %v441_v3  ;;  %406 = vmatpush.msra.mxu0 %v374_v4  ;;  %s2978_s17 = scalar_lea.vmem %s3799_s0, %s2509_s26  ;;  %v367_v8 = vld [vmem:[%s359_s30] sm:$0xff]  ;;  %v368_v12 = vld [vmem:[%s359_s30 + $0x8] sm:$0xff]  ;;  %vm369_vm4 = vcmp.gt.f32.partialorder %v365_v29, 0.0  ;;  %s2821_s26 = smov 32  }
  0x1b   : > { %2503 = vmatpush.msra.mxu1 %v440_v5  ;;  %2504 = vmatpush.msra.mxu2 %v440_v5  ;;  %v420_v9 = vld [vmem:[%s2978_s17 + $0x28] sm:$0xff]  ;;  %v433_v10 = vld [vmem:[%s2978_s17 + $0x90] sm:$0xff]  ;;  %v434_v13 = vld [vmem:[%s2978_s17 + $0x98] sm:$0xff]  ;;  %v3024_v32 = vsel %vm369_vm4, 0.0, %v2820_v31  ;;  %vm1353_vm4 = vcmask 786048   ;;  %s2196_s30 = sld [smem:[#allocation2]] }
  0x1c   : > { %2505 = vmatpush.msra.mxu3 %v440_v5  ;;  %407 = vmatpush.msra.mxu0 %v373_v6  ;;  %v436_v11 = vld [vmem:[%s2978_s17 + $0xa8] sm:$0xff]  ;;  %v421_v14 = vld [vmem:[%s2978_s17 + $0x30] sm:$0xff]  ;;  %v415_v16 = vld [vmem:[%s2978_s17] sm:$0xff] }
  0x1d   : > { %2506 = vmatpush.msra.mxu1 %v439_v7  ;;  %2507 = vmatpush.msra.mxu2 %v439_v7  ;;  %v437_v15 = vld [vmem:[%s2978_s17 + $0xb0] sm:$0xff]  ;;  %v435_v17 = vld [vmem:[%s2978_s17 + $0xa0] sm:$0xff]  ;;  %v422_v18 = vld [vmem:[%s2978_s17 + $0x38] sm:$0xff] }
  0x1e   : > { %2436 = vmatmul.msk.f32.vlgmr.msra.gmra.mxu0 %vm381_vm2, %v367_v8  ;;  %2444 = vmatmul.msk.f32.vlgmr.msra.gmra.mxu1 %vm443_vm3, %v420_v9  ;;  %v438_v19 = vld [vmem:[%s2978_s17 + $0xb8] sm:$0xff]  ;;  %v416_v20 = vld [vmem:[%s2978_s17 + $0x8] sm:$0xff]  ;;  %v423_v21 = vld [vmem:[%s2978_s17 + $0x40] sm:$0xff] }
  0x1f   : > { %2457 = vmatmul.msk.f32.vlgmr.msra.gmra.mxu2 %vm443_vm3, %v433_v10  ;;  %2508 = vmatpush.msra.mxu3 %v439_v7  ;;  %v417_v22 = vld [vmem:[%s2978_s17 + $0x10] sm:$0xff]  ;;  %v424_v23 = vld [vmem:[%s2978_s17 + $0x48] sm:$0xff]  ;;  %v418_v24 = vld [vmem:[%s2978_s17 + $0x18] sm:$0xff] }
  0x20   : > { %2438 = vmatpush.msk.msrb.mxu0 %vm516_vm1, %v442_v1  ;;  %2460 = vmatmul.msk.f32.vlgmr.msra.gmra.mxu3 %vm443_vm3, %v436_v11  ;;  %v425_v25 = vld [vmem:[%s2978_s17 + $0x50] sm:$0xff]  ;;  %v419_v26 = vld [vmem:[%s2978_s17 + $0x20] sm:$0xff]  ;;  %v426_v27 = vld [vmem:[%s2978_s17 + $0x58] sm:$0xff] }
  0x21   : > { %v427_v28 = vld [vmem:[%s2978_s17 + $0x60] sm:$0xff]  ;;  %2567 = vset.pattern.permute.xlu0 %v2819_v30  ;;  %2568 = vset.pattern.permute.xlu2 %v2819_v30  ;;  %v428_v34 = vld [vmem:[%s2978_s17 + $0x68] sm:$0xff]  ;;  %v429_v36 = vld [vmem:[%s2978_s17 + $0x70] sm:$0xff] }
  0x22   : > { %533 = vmatpush.msrb.mxu0 %v441_v3  ;;  %2569 = vset.pattern.permute.xlu1 %v2819_v30  ;;  %v430_v37 = vld [vmem:[%s2978_s17 + $0x78] sm:$0xff]  ;;  %v431_v38 = vld [vmem:[%s2978_s17 + $0x80] sm:$0xff]  ;;  %v432_v39 = vld [vmem:[%s2978_s17 + $0x88] sm:$0xff]  ;;  %s2825_s17 = smov 104  }
  0x23   : > { %967 = vrot.lane.b32.xlu1 %v3024_v32, %s2821_s26  ;;  %869 = vrot.lane.b32.xlu2 %v3024_v32, %s2822_s28  ;;  %v2574_v42 = vld [vmem:[%s3804_s5] ss:$0 sm:$0xff] }
  0x24   : > { %534 = vmatpush.msrb.mxu0 %v440_v5 }
  0x26   : > { %2437 = vmatmul.msk.f32.gmra.mxu0 %vm381_vm2, %v368_v12  ;;  %2445 = vmatmul.msk.f32.gmra.mxu1 %vm443_vm3, %v421_v14 }
  0x27   : > { %2458 = vmatmul.msk.f32.gmra.mxu2 %vm443_vm3, %v434_v13  ;;  %535 = vmatpush.msrb.mxu0 %v439_v7 }
  0x28   : > { %2461 = vmatmul.msk.f32.gmra.mxu3 %vm443_vm3, %v437_v15 }
  0x2b   : > { %969 = vrot.lane.b32.xlu1 %v3035_v35, %s2821_s26  ;;  %871 = vrot.lane.b32.xlu2 %v3035_v35, %s2822_s28 }
  0x2e   : > { %2439 = vmatmul.msk.f32.vlgmr.msrb.gmra.mxu0 %vm443_vm3, %v415_v16  ;;  %2446 = vmatmul.msk.f32.gmra.mxu1 %vm443_vm3, %v422_v18 }
  0x2f   : > { %2459 = vmatmul.msk.f32.gmra.mxu2 %vm443_vm3, %v435_v17 }
  0x30   : > { %2462 = vmatmul.msk.f32.gmra.mxu3 %vm443_vm3, %v438_v19 }
  0x33   : > { %1065 = vrot.lane.b32.xlu1 %v3024_v32, %s2823_s29 }
  0x36   : > { %2440 = vmatmul.msk.f32.gmra.mxu0 %vm443_vm3, %v416_v20  ;;  %2447 = vmatmul.msk.f32.gmra.mxu1 %vm443_vm3, %v423_v21 }
  0x3b   : > { %1067 = vrot.lane.b32.xlu1 %v3035_v35, %s2823_s29 }
  0x3e   : > { %2441 = vmatmul.msk.f32.gmra.mxu0 %vm443_vm3, %v417_v22  ;;  %2448 = vmatmul.msk.f32.gmra.mxu1 %vm443_vm3, %v424_v23 }
  0x46   : > { %2442 = vmatmul.msk.f32.gmra.mxu0 %vm443_vm3, %v418_v24  ;;  %2449 = vmatmul.msk.f32.gmra.mxu1 %vm443_vm3, %v425_v25 }
  0x4e   : > { %2443 = vmatmul.msk.f32.gmra.mxu0 %vm443_vm3, %v419_v26  ;;  %2450 = vmatmul.msk.f32.gmra.mxu1 %vm443_vm3, %v426_v27 }
  0x56   : > { %2451 = vmatmul.msk.f32.gmra.mxu1 %vm443_vm3, %v427_v28 }
  0x5e   : > { %2452 = vmatmul.msk.f32.gmra.mxu1 %vm443_vm3, %v428_v34 }
  0x66   : > { %2453 = vmatmul.msk.f32.gmra.mxu1 %vm443_vm3, %v429_v36 }
  0x6e   : > { %2454 = vmatmul.msk.f32.gmra.mxu1 %vm443_vm3, %v430_v37 }
  0x76   : > { %2455 = vmatmul.msk.f32.gmra.mxu1 %vm443_vm3, %v431_v38 }
  0x7d   : > { %v3130_v3 = vpop.permute.xlu2 %869 }
  0x7e   : > { %2456 = vmatmul.msk.f32.gmra.mxu1 %vm443_vm3, %v432_v39 }
  0x85   : > { %v3138_v6 = vpop.permute.xlu2 %871 }
  0x95   : > { %v3132_v4 = vpop.permute.xlu1 %967 }
  0x9b   : > { %v409_v40 = vpop.f32.mrf.mxu0  ;;  %v552_v41 = vpop.f32.mrf.mxu1 }
  0x9c   : > { %956 = vperm.xlu0 %2567, %v552_v41   ;;  %643 = vrot.lane.b32.xlu2 %v552_v41, %s2824_s15  ;;  %v3057_v43 = vadd.f32 %v2574_v42, %v409_v40 }
  0x9d   : > { %v3140_v7 = vpop.permute.xlu1 %969 }
  0xa2   : > { %v3059_v44 = vpop.f32.mrf.mxu2 }
  0xa3   : > { %v412_v45 = vpop.f32.mrf.mxu0  ;;  %v555_v47 = vpop.f32.mrf.mxu1 }
  0xa4   : > { %v3061_v46 = vadd.f32 %v2574_v42, %v412_v45  ;;  %669 = vrot.lane.b32.xlu0 %v3059_v44, %s2824_s15  ;;  %1209 = vrot.lane.b32.xlu2 %v3057_v43, %s2825_s17  ;;  %v3067_v48 = vpop.f32.mrf.mxu3 }
  0xa5   : > { %v3148_v10 = vpop.permute.xlu1 %1065 }
  0xaa   : > { %v3069_v49 = vpop.f32.mrf.mxu2 }
  0xab   : > { %671 = vrot.lane.b32.xlu1 %v3069_v49, %s2824_s15  ;;  %v537_v50 = vpop.f32.mrf.mxu0  ;;  %v558_v51 = vpop.f32.mrf.mxu1 }
  0xac   : > { %675 = vrot.lane.b32.xlu0 %v3067_v48, %s2824_s15  ;;  %770 = vperm.xlu2 %2568, %v537_v50   ;;  %v3075_v52 = vpop.f32.mrf.mxu3 }
  0xad   : > { %v3154_v13 = vpop.permute.xlu1 %1067 }
  0xb2   : > { %v3077_v53 = vpop.f32.mrf.mxu2 }
  0xb3   : > { %677 = vrot.lane.b32.xlu1 %v3075_v52, %s2824_s15  ;;  %v540_v54 = vpop.f32.mrf.mxu0  ;;  %v3084_v55 = vpop.f32.mrf.mxu1 }
  0xb4   : > { %831 = vmatpush.msrb.mxu2 %v540_v54  ;;  %645 = vrot.lane.b32.xlu0 %v555_v47, %s2824_s15  ;;  %v3086_v56 = vpop.f32.mrf.mxu3 }
  0xb5   : > { %673 = vrot.lane.b32.xlu2 %v3077_v53, %s2824_s15 }
  0xb6   : > { %832 = vmatpush.msrb.mxu2 %v537_v50 }
  0xb8   : > { %1030 = vmatpush.msra.mxu2 %v552_v41 }
  0xbb   : > { %647 = vrot.lane.b32.xlu1 %v558_v51, %s2824_s15  ;;  %v543_v57 = vpop.f32.mrf.mxu0  ;;  %v3091_v58 = vpop.f32.mrf.mxu1 }
  0xbc   : > { %1050 = vperm.xlu0 %2567, %v555_v47   ;;  %1304 = vmatpush.msra.mxu0 %v3091_v58 }
  0xbd   : > { %679 = vrot.lane.b32.xlu2 %v3086_v56, %s2824_s15 }
  0xbe   : > { %1305 = vmatpush.msra.mxu0 %v3084_v55 }
  0xc3   : > { %1054 = vperm.xlu1 %2569, %v558_v51   ;;  %v546_v59 = vpop.f32.mrf.mxu0  ;;  %v3098_v60 = vpop.f32.mrf.mxu1 }
  0xc4   : > { %932 = vmatpush.msrb.mxu3 %v546_v59  ;;  %633 = vrot.lane.b32.xlu0 %v537_v50, %s2824_s15 }
  0xc5   : > { %649 = vrot.lane.b32.xlu2 %v3084_v55, %s2824_s15 }
  0xc6   : > { %933 = vmatpush.msrb.mxu3 %v543_v57 }
  0xc8   : > { %1128 = vmatpush.msra.mxu3 %v558_v51 }
  0xca   : > { %1129 = vmatpush.msra.mxu3 %v555_v47 }
  0xcb   : > { %637 = vrot.lane.b32.xlu1 %v543_v57, %s2824_s15  ;;  %v549_v61 = vpop.f32.mrf.mxu0  ;;  %v3102_v62 = vpop.f32.mrf.mxu1 }
  0xcc   : > { %1031 = vmatpush.msra.mxu2 %v549_v61  ;;  %635 = vrot.lane.b32.xlu0 %v540_v54, %s2824_s15 }
  0xcd   : > { %774 = vperm.xlu2 %2568, %v540_v54  }
  0xd3   : > { %639 = vrot.lane.b32.xlu1 %v546_v59, %s2824_s15  ;;  %v3105_v63 = vpop.f32.mrf.mxu1 }
  0xd4   : > { %651 = vrot.lane.b32.xlu0 %v3091_v58, %s2824_s15 }
  0xd5   : > { %852 = vperm.xlu2 %2568, %v543_v57  }
  0xdb   : > { %653 = vrot.lane.b32.xlu1 %v3098_v60, %s2824_s15  ;;  %v3111_v0 = vpop.f32.mrf.mxu1 }
  0xdc   : > { %657 = vrot.lane.b32.xlu0 %v3105_v63, %s2824_s15 }
  0xdd   : > { %641 = vrot.lane.b32.xlu2 %v549_v61, %s2824_s15 }
  0xe3   : > { %856 = vperm.xlu1 %2569, %v546_v59   ;;  %v3116_v1 = vpop.f32.mrf.mxu1 }
  0xe5   : > { %655 = vrot.lane.b32.xlu2 %v3102_v62, %s2824_s15 }
  0xeb   : > { %952 = vperm.xlu1 %2569, %v549_v61   ;;  %v3120_v2 = vpop.f32.mrf.mxu1 }
  0xec   : > { %1604 = vmatpush.msrb.mxu0 %v3120_v2  ;;  %663 = vrot.lane.b32.xlu0 %v3120_v2, %s2824_s15 }
  0xed   : > { %661 = vrot.lane.b32.xlu2 %v3116_v1, %s2824_s15 }
  0xee   : > { %1605 = vmatpush.msrb.mxu0 %v3116_v1 }
  0xf3   : > { %1211 = vrot.lane.b32.xlu1 %v3061_v46, %s2825_s17  ;;  %v3134_v5 = vpop.f32.mrf.mxu1 }
  0xf6   : > { %v644_v9 = vpop.permute.xlu2 %643 }
  0xfb   : > { %659 = vrot.lane.b32.xlu1 %v3111_v0, %s2824_s15  ;;  %v3142_v8 = vpop.f32.mrf.mxu1 }
  0xfc   : > { %667 = vrot.lane.b32.xlu2 %v3142_v8, %s2824_s15 }
  0xfe   : > { %v3152_v12 = vpop.permute.xlu2 %1209 }
 0x103   : > { %665 = vrot.lane.b32.xlu1 %v3134_v5, %s2824_s15 }
 0x106   : > { %v771_v15 = vpop.permute.xlu2 %770 }
 0x10e   : > { %v3150_v11 = vpop.permute.xlu0 %956 }
 0x10f   : > { %v674_v19 = vpop.permute.xlu2 %673 }
 0x116   : > { %v670_v14 = vpop.permute.xlu0 %669 }
 0x117   : > { %v680_v23 = vpop.permute.xlu2 %679 }
 0x11d   : > { %v672_v16 = vpop.permute.xlu1 %671 }
 0x11e   : > { %v676_v17 = vpop.permute.xlu0 %675 }
 0x11f   : > { %v650_v26 = vpop.permute.xlu2 %649 }
 0x125   : > { %v678_v18 = vpop.permute.xlu1 %677 }
 0x126   : > { %v646_v20 = vpop.permute.xlu0 %645 }
 0x127   : > { %v775_v29 = vpop.permute.xlu2 %774 }
 0x12d   : > { %v648_v21 = vpop.permute.xlu1 %647 }
 0x12e   : > { %v3156_v22 = vpop.permute.xlu0 %1050 }
 0x12f   : > { %v853_v33 = vpop.permute.xlu2 %852 }
 0x135   : > { %v3158_v24 = vpop.permute.xlu1 %1054 }
 0x136   : > { %v634_v25 = vpop.permute.xlu0 %633 }
 0x137   : > { %705 = vxpose.xlu0.b32.start [1/16] (narrow) %v634_v25, 8  ;;  %v642_v36 = vpop.permute.xlu2 %641 }
 0x13d   : > { %v638_v27 = vpop.permute.xlu1 %637 }
 0x13e   : > { %v636_v28 = vpop.permute.xlu0 %635 }
 0x13f   : > { %706 = vxpose.xlu0.b32.cont [2/16] (narrow) %v636_v28, 8  ;;  %v656_v39 = vpop.permute.xlu2 %655 }
 0x145   : > { %v640_v30 = vpop.permute.xlu1 %639 }
 0x146   : > { %v652_v47 = vpop.permute.xlu0 %651 }
 0x147   : > { %707 = vxpose.xlu0.b32.cont [3/16] (narrow) %v638_v27, 8  ;;  %v662_v41 = vpop.permute.xlu2 %661 }
 0x14d   : > { %v654_v31 = vpop.permute.xlu1 %653 }
 0x14e   : > { %v658_v50 = vpop.permute.xlu0 %657 }
 0x14f   : > { %708 = vxpose.xlu0.b32.cont [4/16] (narrow) %v640_v30, 8 }
 0x155   : > { %v3160_v34 = vpop.permute.xlu1 %856 }
 0x156   : > { %v668_v45 = vpop.permute.xlu2 %667 }
 0x157   : > { %709 = vxpose.xlu0.b32.cont [5/16] (narrow) %v642_v36, 8 }
 0x15d   : > { %v3162_v37 = vpop.permute.xlu1 %952 }
 0x15e   : > { %v664_v51 = vpop.permute.xlu0 %663 }
 0x15f   : > { %710 = vxpose.xlu0.b32.cont [6/16] (narrow) %v644_v9, 8 }
 0x165   : > { %v3164_v38 = vpop.permute.xlu1 %1211 }
 0x167   : > { %711 = vxpose.xlu0.b32.cont [7/16] (narrow) %v646_v20, 8 }
 0x16d   : > { %v660_v40 = vpop.permute.xlu1 %659 }
 0x16f   : > { %712 = vxpose.xlu0.b32.cont [8/16] (narrow) %v648_v21, 8 }
 0x175   : > { %v666_v42 = vpop.permute.xlu1 %665 }
 0x176   : > { %737 = vxpose.xlu1.b32.start [1/8] (short) (narrow) %v666_v42, 8 }
 0x177   : > { %713 = vxpose.xlu0.b32.cont [9/16] (narrow) %v650_v26, 8 }
 0x17e   : > { %738 = vxpose.xlu1.b32.cont [2/8] (short) (narrow) %v668_v45, 8 }
 0x17f   : > { %714 = vxpose.xlu0.b32.cont [10/16] (narrow) %v652_v47, 8 }
 0x186   : > { %739 = vxpose.xlu1.b32.cont [3/8] (short) (narrow) %v670_v14, 8 }
 0x187   : > { %715 = vxpose.xlu0.b32.cont [11/16] (narrow) %v654_v31, 8 }
 0x18e   : > { %740 = vxpose.xlu1.b32.cont [4/8] (short) (narrow) %v672_v16, 8 }
 0x18f   : > { %716 = vxpose.xlu0.b32.cont [12/16] (narrow) %v656_v39, 8 }
 0x196   : > { %741 = vxpose.xlu1.b32.cont [5/8] (short) (narrow) %v674_v19, 8 }
 0x197   : > { %717 = vxpose.xlu0.b32.cont [13/16] (narrow) %v658_v50, 8 }
 0x19e   : > { %742 = vxpose.xlu1.b32.cont [6/8] (short) (narrow) %v676_v17, 8 }
 0x19f   : > { %718 = vxpose.xlu0.b32.cont [14/16] (narrow) %v660_v40, 8 }
 0x1a6   : > { %743 = vxpose.xlu1.b32.cont [7/8] (short) (narrow) %v678_v18, 8 }
 0x1a7   : > { %719 = vxpose.xlu0.b32.cont [15/16] (narrow) %v662_v41, 8 }
 0x1ae   : > { %744 = vxpose.xlu1.b32.end [8/8] (short) (narrow) %v680_v23, 8 }
 0x1af   : > { %720 = vxpose.xlu0.b32.end [16/16] (narrow) %v664_v51, 8 }
 0x1db   : > { %v721_v54 = vpop.trf.xlu0 }
 0x1dc   : > { %v3166_v57 = vperm.slane %v721_v54, 0 }
 0x1de   : > { %v778_v59 = vadd.f32 %v3166_v57, %v771_v15  ;;  %v779_v61 = vadd.f32 %v3166_v57, %v775_v29  ;;  %v859_v20 = vadd.f32 %v853_v33, %v3166_v57  ;;  %v960_v26 = vadd.f32 %v3150_v11, %v3166_v57 }
 0x1df   : > { %v1057_v31 = vadd.f32 %v3156_v22, %v3166_v57  ;;  %v959_v39 = vadd.f32 %v3162_v37, %v3166_v57  ;;  %v860_v37 = vadd.f32 %v3160_v34, %v3166_v57 }
 0x1e0   : > { %vm780_vm6 = vcmp.gt.f32.partialorder %v778_v59, 0.0  ;;  %v782_v9 = vmul.f32 0.2, %v778_v59  ;;  %v783_v16 = vmul.f32 0.2, %v779_v61  ;;  %vm781_vm8 = vcmp.gt.f32.partialorder %v779_v61, 0.0 }
 0x1e1   : > { %v863_v21 = vmul.f32 0.2, %v859_v20  ;;  %vm861_vm9 = vcmp.gt.f32.partialorder %v859_v20, 0.0  ;;  %v964_v28 = vmul.f32 0.2, %v960_v26  ;;  %vm962_vm11 = vcmp.gt.f32.partialorder %v960_v26, 0.0 }
 0x1e2   : > { %v784_v14 = vsel %vm780_vm6, %v778_v59, %v782_v9  ;;  %v785_v19 = vsel %vm781_vm8, %v779_v61, %v783_v16  ;;  %v1061_v36 = vmul.f32 0.2, %v1057_v31  ;;  %vm1059_vm13 = vcmp.gt.f32.partialorder %v1057_v31, 0.0 }
 0x1e3   : > { %v3171_v17 = vadd.f32 %v784_v14, %v3024_v32  ;;  %v3177_v15 = vadd.f32 %v785_v19, %v3035_v35  ;;  %v865_v25 = vsel %vm861_vm9, %v859_v20, %v863_v21  ;;  %v966_v30 = vsel %vm962_vm11, %v960_v26, %v964_v28 }
 0x1e4   : > { %v3184_v27 = vadd.f32 %v3130_v3, %v865_v25  ;;  %v3191_v33 = vadd.f32 %v3140_v7, %v966_v30  ;;  %v1063_v40 = vsel %vm1059_vm13, %v1057_v31, %v1061_v36  ;;  %v963_v42 = vmul.f32 0.2, %v959_v39 }
 0x1e5   : > { %v789_v18 = vsel %vm788_vm7, %v3171_v17, -inf  ;;  %v792_v23 = vsel %vm788_vm7, %v3177_v15, -inf  ;;  %v3198_v41 = vadd.f32 %v3148_v10, %v1063_v40  ;;  %vm961_vm15 = vcmp.gt.f32.partialorder %v959_v39, 0.0 }
 0x1e6   : > { %790 = vmax.xlane.f32.xlu2 %v789_v18  ;;  %v878_v29 = vsel %vm877_vm10, %v3184_v27, -inf  ;;  %v979_v11 = vsel %vm975_vm12, %v3191_v33, -inf  ;;  %v965_v45 = vsel %vm961_vm15, %v959_v39, %v963_v42  ;;  %v864_v51 = vmul.f32 0.2, %v860_v37 }
 0x1e7   : > { %v1074_v22 = vsel %vm1073_vm14, %v3198_v41, -inf  ;;  %v3203_v47 = vadd.f32 %v3132_v4, %v965_v45  ;;  %vm862_vm0 = vcmp.gt.f32.partialorder %v860_v37, 0.0  ;;  %v1058_v59 = vadd.f32 %v3158_v24, %v3166_v57 }
 0x1e8   : > { %v866_v54 = vsel %vm862_vm0, %v860_v37, %v864_v51  ;;  %vm1549_vm9 = vcmask 1048448   ;;  %vm1451_vm15 = vcmask 917248  }
 0x1e9   : > { %v976_v50 = vsel %vm975_vm12, %v3203_v47, -inf  ;;  %v3212_v61 = vadd.f32 %v3138_v6, %v866_v54  ;;  %v1062_v9 = vmul.f32 0.2, %v1058_v59  ;;  %vm1060_vm1 = vcmp.gt.f32.partialorder %v1058_v59, 0.0 }
 0x1eb   : > { %v881_v14 = vsel %vm877_vm10, %v3212_v61, -inf  ;;  %v1064_v16 = vsel %vm1060_vm1, %v1058_v59, %v1062_v9 }
 0x1ec   : > { %v3218_v34 = vadd.f32 %v3154_v13, %v1064_v16 }
 0x1ee   : > { %793 = vmax.xlane.f32.xlu2 %v792_v23  ;;  %v1077_v24 = vsel %vm1073_vm14, %v3218_v34, -inf }
 0x1f6   : > { %879 = vmax.xlane.f32.xlu2 %v878_v29 }
 0x1fe   : > { %980 = vmax.xlane.f32.xlu2 %v979_v11 }
 0x206   : > { %1075 = vmax.xlane.f32.xlu2 %v1074_v22 }
 0x20e   : > { %977 = vmax.xlane.f32.xlu1 %v976_v50 }
 0x21e   : > { %1230 = vperm.xlu2 %2568, %v3091_v58  }
 0x220   : > { %882 = vmax.xlane.f32.xlu0 %v881_v14 }
 0x226   : > { %1526 = vperm.xlu2 %2568, %v3116_v1   ;;  %v3247_v1 = vpop.trf.xlu1 }
 0x227   : > { %1345 = vrot.lane.b32.xlu1 %v3024_v32, %s2826_s22 }
 0x228   : > { %1078 = vmax.xlane.f32.xlu0 %v1077_v24 }
 0x22e   : > { %1530 = vperm.xlu2 %2568, %v3120_v2  }
 0x22f   : > { %1347 = vrot.lane.b32.xlu1 %v3035_v35, %s2826_s22 }
 0x236   : > { %1543 = vrot.lane.b32.xlu2 %v3035_v35, %s2827_s23 }
 0x237   : > { %1443 = vrot.lane.b32.xlu1 %v3024_v32, %s2829_s25 }
 0x23c   : > { %1226 = vperm.xlu0 %2567, %v3084_v55  }
 0x23e   : > { %1966 = vperm.xlu2 %2568, %v3086_v56  }
 0x23f   : > { %1445 = vrot.lane.b32.xlu1 %v3035_v35, %s2829_s25 }
 0x244   : > { %1330 = vperm.xlu0 %2567, %v3098_v60  }
 0x24c   : > { %1241 = vrot.lane.b32.xlu0 %v3024_v32, %s2828_s24 }
 0x254   : > { %1243 = vrot.lane.b32.xlu0 %v3035_v35, %s2828_s24 }
 0x259   : > { %v3249_v19 = vpop.xlane.xlu2 %790 }
 0x25c   : > { %1541 = vrot.lane.b32.xlu0 %v3024_v32, %s2827_s23 }
 0x261   : > { %v3255_v31 = vpop.xlane.xlu2 %793 }
 0x269   : > { %v880_v22 = vpop.xlane.xlu2 %879 }
 0x26a   : > { %v884_v45 = vsub.f32 %v3184_v27, %v880_v22 }
 0x26c   : > { %v886_v50 = vmul.f32 1.442695, %v884_v45 }
 0x26e   : > { %2575 = vpow2.f32 %v886_v50 }
 0x271   : > { %v3278_v59 = vpop.xlane.xlu2 %980 }
 0x274   : > { %v3265_v37 = vpop.eup %2575 }
 0x279   : > { %v3280_v9 = vpop.xlane.xlu2 %1075 }
 0x281   : > { %v978_v18 = vpop.xlane.xlu1 %977  ;;  %v1231_v14 = vpop.permute.xlu2 %1230 }
 0x282   : > { %v982_v51 = vsub.f32 %v3203_v47, %v978_v18  ;;  %v1234_v16 = vadd.f32 %v1231_v14, %v3166_v57 }
 0x284   : > { %v984_v54 = vmul.f32 1.442695, %v982_v51  ;;  %vm1236_vm6 = vcmp.gt.f32.partialorder %v1234_v16, 0.0 }
 0x286   : > { %2577 = vpow2.f32 %v984_v54 }
 0x28c   : > { %v3274_v27 = vpop.eup %2577 }
 0x293   : > { %v3243_v55 = vpop.xlane.xlu0 %882 }
 0x299   : > { %v1346_v26 = vpop.permute.xlu1 %1345 }
 0x29b   : > { %v3245_v58 = vpop.xlane.xlu0 %1078 }
 0x2a1   : > { %v1348_v22 = vpop.permute.xlu1 %1347 }
 0x2ae   : > { %v1227_v2 = vpop.permute.xlu0 %1226 }
 0x2af   : > { %v1233_v20 = vadd.f32 %v1227_v2, %v3166_v57  ;;  %v1238_v2 = vmul.f32 0.2, %v1234_v16 }
 0x2b1   : > { %v1237_v28 = vmul.f32 0.2, %v1233_v20  ;;  %vm1235_vm3 = vcmp.gt.f32.partialorder %v1233_v20, 0.0  ;;  %v1240_v18 = vsel %vm1236_vm6, %v1234_v16, %v1238_v2 }
 0x2b3   : > { %v1239_v36 = vsel %vm1235_vm3, %v1233_v20, %v1237_v28  ;;  %v1527_v20 = vpop.permute.xlu2 %1526 }
 0x2b4   : > { %v1533_v47 = vadd.f32 %v1527_v20, %v3166_v57 }
 0x2b6   : > { %v1331_v21 = vpop.permute.xlu0 %1330  ;;  %vm1535_vm8 = vcmp.gt.f32.partialorder %v1533_v47, 0.0 }
 0x2b7   : > { %v1337_v23 = vadd.f32 %v1331_v21, %v3166_v57 }
 0x2b9   : > { %v1341_v25 = vmul.f32 0.2, %v1337_v23  ;;  %vm1339_vm2 = vcmp.gt.f32.partialorder %v1337_v23, 0.0 }
 0x2bb   : > { %v1343_v29 = vsel %vm1339_vm2, %v1337_v23, %v1341_v25  ;;  %v1537_v23 = vmul.f32 0.2, %v1533_v47  ;;  %v1531_v45 = vpop.permute.xlu2 %1530 }
 0x2bc   : > { %v3253_v30 = vadd.f32 %v1346_v26, %v1343_v29  ;;  %v1534_v2 = vadd.f32 %v1531_v45, %v3166_v57 }
 0x2bd   : > { %v1539_v28 = vsel %vm1535_vm8, %v1533_v47, %v1537_v23  ;;  %v1444_v47 = vpop.permute.xlu1 %1443  ;;  %vm842_vm8 = vcmask 64512  }
 0x2be   : > { %v1242_v11 = vpop.permute.xlu0 %1241  ;;  %v1354_v39 = vsel %vm1353_vm4, %v3253_v30, -inf  ;;  %vm1536_vm0 = vcmp.gt.f32.partialorder %v1534_v2, 0.0 }
 0x2bf   : > { %v3259_v40 = vadd.f32 %v1242_v11, %v1239_v36  ;;  %1355 = vmax.xlane.f32.xlu0 %v1354_v39 }
 0x2c1   : > { %v1250_v42 = vsel %vm1249_vm5, %v3259_v40, -inf }
 0x2c2   : > { %1251 = vmax.xlane.f32.xlu2 %v1250_v42 }
 0x2c6   : > { %v1244_v24 = vpop.permute.xlu0 %1243 }
 0x2c7   : > { %v3284_v21 = vadd.f32 %v1244_v24, %v1240_v18  ;;  %v1544_v18 = vpop.permute.xlu2 %1543 }
 0x2c9   : > { %v1253_v25 = vsel %vm1249_vm5, %v3284_v21, -inf }
 0x2ce   : > { %v1542_v26 = vpop.permute.xlu0 %1541 }
 0x2cf   : > { %v3288_v29 = vadd.f32 %v1542_v26, %v1539_v28  ;;  %v1538_v26 = vmul.f32 0.2, %v1534_v2  ;;  %v1967_v45 = vpop.permute.xlu2 %1966 }
 0x2d1   : > { %v1550_v36 = vsel %vm1549_vm9, %v3288_v29, -inf }
 0x2d3   : > { %1334 = vperm.xlu0 %2567, %v3102_v62  }
 0x2da   : > { %892 = vrot.lane.b32.xlu2 %v3265_v37, %s2827_s23 }
 0x2db   : > { %1428 = vperm.xlu0 %2567, %v3105_v63  }
 0x2e3   : > { %1432 = vperm.xlu0 %2567, %v3111_v0  }
 0x2eb   : > { %1962 = vperm.xlu0 %2567, %v3075_v52  }
 0x2f3   : > { %1871 = vperm.xlu0 %2567, %v3077_v53  }
 0x2fb   : > { %990 = vrot.lane.b32.xlu0 %v3274_v27, %s2829_s25 }
 0x325   : > { %1254 = vmax.xlane.f32.xlu0 %v1253_v25 }
 0x32d   : > { %1551 = vmax.xlane.f32.xlu0 %v1550_v36 }
 0x332   : > { %v1356_v11 = vpop.xlane.xlu0 %1355 }
 0x345   : > { %v1335_v39 = vpop.permute.xlu0 %1334 }
 0x346   : > { %v1338_v42 = vadd.f32 %v1335_v39, %v3166_v57  ;;  %v1540_v39 = vsel %vm1536_vm0, %v1534_v2, %v1538_v26 }
 0x348   : > { %v1342_v50 = vmul.f32 0.2, %v1338_v42  ;;  %vm1340_vm11 = vcmp.gt.f32.partialorder %v1338_v42, 0.0 }
 0x34a   : > { %v1344_v51 = vsel %vm1340_vm11, %v1338_v42, %v1342_v50  ;;  %v3300_v42 = vadd.f32 %v1544_v18, %v1540_v39 }
 0x34b   : > { %v3293_v54 = vadd.f32 %v1348_v22, %v1344_v51  ;;  %v3303_v22 = vperm.slane %v3247_v1, 0 }
 0x34c   : > { %v1553_v51 = vsel %vm1549_vm9, %v3300_v42, -inf  ;;  %vm2297_vm9 = vcmask 7168  }
 0x34d   : > { %v1429_v14 = vpop.permute.xlu0 %1428  ;;  %v1357_v16 = vsel %vm1353_vm4, %v3293_v54, -inf }
 0x34e   : > { %v1435_v24 = vadd.f32 %v1429_v14, %v3166_v57  ;;  %1358 = vmax.xlane.f32.xlu1 %v1357_v16  ;;  %v1970_v14 = vadd.f32 %v1967_v45, %v3303_v22 }
 0x350   : > { %v1439_v20 = vmul.f32 0.2, %v1435_v24  ;;  %vm1437_vm13 = vcmp.gt.f32.partialorder %v1435_v24, 0.0  ;;  %vm1972_vm2 = vcmp.gt.f32.partialorder %v1970_v14, 0.0 }
 0x352   : > { %v1441_v23 = vsel %vm1437_vm13, %v1435_v24, %v1439_v20  ;;  %v1974_v20 = vmul.f32 0.2, %v1970_v14 }
 0x353   : > { %v1449_v25 = vadd.f32 %v1444_v47, %v1441_v23  ;;  %v885_v23 = vsub.f32 %v3212_v61, %v3243_v55 }
 0x354   : > { %v1976_v18 = vsel %vm1972_vm2, %v1970_v14, %v1974_v20 }
 0x355   : > { %v1433_v28 = vpop.permute.xlu0 %1432  ;;  %v1452_v36 = vsel %vm1451_vm15, %v1449_v25, -inf  ;;  %v3318_v26 = vadd.f32 %v1976_v18, %v3154_v13 }
 0x356   : > { %1453 = vmax.xlane.f32.xlu2 %v1452_v36  ;;  %v888_v36 = vmul.f32 1.442695, %v885_v23  ;;  %v1436_v13 = vadd.f32 %v1433_v28, %v3166_v57 }
 0x357   : > { %v1982_v39 = vsel %vm1073_vm14, %v3318_v26, -inf }
 0x358   : > { %2579 = vpow2.f32 %v888_v36  ;;  %v1440_v55 = vmul.f32 0.2, %v1436_v13 }
 0x35d   : > { %v1963_v50 = vpop.permute.xlu0 %1962 }
 0x35e   : > { %v1969_v16 = vadd.f32 %v1963_v50, %v3303_v22  ;;  %1554 = vmax.xlane.f32.xlu2 %v1553_v51  ;;  %v3324_v45 = vpop.eup %2579 }
 0x360   : > { %vm1971_vm1 = vcmp.gt.f32.partialorder %v1969_v16, 0.0  ;;  %v1973_v24 = vmul.f32 0.2, %v1969_v16 }
 0x362   : > { %v1975_v47 = vsel %vm1971_vm1, %v1969_v16, %v1973_v24  ;;  %v3335_v16 = vpop.xlane.xlu2 %1251 }
 0x363   : > { %v3310_v2 = vadd.f32 %v1975_v47, %v3148_v10  ;;  %v1360_v10 = vsub.f32 %v3253_v30, %v1356_v11  ;;  %v1446_v30 = vpop.permute.xlu1 %1445 }
 0x365   : > { %v1979_v1 = vsel %vm1073_vm14, %v3310_v2, -inf  ;;  %v1362_v50 = vmul.f32 1.442695, %v1360_v10  ;;  %vm1438_vm14 = vcmp.gt.f32.partialorder %v1436_v13, 0.0  ;;  %v1872_v57 = vpop.permute.xlu0 %1871 }
 0x366   : > { %1980 = vmax.xlane.f32.xlu0 %v1979_v1  ;;  %v1442_v51 = vsel %vm1438_vm14, %v1436_v13, %v1440_v55  ;;  %v1878_v36 = vadd.f32 %v1872_v57, %v3303_v22 }
 0x367   : > { %1780 = vperm.xlu1 %2569, %v3059_v44   ;;  %2581 = vpow2.f32 %v1362_v50  ;;  %v1450_v11 = vadd.f32 %v1446_v30, %v1442_v51 }
 0x368   : > { %v1882_v50 = vmul.f32 0.2, %v1878_v36  ;;  %vm1880_vm4 = vcmp.gt.f32.partialorder %v1878_v36, 0.0 }
 0x369   : > { %v1455_v14 = vsel %vm1451_vm15, %v1450_v11, -inf }
 0x36a   : > { %v3337_v24 = vpop.permute.xlu2 %892 }
 0x36d   : > { %v3328_v61 = vpop.eup %2581 }
 0x36e   : > { %1983 = vmax.xlane.f32.xlu0 %v1982_v39 }
 0x36f   : > { %1784 = vperm.xlu1 %2569, %v3069_v49  }
 0x377   : > { %894 = vrot.lane.b32.xlu1 %v3324_v45, %s2827_s23 }
 0x382   : > { %1368 = vrot.lane.b32.xlu0 %v3328_v61, %s2823_s29 }
 0x38a   : > { %1698 = vperm.xlu0 %2567, %v3142_v8  }
 0x3a1   : > { %1456 = vmax.xlane.f32.xlu1 %v1455_v14  ;;  %v1884_v14 = vsel %vm1880_vm4, %v1878_v36, %v1882_v50  ;;  %v1080_v36 = vsub.f32 %v3198_v41, %v3280_v9 }
 0x3a3   : > { %v1082_v50 = vmul.f32 1.442695, %v1080_v36 }
 0x3c1   : > { %v1359_v18 = vpop.xlane.xlu1 %1358 }
 0x3c9   : > { %v1454_v20 = vpop.xlane.xlu2 %1453 }
 0x3ca   : > { %v1458_v47 = vsub.f32 %v1449_v25, %v1454_v20 }
 0x3cc   : > { %v1460_v1 = vmul.f32 1.442695, %v1458_v47  ;;  %v1886_v47 = vadd.f32 %v1884_v14, %v3132_v4 }
 0x3ce   : > { %2583 = vpow2.f32 %v1460_v1 }
 0x3cf   : > { %2585 = vpow2.f32 %v1082_v50 }
 0x3d4   : > { %v3339_v23 = vpop.eup %2583 }
 0x3d5   : > { %1466 = vrot.lane.b32.xlu0 %v3339_v23, %s2821_s26  ;;  %v3359_v14 = vpop.eup %2585 }
 0x3d9   : > { %v1781_v28 = vpop.permute.xlu1 %1780 }
 0x3da   : > { %v1787_v39 = vadd.f32 %v1781_v28, %v3303_v22  ;;  %v1888_v28 = vsel %vm975_vm12, %v1886_v47, -inf }
 0x3dc   : > { %vm1789_vm3 = vcmp.gt.f32.partialorder %v1787_v39, 0.0  ;;  %v1791_v10 = vmul.f32 0.2, %v1787_v39 }
 0x3de   : > { %v1793_v13 = vsel %vm1789_vm3, %v1787_v39, %v1791_v10 }
 0x3df   : > { %v1795_v25 = vadd.f32 %v1793_v13, %v3130_v3  ;;  %v991_v3 = vpop.permute.xlu0 %990  ;;  %v1555_v13 = vpop.xlane.xlu2 %1554 }
 0x3e0   : > { %v996_v10 = vsel %vm788_vm7, %v991_v3, 0.0  ;;  %v1557_v4 = vsub.f32 %v3300_v42, %v1555_v13 }
 0x3e1   : > { %v1785_v55 = vpop.permute.xlu1 %1784  ;;  %v1797_v51 = vsel %vm877_vm10, %v1795_v25, -inf }
 0x3e2   : > { %v1788_v30 = vadd.f32 %v1785_v55, %v3303_v22  ;;  %1798 = vmax.xlane.f32.xlu1 %v1797_v51  ;;  %v1361_v55 = vsub.f32 %v3293_v54, %v1359_v18 }
 0x3e4   : > { %vm1790_vm5 = vcmp.gt.f32.partialorder %v1788_v30, 0.0  ;;  %v1792_v20 = vmul.f32 0.2, %v1788_v30 }
 0x3e6   : > { %v1794_v1 = vsel %vm1790_vm5, %v1788_v30, %v1792_v20  ;;  %v1364_v30 = vmul.f32 1.442695, %v1361_v55 }
 0x3e7   : > { %v1796_v57 = vadd.f32 %v1794_v1, %v3138_v6  ;;  %v1560_v6 = vmul.f32 1.442695, %v1557_v4  ;;  %v1255_v18 = vpop.xlane.xlu0 %1254 }
 0x3e9   : > { %v1800_v39 = vsel %vm877_vm10, %v1796_v57, -inf  ;;  %2587 = vpow2.f32 %v1560_v6  ;;  %v895_v51 = vpop.permute.xlu1 %894 }
 0x3ea   : > { %1889 = vmax.xlane.f32.xlu1 %v1888_v28  ;;  %1801 = vmax.xlane.f32.xlu2 %v1800_v39  ;;  %2589 = vpow2.f32 %v1364_v30  ;;  %v901_v28 = vsel %vm788_vm7, %v895_v51, 0.0 }
 0x3ef   : > { %v3361_v20 = vpop.eup %2587  ;;  %v1552_v39 = vpop.xlane.xlu0 %1551 }
 0x3f0   : > { %v3367_v1 = vpop.eup %2589 }
 0x3f7   : > { %v3376_v3 = vpop.xlane.xlu0 %1980 }
 0x3ff   : > { %997 = vadd.xlane.f32.xlu0 %v996_v10  ;;  %v1984_v6 = vpop.xlane.xlu0 %1983 }
 0x403   : > { %1875 = vperm.xlu1 %2569, %v3067_v48  }
 0x40b   : > { %1694 = vperm.xlu1 %2569, %v3134_v5  }
 0x413   : > { %1566 = vrot.lane.b32.xlu0 %v3361_v20, %s2822_s28  ;;  %1088 = vrot.lane.b32.xlu1 %v3359_v14, %s2826_s22 }
 0x414   : > { %v1457_v41 = vpop.xlane.xlu1 %1456 }
 0x415   : > { %v1459_v9 = vsub.f32 %v1450_v11, %v1457_v41  ;;  %v1986_v41 = vsub.f32 %v3318_v26, %v1984_v6  ;;  %v1081_v6 = vsub.f32 %v3218_v34, %v3245_v58 }
 0x417   : > { %v1462_v42 = vmul.f32 1.442695, %v1459_v9  ;;  %v1989_v51 = vmul.f32 1.442695, %v1986_v41 }
 0x419   : > { %2591 = vpow2.f32 %v1462_v42 }
 0x41b   : > { %1370 = vrot.lane.b32.xlu1 %v3367_v1, %s2823_s29 }
 0x41f   : > { %v3371_v54 = vpop.eup %2591 }
 0x423   : > { %1468 = vrot.lane.b32.xlu1 %v3371_v54, %s2821_s26 }
 0x44d   : > { %902 = vadd.xlane.f32.xlu1 %v901_v28 }
 0x455   : > { %v1799_v11 = vpop.xlane.xlu1 %1798 }
 0x456   : > { %v1803_v10 = vsub.f32 %v1795_v25, %v1799_v11 }
 0x458   : > { %v1805_v13 = vmul.f32 1.442695, %v1803_v10 }
 0x45a   : > { %2593 = vpow2.f32 %v1805_v13 }
 0x45d   : > { %v1802_v36 = vpop.xlane.xlu2 %1801  ;;  %v1890_v4 = vpop.xlane.xlu1 %1889 }
 0x45e   : > { %v1804_v50 = vsub.f32 %v1796_v57, %v1802_v36  ;;  %v1894_v55 = vsub.f32 %v1886_v47, %v1890_v4  ;;  %v983_v4 = vsub.f32 %v3191_v33, %v3278_v59  ;;  %v1257_v33 = vsub.f32 %v3284_v21, %v1255_v18 }
 0x45f   : > { %v1556_v59 = vsub.f32 %v3288_v29, %v1552_v39  ;;  %v795_v21 = vsub.f32 %v3171_v17, %v3249_v19  ;;  %v796_v29 = vsub.f32 %v3177_v15, %v3255_v31  ;;  %v898_v17 = vsel %vm788_vm7, %v3337_v24, 0.0  ;;  %v1369_v31 = vpop.permute.xlu0 %1368 }
 0x460   : > { %v1807_v30 = vmul.f32 1.442695, %v1804_v50  ;;  %v1896_v9 = vmul.f32 1.442695, %v1894_v55  ;;  %v3379_v42 = vpop.eup %2593  ;;  %v986_v50 = vmul.f32 1.442695, %v983_v4 }
 0x461   : > { %v1084_v55 = vmul.f32 1.442695, %v1081_v6  ;;  %v1260_v34 = vmul.f32 1.442695, %v1257_v33  ;;  %v797_v18 = vmul.f32 1.442695, %v795_v21 }
 0x462   : > { %2595 = vpow2.f32 %v1807_v30  ;;  %v799_v39 = vmul.f32 1.442695, %v796_v29 }
 0x463   : > { %2597 = vpow2.f32 %v1896_v9 }
 0x464   : > { %2599 = vpow2.f32 %v1989_v51  ;;  %v1558_v51 = vmul.f32 1.442695, %v1556_v59 }
 0x465   : > { %2601 = vpow2.f32 %v986_v50 }
 0x466   : > { %1811 = vrot.lane.b32.xlu1 %v3379_v42, %s2827_s23  ;;  %2603 = vpow2.f32 %v1084_v55 }
 0x467   : > { %v1699_v33 = vpop.permute.xlu0 %1698 }
 0x468   : > { %v3383_v25 = vpop.eup %2595  ;;  %v1703_v59 = vadd.f32 %v3303_v22, %v1699_v33 }
 0x469   : > { %1813 = vrot.lane.b32.xlu0 %v3383_v25, %s2827_s23  ;;  %v3387_v57 = vpop.eup %2597 }
 0x46a   : > { %v3391_v26 = vpop.eup %2599  ;;  %v1707_v21 = vmul.f32 0.2, %v1703_v59  ;;  %vm1705_vm6 = vcmp.gt.f32.partialorder %v1703_v59, 0.0 }
 0x46b   : > { %v3405_v30 = vpop.eup %2601 }
 0x46c   : > { %v3411_v9 = vpop.eup %2603 }
 0x46e   : > { %1902 = vrot.lane.b32.xlu1 %v3387_v57, %s2829_s25 }
 0x471   : > { %1995 = vrot.lane.b32.xlu0 %v3391_v26, %s2826_s22 }
 0x475   : > { %v1876_v47 = vpop.permute.xlu1 %1875 }
 0x476   : > { %v1879_v28 = vadd.f32 %v1876_v47, %v3303_v22 }
 0x478   : > { %vm1881_vm10 = vcmp.gt.f32.partialorder %v1879_v28, 0.0  ;;  %v1883_v11 = vmul.f32 0.2, %v1879_v28 }
 0x47a   : > { %v1885_v10 = vsel %vm1881_vm10, %v1879_v28, %v1883_v11 }
 0x47b   : > { %v3397_v13 = vadd.f32 %v1885_v10, %v3140_v7  ;;  %v1256_v7 = vsub.f32 %v3259_v40, %v3335_v16 }
 0x47d   : > { %v1891_v36 = vsel %vm975_vm12, %v3397_v13, -inf  ;;  %v1258_v41 = vmul.f32 1.442695, %v1256_v7  ;;  %v1695_v15 = vpop.permute.xlu1 %1694 }
 0x47e   : > { %1892 = vmax.xlane.f32.xlu2 %v1891_v36  ;;  %v1985_v36 = vsub.f32 %v3310_v2, %v3376_v3  ;;  %v1702_v6 = vadd.f32 %v3303_v22, %v1695_v15  ;;  %v1709_v22 = vsel %vm1705_vm6, %v1703_v59, %v1707_v21  ;;  %v1374_v21 = vsel %vm788_vm7, %v1369_v31, 0.0 }
 0x47f   : > { %2605 = vpow2.f32 %v1258_v41 }
 0x480   : > { %2607 = vpow2.f32 %v1260_v34  ;;  %v1987_v55 = vmul.f32 1.442695, %v1985_v36  ;;  %v1706_v7 = vmul.f32 0.2, %v1702_v6  ;;  %vm1704_vm12 = vcmp.gt.f32.partialorder %v1702_v6, 0.0 }
 0x481   : > { %2609 = vpow2.f32 %v1558_v51 }
 0x482   : > { %2611 = vpow2.f32 %v797_v18  ;;  %v1708_v51 = vsel %vm1704_vm12, %v1702_v6, %v1706_v7 }
 0x483   : > { %2613 = vpow2.f32 %v799_v39  ;;  %v3452_v3 = vadd.f32 %v1708_v51, %v3024_v32 }
 0x484   : > { %2615 = vpow2.f32 %v1987_v55 }
 0x485   : > { %v3416_v58 = vpop.eup %2605  ;;  %v1089_v41 = vpop.permute.xlu1 %1088  ;;  %v1712_v39 = vsel %vm788_vm7, %v3452_v3, -inf }
 0x486   : > { %v3421_v40 = vpop.eup %2607  ;;  %v1094_v34 = vsel %vm788_vm7, %v1089_v41, 0.0 }
 0x487   : > { %v3425_v16 = vpop.eup %2609 }
 0x488   : > { %v3433_v47 = vpop.eup %2611 }
 0x489   : > { %v801_v28 = vsel %vm788_vm7, %v3433_v47, 0.0  ;;  %v3437_v11 = vpop.eup %2613 }
 0x48a   : > { %v804_v10 = vsel %vm788_vm7, %v3437_v11, 0.0  ;;  %v3449_v2 = vpop.eup %2615 }
 0x496   : > { %992 = vrot.lane.b32.xlu2 %v3405_v30, %s2829_s25 }
 0x49e   : > { %1090 = vrot.lane.b32.xlu2 %v3411_v9, %s2826_s22 }
 0x4a6   : > { %1264 = vrot.lane.b32.xlu2 %v3416_v58, %s2828_s24 }
 0x4ae   : > { %1266 = vrot.lane.b32.xlu2 %v3421_v40, %s2828_s24 }
 0x4b6   : > { %1564 = vrot.lane.b32.xlu2 %v3425_v16, %s2822_s28 }
 0x4df   : > { %802 = vadd.xlane.f32.xlu2 %v801_v28  ;;  %v1371_v28 = vpop.permute.xlu1 %1370 }
 0x4e0   : > { %v1377_v15 = vsel %vm788_vm7, %v1371_v28, 0.0 }
 0x4e7   : > { %805 = vadd.xlane.f32.xlu2 %v804_v10  ;;  %v1467_v10 = vpop.permute.xlu0 %1466 }
 0x4e8   : > { %v1472_v6 = vsel %vm788_vm7, %v1467_v10, 0.0 }
 0x4ef   : > { %899 = vadd.xlane.f32.xlu2 %v898_v17  ;;  %v3460_v17 = vadd.f32 %v1709_v22, %v3035_v35  ;;  %v998_v36 = vpop.xlane.xlu0 %997 }
 0x4f1   : > { %v1893_v19 = vpop.xlane.xlu2 %1892  ;;  %v1715_v32 = vsel %vm788_vm7, %v3460_v17, -inf }
 0x4f7   : > { %v1567_v7 = vpop.permute.xlu0 %1566 }
 0x4f8   : > { %v1573_v35 = vsel %vm788_vm7, %v1567_v7, 0.0 }
 0x4f9   : > { %v993_v4 = vpop.permute.xlu2 %992 }
 0x4fa   : > { %v999_v50 = vsel %vm788_vm7, %v993_v4, 0.0  ;;  %v1469_v4 = vpop.permute.xlu1 %1468 }
 0x4fb   : > { %1000 = vadd.xlane.f32.xlu1 %v999_v50  ;;  %v1475_v33 = vsel %vm788_vm7, %v1469_v4, 0.0 }
 0x501   : > { %v1091_v24 = vpop.permute.xlu2 %1090 }
 0x502   : > { %v903_v41 = vpop.xlane.xlu1 %902  ;;  %v1097_v51 = vsel %vm788_vm7, %v1091_v24, 0.0 }
 0x503   : > { %1095 = vadd.xlane.f32.xlu1 %v1094_v34  ;;  %2617 = vrcp.f32 %v903_v41 }
 0x507   : > { %1993 = vrot.lane.b32.xlu2 %v3449_v2, %s2826_s22 }
 0x509   : > { %v1265_v18 = vpop.permute.xlu2 %1264 }
 0x50a   : > { %v1270_v29 = vsel %vm788_vm7, %v1265_v18, 0.0  ;;  %v1812_v34 = vpop.permute.xlu1 %1811  ;;  %v2618_v18 = vpop.eup %2617 }
 0x50b   : > { %1271 = vadd.xlane.f32.xlu0 %v1270_v29  ;;  %1713 = vmax.xlane.f32.xlu1 %v1712_v39  ;;  %v1817_v59 = vsel %vm788_vm7, %v1812_v34, 0.0  ;;  %v1895_v29 = vsub.f32 %v3397_v13, %v1893_v19  ;;  %v907_v39 = vmul.f32 %v2618_v18, %v3324_v45 }
 0x50d   : > { %v1898_v22 = vmul.f32 1.442695, %v1895_v29 }
 0x50f   : > { %2619 = vpow2.f32 %v1898_v22 }
 0x511   : > { %v1267_v50 = vpop.permute.xlu2 %1266 }
 0x512   : > { %v1273_v55 = vsel %vm788_vm7, %v1267_v50, 0.0  ;;  %v1903_v4 = vpop.permute.xlu1 %1902 }
 0x513   : > { %1716 = vmax.xlane.f32.xlu0 %v1715_v32  ;;  %1378 = vadd.xlane.f32.xlu1 %v1377_v15 }
 0x515   : > { %v3475_v10 = vpop.eup %2619 }
 0x519   : > { %v1565_v28 = vpop.permute.xlu2 %1564 }
 0x51b   : > { %1473 = vadd.xlane.f32.xlu0 %v1472_v6  ;;  %1274 = vadd.xlane.f32.xlu1 %v1273_v55 }
 0x523   : > { %1574 = vadd.xlane.f32.xlu0 %v1573_v35  ;;  %1476 = vadd.xlane.f32.xlu1 %v1475_v33 }
 0x52b   : > { %1818 = vadd.xlane.f32.xlu1 %v1817_v59 }
 0x530   : > { %1098 = vadd.xlane.f32.xlu2 %v1097_v51  ;;  %v1814_v51 = vpop.permute.xlu0 %1813 }
 0x538   : > { %1375 = vadd.xlane.f32.xlu2 %v1374_v21  ;;  %v1908_v21 = vsel %vm788_vm7, %v1903_v4, 0.0 }
 0x544   : > { %912 = vrot.lane.b32.xlu1 %v907_v39, %s2827_s23 }
 0x550   : > { %1904 = vrot.lane.b32.xlu2 %v3475_v10, %s2829_s25 }
 0x552   : > { %v803_v24 = vpop.xlane.xlu2 %802 }
 0x553   : > { %2621 = vrcp.f32 %v803_v24 }
 0x559   : > { %v2622_v31 = vpop.eup %2621 }
 0x55a   : > { %v806_v32 = vpop.xlane.xlu2 %805  ;;  %v809_v15 = vmul.f32 %v2622_v31, %v3433_v47 }
 0x55b   : > { %2623 = vrcp.f32 %v806_v32 }
 0x55c   : > { %2463 = vmatmul.msk.f32.vlgmr.msrb.gmra.mxu2 %vm788_vm7, %v809_v15 }
 0x55d   : > { %1408 = vmatpush.msrb.mxu2 %v3102_v62 }
 0x55f   : > { %1409 = vmatpush.msrb.mxu2 %v3098_v60  ;;  %v1570_v60 = vsel %vm788_vm7, %v1565_v28, 0.0 }
 0x561   : > { %v2624_v45 = vpop.eup %2623 }
 0x562   : > { %v900_v13 = vpop.xlane.xlu2 %899  ;;  %v810_v19 = vmul.f32 %v2624_v45, %v3437_v11 }
 0x564   : > { %2464 = vmatmul.msk.f32.gmra.mxu2 %vm788_vm7, %v810_v19 }
 0x56a   : > { %v1994_v50 = vpop.permute.xlu2 %1993 }
 0x56b   : > { %v1999_v6 = vsel %vm788_vm7, %v1994_v50, 0.0 }
 0x56c   : > { %2000 = vadd.xlane.f32.xlu0 %v1999_v6 }
 0x56e   : > { %v1001_v55 = vpop.xlane.xlu1 %1000 }
 0x56f   : > { %2625 = vrcp.f32 %v1001_v55 }
 0x575   : > { %v2626_v47 = vpop.eup %2625 }
 0x576   : > { %v1096_v7 = vpop.xlane.xlu1 %1095  ;;  %v1005_v41 = vmul.f32 %v2626_v47, %v3405_v30  ;;  %v1820_v47 = vsel %vm788_vm7, %v1814_v51, 0.0 }
 0x577   : > { %2627 = vrcp.f32 %v1096_v7 }
 0x578   : > { %1010 = vrot.lane.b32.xlu1 %v1005_v41, %s2829_s25  ;;  %2629 = vrcp.f32 %v900_v13 }
 0x579   : > { %1571 = vadd.xlane.f32.xlu2 %v1570_v60  ;;  %2631 = vrcp.f32 %v998_v36 }
 0x57d   : > { %v2628_v62 = vpop.eup %2627 }
 0x57e   : > { %v1102_v11 = vmul.f32 %v2628_v62, %v3359_v14  ;;  %v2630_v35 = vpop.eup %2629  ;;  %v1714_v36 = vpop.xlane.xlu1 %1713 }
 0x57f   : > { %v906_v33 = vmul.f32 %v2630_v35, %v3265_v37  ;;  %v2632_v34 = vpop.eup %2631  ;;  %v1996_v37 = vpop.permute.xlu0 %1995  ;;  %v1718_v39 = vsub.f32 %v3452_v3, %v1714_v36 }
 0x580   : > { %1106 = vrot.lane.b32.xlu0 %v1102_v11, %s2826_s22  ;;  %v1004_v30 = vmul.f32 %v2632_v34, %v3274_v27  ;;  %v2002_v41 = vsel %vm788_vm7, %v1996_v37, 0.0 }
 0x581   : > { %v1720_v27 = vmul.f32 1.442695, %v1718_v39 }
 0x586   : > { %v1379_v31 = vpop.xlane.xlu1 %1378 }
 0x587   : > { %v1272_v24 = vpop.xlane.xlu0 %1271 }
 0x58e   : > { %v1275_v45 = vpop.xlane.xlu1 %1274 }
 0x58f   : > { %v1717_v15 = vpop.xlane.xlu0 %1716 }
 0x590   : > { %v1719_v35 = vsub.f32 %v3460_v17, %v1717_v15 }
 0x591   : > { %910 = vrot.lane.b32.xlu2 %v906_v33, %s2827_s23 }
 0x592   : > { %v1722_v34 = vmul.f32 1.442695, %v1719_v35 }
 0x596   : > { %v1477_v33 = vpop.xlane.xlu1 %1476 }
 0x597   : > { %v1474_v19 = vpop.xlane.xlu0 %1473 }
 0x599   : > { %1008 = vrot.lane.b32.xlu2 %v1004_v30, %s2829_s25 }
 0x59f   : > { %v1575_v6 = vpop.xlane.xlu0 %1574 }
 0x5a3   : > { %v1099_v59 = vpop.xlane.xlu2 %1098 }
 0x5a4   : > { %2633 = vrcp.f32 %v1099_v59  ;;  %v1819_v59 = vpop.xlane.xlu1 %1818 }
 0x5a5   : > { %2635 = vpow2.f32 %v1720_v27 }
 0x5a6   : > { %2637 = vrcp.f32 %v1272_v24 }
 0x5a7   : > { %2639 = vrcp.f32 %v1275_v45 }
 0x5a8   : > { %2641 = vrcp.f32 %v1379_v31 }
 0x5a9   : > { %2643 = vrcp.f32 %v1575_v6 }
 0x5aa   : > { %v2634_v14 = vpop.eup %2633  ;;  %1909 = vadd.xlane.f32.xlu0 %v1908_v21 }
 0x5ab   : > { %v1376_v18 = vpop.xlane.xlu2 %1375  ;;  %v1103_v29 = vmul.f32 %v2634_v14, %v3411_v9  ;;  %v3500_v32 = vpop.eup %2635 }
 0x5ac   : > { %v1724_v9 = vsel %vm788_vm7, %v3500_v32, 0.0  ;;  %v2638_v13 = vpop.eup %2637 }
 0x5ad   : > { %1108 = vrot.lane.b32.xlu1 %v1103_v29, %s2826_s22  ;;  %v1278_v3 = vmul.f32 %v2638_v13, %v3416_v58  ;;  %v2640_v4 = vpop.eup %2639 }
 0x5ae   : > { %v1279_v50 = vmul.f32 %v2640_v4, %v3421_v40  ;;  %v2642_v55 = vpop.eup %2641 }
 0x5af   : > { %v1383_v7 = vmul.f32 %v2642_v55, %v3367_v1  ;;  %v2644_v58 = vpop.eup %2643 }
 0x5b0   : > { %v1579_v40 = vmul.f32 %v2644_v58, %v3361_v20 }
 0x5b3   : > { %v1905_v22 = vpop.permute.xlu2 %1904 }
 0x5b4   : > { %v1911_v28 = vsel %vm788_vm7, %v1905_v22, 0.0 }
 0x5b5   : > { %1912 = vadd.xlane.f32.xlu0 %v1911_v28 }
 0x5b6   : > { %v913_v14 = vpop.permute.xlu1 %912 }
 0x5c2   : > { %1725 = vadd.xlane.f32.xlu2 %v1724_v9 }
 0x5c9   : > { %1282 = vrot.lane.b32.xlu0 %v1278_v3, %s2828_s24 }
 0x5d1   : > { %1284 = vrot.lane.b32.xlu0 %v1279_v50, %s2828_s24 }
 0x5d7   : > { %1821 = vadd.xlane.f32.xlu1 %v1820_v47 }
 0x5da   : > { %1388 = vrot.lane.b32.xlu2 %v1383_v7, %s2823_s29 }
 0x5df   : > { %v2001_v60 = vpop.xlane.xlu0 %2000  ;;  %2003 = vadd.xlane.f32.xlu1 %v2002_v41  ;;  %v3557_v9 = vpop.f32.mrf.mxu2 }
 0x5e0   : > { %2645 = vrcp.f32 %v2001_v60 }
 0x5e1   : > { %2647 = vrcp.f32 %v1376_v18 }
 0x5e2   : > { %1584 = vrot.lane.b32.xlu2 %v1579_v40, %s2822_s28  ;;  %2649 = vpow2.f32 %v1722_v34 }
 0x5e3   : > { %2651 = vrcp.f32 %v1474_v19 }
 0x5e4   : > { %2653 = vrcp.f32 %v1477_v33 }
 0x5e6   : > { %v2646_v62 = vpop.eup %2645 }
 0x5e7   : > { %v2007_v11 = vmul.f32 %v2646_v62, %v3449_v2  ;;  %v2648_v30 = vpop.eup %2647  ;;  %v3564_v13 = vpop.f32.mrf.mxu2 }
 0x5e8   : > { %v1382_v20 = vmul.f32 %v2648_v30, %v3328_v61  ;;  %v3520_v2 = vpop.eup %2649 }
 0x5e9   : > { %v1727_v17 = vsel %vm788_vm7, %v3520_v2, 0.0  ;;  %v2652_v21 = vpop.eup %2651 }
 0x5ea   : > { %2011 = vrot.lane.b32.xlu2 %v2007_v11, %s2826_s22  ;;  %v1011_v61 = vpop.permute.xlu1 %1010 }
 0x5ec   : > { %v1572_v1 = vpop.xlane.xlu2 %1571 }
 0x5ed   : > { %2655 = vrcp.f32 %v1572_v1 }
 0x5ee   : > { %2657 = vrcp.f32 %v1819_v59 }
 0x5f2   : > { %v1107_v29 = vpop.permute.xlu0 %1106 }
 0x5f4   : > { %v911_v51 = vpop.permute.xlu2 %910 }
 0x5f5   : > { %2465 = vmatmul.msk.f32.vlgmr.msrb.gmra.mxu3 %vm788_vm7, %v911_v51 }
 0x5f6   : > { %1506 = vmatpush.msrb.mxu3 %v3111_v0  ;;  %v1480_v0 = vmul.f32 %v2652_v21, %v3339_v23 }
 0x5f8   : > { %1507 = vmatpush.msrb.mxu3 %v3105_v63  ;;  %1386 = vrot.lane.b32.xlu1 %v1382_v20, %s2823_s29  ;;  %v2654_v63 = vpop.eup %2653  ;;  %s2830_s29 = smov 120  }
 0x5f9   : > { %v1481_v36 = vmul.f32 %v2654_v63, %v3371_v54 }
 0x5fb   : > { %1728 = vadd.xlane.f32.xlu0 %v1727_v17 }
 0x5fc   : > { %v1009_v18 = vpop.permute.xlu2 %1008 }
 0x5fd   : > { %2466 = vmatmul.msk.f32.gmra.mxu3 %vm788_vm7, %v913_v14  ;;  %2467 = vmatmul.msk.f32.vlgmr.msra.gmra.mxu2 %vm788_vm7, %v1009_v18 }
 0x5fe   : > { %1754 = vmatpush.msra.mxu2 %v3142_v8  ;;  %v2656_v8 = vpop.eup %2655 }
 0x5ff   : > { %v2658_v23 = vpop.eup %2657 }
 0x600   : > { %1755 = vmatpush.msra.mxu2 %v3134_v5  ;;  %1484 = vrot.lane.b32.xlu1 %v1480_v0, %s2821_s26  ;;  %v1578_v5 = vmul.f32 %v2656_v8, %v3425_v16  ;;  %v1825_v37 = vmul.f32 %v2658_v23, %v3379_v42 }
 0x605   : > { %2468 = vmatmul.msk.f32.gmra.mxu2 %vm788_vm7, %v1011_v61  ;;  %2469 = vmatmul.msk.f32.vlgmr.msra.gmra.mxu3 %vm788_vm7, %v1107_v29 }
 0x606   : > { %1851 = vmatpush.msra.mxu3 %v3069_v49 }
 0x608   : > { %1852 = vmatpush.msra.mxu3 %v3059_v44  ;;  %1486 = vrot.lane.b32.xlu1 %v1481_v36, %s2821_s26 }
 0x60f   : > { %1315 = vrot.lane.b32.xlu0 %v3061_v46, %s2830_s29 }
 0x610   : > { %1582 = vrot.lane.b32.xlu1 %v1578_v5, %s2822_s28 }
 0x618   : > { %1829 = vrot.lane.b32.xlu1 %v1825_v37, %s2827_s23 }
 0x61d   : > { %v1910_v49 = vpop.xlane.xlu0 %1909 }
 0x61e   : > { %2659 = vrcp.f32 %v1910_v49 }
 0x61f   : > { %v1109_v44 = vpop.permute.xlu1 %1108 }
 0x620   : > { %2470 = vmatmul.msk.f32.gmra.mxu3 %vm788_vm7, %v1109_v44 }
 0x624   : > { %v2660_v54 = vpop.eup %2659 }
 0x625   : > { %v1916_v39 = vmul.f32 %v2660_v54, %v3387_v57 }
 0x627   : > { %1920 = vrot.lane.b32.xlu2 %v1916_v39, %s2829_s25 }
 0x628   : > { %v1913_v16 = vpop.xlane.xlu0 %1912 }
 0x629   : > { %2661 = vrcp.f32 %v1913_v16 }
 0x62f   : > { %v2662_v22 = vpop.eup %2661 }
 0x630   : > { %v1917_v27 = vmul.f32 %v2662_v22, %v3475_v10 }
 0x632   : > { %1922 = vrot.lane.b32.xlu2 %v1917_v27, %s2829_s25 }
 0x635   : > { %v1726_v3 = vpop.xlane.xlu2 %1725 }
 0x63a   : > { %1763 = vrot.lane.b32.xlu2 %v3057_v43, %s2827_s23 }
 0x63b   : > { %v1283_v42 = vpop.permute.xlu0 %1282 }
 0x63c   : > { %2471 = vmatmul.msk.f32.vlgmr.msra.gmra.mxu0 %vm788_vm7, %v1283_v42 }
 0x63d   : > { %1942 = vmatpush.msra.mxu0 %v3067_v48  ;;  %v840_v48 = vmul.f32 %v3557_v9, %v3057_v43  ;;  %v1389_v4 = vpop.permute.xlu2 %1388 }
 0x63f   : > { %1943 = vmatpush.msra.mxu0 %v3077_v53  ;;  %v843_v53 = vsel %vm842_vm8, %v840_v48, 0.0 }
 0x643   : > { %v1285_v57 = vpop.permute.xlu0 %1284 }
 0x644   : > { %2472 = vmatmul.msk.f32.gmra.mxu0 %vm788_vm7, %v1285_v57 }
 0x645   : > { %v1585_v60 = vpop.permute.xlu2 %1584 }
 0x64a   : > { %v1822_v28 = vpop.xlane.xlu1 %1821 }
 0x64b   : > { %2663 = vrcp.f32 %v1822_v28 }
 0x64d   : > { %v2012_v1 = vpop.permute.xlu2 %2011 }
 0x651   : > { %v2664_v24 = vpop.eup %2663 }
 0x652   : > { %v2004_v31 = vpop.xlane.xlu1 %2003  ;;  %v1826_v10 = vmul.f32 %v2664_v24, %v3383_v25  ;;  %v841_v25 = vmul.f32 %v3564_v13, %v3061_v46 }
 0x653   : > { %2665 = vrcp.f32 %v2004_v31 }
 0x654   : > { %1831 = vrot.lane.b32.xlu1 %v1826_v10, %s2827_s23  ;;  %2667 = vrcp.f32 %v1726_v3 }
 0x659   : > { %v2666_v15 = vpop.eup %2665 }
 0x65a   : > { %v2008_v45 = vmul.f32 %v2666_v15, %v3391_v26  ;;  %v846_v26 = vsel %vm842_vm8, %v841_v25, 0.0  ;;  %v2668_v55 = vpop.eup %2667 }
 0x65b   : > { %v1732_v7 = vmul.f32 %v2668_v55, %v3500_v32 }
 0x65c   : > { %2013 = vrot.lane.b32.xlu1 %v2008_v45, %s2826_s22  ;;  %s364_s22 = scalar_lea.vmem %s3807_s8, %s2494_s27  ;;  %s2429_s27 = sshll.u32 %s347_s18, 4 }
 0x65d   : > { %s349_s26 = scalar_lea.vmem [#allocation3], %s2429_s27  ;;  %s2775_s27 = scalar_lea.hbm %s3808_s9, 32 }
 0x65e   : > { %s2323_s28 = sshll.u32 %s349_s26, 4  ;;  %s2324_s28 = int_to_ptr.vmem [resolvable:$true] %s2323_s28 }
 0x663   : > { %844 = vadd.xlane.f32.xlu2 %v843_v53 }
 0x664   : > { %1313 = vrot.lane.b32.xlu1 %v3057_v43, %s2830_s29 }
 0x66a   : > { %v1387_v19 = vpop.permute.xlu1 %1386 }
 0x66b   : > { %847 = vadd.xlane.f32.xlu2 %v846_v26  ;;  %2473 = vmatmul.msk.f32.vlgmr.msrb.gmra.mxu2 %vm788_vm7, %v1387_v19 }
 0x66c   : > { %2033 = vmatpush.msrb.mxu2 %v3086_v56  ;;  %1765 = vrot.lane.b32.xlu1 %v3061_v46, %s2827_s23  ;;  %s2496_s23 = sshll.u32 %s2910_s7, 4  ;;  %s2308_s7 = scalar_lea.sflag [#allocation4], %s347_s18 }
 0x66d   : > { %s2322_s29 = scalar_lea.hbm %s3808_s9, %s2496_s23 }
 0x66e   : > { %2034 = vmatpush.msrb.mxu2 %v3075_v52  ;;  %v1729_v6 = vpop.xlane.xlu0 %1728 }
 0x66f   : > { %2669 = vrcp.f32 %v1729_v6 }
 0x672   : > { %v1485_v50 = vpop.permute.xlu1 %1484 }
 0x673   : > { %2474 = vmatmul.msk.f32.gmra.mxu2 %vm788_vm7, %v1389_v4  ;;  %2475 = vmatmul.msk.f32.vlgmr.msrb.gmra.mxu3 %vm788_vm7, %v1485_v50 }
 0x675   : > { %v2670_v41 = vpop.eup %2669 }
 0x676   : > { %v1733_v62 = vmul.f32 %v2670_v41, %v3520_v2 }
 0x678   : > { %v3578_v47 = vpop.f32.mrf.mxu3 }
 0x679   : > { %v941_v56 = vmul.f32 %v3578_v47, %v3057_v43 }
 0x67a   : > { %v1487_v58 = vpop.permute.xlu1 %1486 }
 0x67b   : > { %2476 = vmatmul.msk.f32.gmra.mxu3 %vm788_vm7, %v1487_v58  ;;  %2479 = vmatmul.msk.f32.vlgmr.msra.gmra.mxu2 %vm788_vm7, %v1732_v7  ;;  %v943_v52 = vsel %vm842_vm8, %v941_v56, 0.0 }
 0x67c   : > { %944 = vadd.xlane.f32.xlu0 %v943_v52 }
 0x680   : > { %v3586_v40 = vpop.f32.mrf.mxu2  ;;  %v3589_v11 = vpop.f32.mrf.mxu3 }
 0x681   : > { %v1921_v20 = vpop.permute.xlu2 %1920  ;;  %v1039_v29 = vmul.f32 %v3586_v40, %v3057_v43  ;;  %v1316_v5 = vpop.permute.xlu0 %1315  ;;  %v942_v49 = vmul.f32 %v3589_v11, %v3061_v46 }
 0x682   : > { %v1583_v32 = vpop.permute.xlu1 %1582 }
 0x683   : > { %2477 = vmatmul.msk.f32.vlgmr.msrb.gmra.mxu0 %vm788_vm7, %v1583_v32  ;;  %2480 = vmatmul.msk.f32.gmra.mxu2 %vm788_vm7, %v1733_v62  ;;  %v1041_v36 = vsel %vm842_vm8, %v1039_v29, 0.0  ;;  %v946_v39 = vsel %vm842_vm8, %v942_v49, 0.0 }
 0x688   : > { %v3593_v35 = vpop.f32.mrf.mxu2  ;;  %v3600_v59 = vpop.f32.mrf.mxu3 }
 0x689   : > { %v1040_v33 = vmul.f32 %v3593_v35, %v3061_v46  ;;  %v1137_v51 = vmul.f32 %v3600_v59, %v3057_v43 }
 0x68a   : > { %v1830_v34 = vpop.permute.xlu1 %1829 }
 0x68b   : > { %2478 = vmatmul.msk.f32.gmra.mxu0 %vm788_vm7, %v1585_v60  ;;  %2481 = vmatmul.msk.f32.vlgmr.msra.gmra.mxu3 %vm788_vm7, %v1830_v34  ;;  %v1044_v30 = vsel %vm842_vm8, %v1040_v33, 0.0  ;;  %v1139_v2 = vsel %vm842_vm8, %v1137_v51, 0.0 }
 0x68c   : > { %2485 = vmatmul.msk.f32.vlgmr.msrb.gmra.mxu2 %vm788_vm7, %v2012_v1  ;;  %1045 = vadd.xlane.f32.xlu0 %v1044_v30  ;;  %v1923_v17 = vpop.permute.xlu2 %1922 }
 0x693   : > { %2483 = vmatmul.msk.f32.vlgmr.msra.gmra.mxu0 %vm788_vm7, %v1921_v20 }
 0x694   : > { %1140 = vadd.xlane.f32.xlu0 %v1139_v2  ;;  %v1764_v26 = vpop.permute.xlu2 %1763 }
 0x69b   : > { %2484 = vmatmul.msk.f32.gmra.mxu0 %vm788_vm7, %v1923_v17 }
 0x6a3   : > { %v3623_v44 = vpop.f32.mrf.mxu3 }
 0x6a4   : > { %v1138_v53 = vmul.f32 %v3623_v44, %v3061_v46 }
 0x6a6   : > { %v1142_v19 = vsel %vm842_vm8, %v1138_v53, 0.0 }
 0x6b9   : > { %v3610_v18 = vpop.f32.mrf.mxu0 }
 0x6c1   : > { %v3617_v8 = vpop.f32.mrf.mxu0 }
 0x6c2   : > { %v1320_v23 = vmul.f32 %v1316_v5, %v3617_v8 }
 0x6c4   : > { %v1324_v37 = vsel %vm842_vm8, %v1320_v23, 0.0 }
 0x6c6   : > { %v1832_v21 = vpop.permute.xlu1 %1831 }
 0x6c7   : > { %2482 = vmatmul.msk.f32.gmra.mxu3 %vm788_vm7, %v1832_v21 }
 0x6ce   : > { %v2014_v14 = vpop.permute.xlu1 %2013 }
 0x6cf   : > { %2486 = vmatmul.msk.f32.gmra.mxu2 %vm788_vm7, %v2014_v14 }
 0x6d6   : > { %v1314_v0 = vpop.permute.xlu1 %1313  ;;  %v845_v21 = vpop.xlane.xlu2 %844 }
 0x6d7   : > { %v1319_v63 = vmul.f32 %v1314_v0, %v3610_v18 }
 0x6d9   : > { %v1321_v61 = vsel %vm842_vm8, %v1319_v63, 0.0 }
 0x6da   : > { %1322 = vadd.xlane.f32.xlu2 %v1321_v61 }
 0x6de   : > { %v1766_v60 = vpop.permute.xlu1 %1765 }
 0x6e2   : > { %1042 = vadd.xlane.f32.xlu2 %v1041_v36 }
 0x6ea   : > { %1325 = vadd.xlane.f32.xlu2 %v1324_v37 }
 0x6ee   : > { %v3625_v54 = vpop.f32.mrf.mxu2 }
 0x6ef   : > { %v1417_v43 = vmul.f32 %v3625_v54, %v1314_v0  ;;  %v945_v14 = vpop.xlane.xlu0 %944 }
 0x6f0   : > { %v949_v23 = vmul.f32 0.35355338, %v945_v14 }
 0x6f1   : > { %v1419_v16 = vsel %vm842_vm8, %v1417_v43, 0.0  ;;  %v849_v43 = vmul.f32 0.35355338, %v845_v21 }
 0x6f2   : > { %947 = vadd.xlane.f32.xlu2 %v946_v39  ;;  %1420 = vadd.xlane.f32.xlu1 %v1419_v16 }
 0x6f6   : > { %v3630_v22 = vpop.f32.mrf.mxu2  ;;  %v3632_v27 = vpop.f32.mrf.mxu3 }
 0x6f7   : > { %v1418_v42 = vmul.f32 %v3630_v22, %v1316_v5  ;;  %v1515_v62 = vmul.f32 %v3632_v27, %v1314_v0 }
 0x6f9   : > { %v1422_v57 = vsel %vm842_vm8, %v1418_v42, 0.0  ;;  %v1517_v34 = vsel %vm842_vm8, %v1515_v62, 0.0 }
 0x6fa   : > { %1423 = vadd.xlane.f32.xlu0 %v1422_v57  ;;  %v1147_v57 = vmax.f32 %v849_v43, %v949_v23 }
 0x6fe   : > { %v3636_v28 = vpop.f32.mrf.mxu3  ;;  %v3638_v24 = vpop.f32.mrf.mxu2 }
 0x6ff   : > { %v1516_v31 = vmul.f32 %v3636_v28, %v1316_v5  ;;  %v1769_v50 = vmul.f32 %v1764_v26, %v3638_v24  ;;  %v1046_v61 = vpop.xlane.xlu0 %1045 }
 0x700   : > { %v3641_v10 = vpop.f32.mrf.mxu0 }
 0x701   : > { %v1613_v15 = vmul.f32 %v3641_v10, %v1314_v0  ;;  %v1520_v45 = vsel %vm842_vm8, %v1516_v31, 0.0  ;;  %v1771_v58 = vsel %vm842_vm8, %v1769_v50, 0.0  ;;  %v848_v0 = vpop.xlane.xlu2 %847 }
 0x702   : > { %1521 = vadd.xlane.f32.xlu1 %v1520_v45 }
 0x703   : > { %v1615_v48 = vsel %vm842_vm8, %v1613_v15, 0.0 }
 0x704   : > { %1616 = vadd.xlane.f32.xlu2 %v1615_v48 }
 0x706   : > { %v3648_v25 = vpop.f32.mrf.mxu2 }
 0x707   : > { %v1770_v32 = vmul.f32 %v1766_v60, %v3648_v25  ;;  %v1141_v39 = vpop.xlane.xlu0 %1140 }
 0x708   : > { %v3650_v3 = vpop.f32.mrf.mxu0  ;;  %v1145_v15 = vmul.f32 0.35355338, %v1141_v39 }
 0x709   : > { %v1774_v1 = vsel %vm842_vm8, %v1770_v32, 0.0  ;;  %v1614_v51 = vmul.f32 %v3650_v3, %v1316_v5 }
 0x70b   : > { %v1618_v2 = vsel %vm842_vm8, %v1614_v51, 0.0 }
 0x70c   : > { %1143 = vadd.xlane.f32.xlu2 %v1142_v19 }
 0x70e   : > { %v3653_v4 = vpop.f32.mrf.mxu3 }
 0x70f   : > { %v1860_v6 = vmul.f32 %v3653_v4, %v1764_v26  ;;  %v3661_v56 = vpop.f32.mrf.mxu2 }
 0x710   : > { %v3657_v55 = vpop.f32.mrf.mxu0  ;;  %v2042_v41 = vmul.f32 %v3661_v56, %v1764_v26 }
 0x711   : > { %v1951_v7 = vmul.f32 %v3657_v55, %v1764_v26  ;;  %v1862_v46 = vsel %vm842_vm8, %v1860_v6, 0.0 }
 0x712   : > { %1863 = vadd.xlane.f32.xlu1 %v1862_v46  ;;  %v2044_v33 = vsel %vm842_vm8, %v2042_v41, 0.0 }
 0x713   : > { %v1953_v52 = vsel %vm842_vm8, %v1951_v7, 0.0 }
 0x714   : > { %1772 = vadd.xlane.f32.xlu2 %v1771_v58  ;;  %1954 = vadd.xlane.f32.xlu0 %v1953_v52 }
 0x718   : > { %v3671_v30 = vpop.f32.mrf.mxu0 }
 0x719   : > { %v1952_v20 = vmul.f32 %v3671_v30, %v1766_v60 }
 0x71a   : > { %2045 = vadd.xlane.f32.xlu1 %v2044_v33 }
 0x71b   : > { %v1956_v17 = vsel %vm842_vm8, %v1952_v20, 0.0 }
 0x71c   : > { %1775 = vadd.xlane.f32.xlu2 %v1774_v1  ;;  %1518 = vadd.xlane.f32.xlu0 %v1517_v34 }
 0x722   : > { %1619 = vadd.xlane.f32.xlu1 %v1618_v2 }
 0x724   : > { %1957 = vadd.xlane.f32.xlu2 %v1956_v17 }
 0x74a   : > { %v3677_v63 = vpop.f32.mrf.mxu3 }
 0x74b   : > { %v1861_v29 = vmul.f32 %v3677_v63, %v1766_v60 }
 0x74d   : > { %v3680_v36 = vpop.xlane.xlu2 %1322  ;;  %v1865_v5 = vsel %vm842_vm8, %v1861_v29, 0.0 }
 0x74e   : > { %1866 = vadd.xlane.f32.xlu0 %v1865_v5 }
 0x752   : > { %v3683_v37 = vpop.f32.mrf.mxu2 }
 0x753   : > { %v2043_v49 = vmul.f32 %v3683_v37, %v1766_v60 }
 0x755   : > { %v1043_v16 = vpop.xlane.xlu2 %1042  ;;  %v2047_v42 = vsel %vm842_vm8, %v2043_v49, 0.0 }
 0x756   : > { %v1047_v31 = vmul.f32 0.35355338, %v1043_v16  ;;  %2048 = vadd.xlane.f32.xlu0 %v2047_v42  ;;  %v850_v42 = vmul.f32 0.35355338, %v848_v0 }
 0x758   : > { %v1149_v45 = vmax.f32 %v1147_v57, %v1047_v31 }
 0x75a   : > { %v1151_v48 = vmax.f32 %v1149_v45, %v1145_v15 }
 0x75c   : > { %v1153_v53 = vsub.f32 %v849_v43, %v1151_v48  ;;  %v1159_v19 = vsub.f32 %v949_v23, %v1151_v48  ;;  %v1165_v26 = vsub.f32 %v1047_v31, %v1151_v48  ;;  %v1171_v50 = vsub.f32 %v1145_v15, %v1151_v48 }
 0x75d   : > { %v3687_v52 = vpop.xlane.xlu2 %1325 }
 0x75e   : > { %v1155_v6 = vmul.f32 1.442695, %v1153_v53  ;;  %v1161_v7 = vmul.f32 1.442695, %v1159_v19  ;;  %v1167_v46 = vmul.f32 1.442695, %v1165_v26 }
 0x75f   : > { %v1173_v58 = vmul.f32 1.442695, %v1171_v50  ;;  %v1048_v53 = vmul.f32 0.35355338, %v1046_v61 }
 0x760   : > { %2671 = vpow2.f32 %v1155_v6 }
 0x761   : > { %2673 = vpow2.f32 %v1161_v7 }
 0x762   : > { %2675 = vpow2.f32 %v1167_v46 }
 0x763   : > { %2677 = vpow2.f32 %v1173_v58 }
 0x765   : > { %v948_v51 = vpop.xlane.xlu2 %947  ;;  %v1421_v17 = vpop.xlane.xlu1 %1420 }
 0x766   : > { %v2672_v41 = vpop.eup %2671  ;;  %v950_v43 = vmul.f32 0.35355338, %v948_v51 }
 0x767   : > { %v2674_v60 = vpop.eup %2673 }
 0x768   : > { %v1177_v62 = vadd.f32 %v2674_v60, %v2672_v41  ;;  %v2676_v32 = vpop.eup %2675  ;;  %v1148_v15 = vmax.f32 %v850_v42, %v950_v43 }
 0x769   : > { %v2678_v1 = vpop.eup %2677 }
 0x76a   : > { %v1179_v33 = vadd.f32 %v2676_v32, %v1177_v62 }
 0x76c   : > { %v1181_v34 = vadd.f32 %v2678_v1, %v1179_v33 }
 0x76d   : > { %v1424_v19 = vpop.xlane.xlu0 %1423 }
 0x76e   : > { %2679 = vrcp.f32 %v1181_v34 }
 0x774   : > { %v2680_v20 = vpop.eup %2679 }
 0x775   : > { %v1189_v2 = vmul.f32 %v2680_v20, %v2676_v32  ;;  %v1185_v21 = vmul.f32 %v2680_v20, %v2672_v41  ;;  %v1187_v14 = vmul.f32 %v2680_v20, %v2674_v60  ;;  %v1191_v5 = vmul.f32 %v2680_v20, %v2678_v1  ;;  %v1522_v45 = vpop.xlane.xlu1 %1521 }
 0x777   : > { %v1617_v29 = vpop.xlane.xlu2 %1616  ;;  %v1193_v23 = vmul.f32 %v1185_v21, %v3557_v9  ;;  %v1195_v49 = vmul.f32 %v1187_v14, %v3578_v47  ;;  %v1199_v16 = vmul.f32 %v1189_v2, %v3586_v40  ;;  %v1203_v31 = vmul.f32 %v1191_v5, %v3600_v59 }
 0x778   : > { %v1150_v47 = vmax.f32 %v1148_v15, %v1048_v53  ;;  %v1425_v2 = vmul.f32 0.35355338, %v1421_v17 }
 0x779   : > { %v1197_v39 = vadd.f32 %v1195_v49, %v1193_v23 }
 0x77b   : > { %v1201_v57 = vadd.f32 %v1199_v16, %v1197_v39  ;;  %v1426_v16 = vmul.f32 0.35355338, %v1424_v19 }
 0x77d   : > { %v3693_v48 = vadd.f32 %v1203_v31, %v1201_v57 }
 0x77f   : > { %v1144_v26 = vpop.xlane.xlu2 %1143  ;;  %v1215_v9 = vmul.f32 %v3152_v12, %v3693_v48 }
 0x780   : > { %v1146_v50 = vmul.f32 0.35355338, %v1144_v26 }
 0x781   : > { %v1217_v6 = vsel %vm842_vm8, %v1215_v9, 0.0  ;;  %v1524_v9 = vmul.f32 0.35355338, %v1522_v45 }
 0x782   : > { %v1152_v7 = vmax.f32 %v1150_v47, %v1146_v50  ;;  %1218 = vadd.xlane.f32.xlu1 %v1217_v6 }
 0x784   : > { %v1154_v40 = vsub.f32 %v850_v42, %v1152_v7  ;;  %v1160_v0 = vsub.f32 %v950_v43, %v1152_v7  ;;  %v1166_v46 = vsub.f32 %v1048_v53, %v1152_v7  ;;  %v1172_v59 = vsub.f32 %v1146_v50, %v1152_v7 }
 0x785   : > { %v1864_v58 = vpop.xlane.xlu1 %1863  ;;  %v1327_v43 = vmul.f32 0.35355338, %v3680_v36  ;;  %v1328_v53 = vmul.f32 0.35355338, %v3687_v52 }
 0x786   : > { %v1157_v41 = vmul.f32 1.442695, %v1154_v40  ;;  %v1163_v60 = vmul.f32 1.442695, %v1160_v0  ;;  %v1169_v62 = vmul.f32 1.442695, %v1166_v46 }
 0x787   : > { %v1773_v61 = vpop.xlane.xlu2 %1772  ;;  %v1955_v32 = vpop.xlane.xlu0 %1954  ;;  %v1868_v33 = vmul.f32 0.35355338, %v1864_v58  ;;  %v1175_v34 = vmul.f32 1.442695, %v1172_v59  ;;  %v1623_v26 = vmax.f32 %v1327_v43, %v1425_v2  ;;  %v1621_v40 = vmul.f32 0.35355338, %v1617_v29 }
 0x788   : > { %2681 = vpow2.f32 %v1157_v41  ;;  %v1777_v1 = vmul.f32 0.35355338, %v1773_v61  ;;  %v1959_v20 = vmul.f32 0.35355338, %v1955_v32  ;;  %v1624_v59 = vmax.f32 %v1328_v53, %v1426_v16 }
 0x789   : > { %2683 = vpow2.f32 %v1163_v60 }
 0x78a   : > { %v2052_v51 = vmax.f32 %v1777_v1, %v1868_v33  ;;  %2685 = vpow2.f32 %v1169_v62  ;;  %v1626_v61 = vmax.f32 %v1624_v59, %v1524_v9 }
 0x78b   : > { %2687 = vpow2.f32 %v1175_v34 }
 0x78c   : > { %v2054_v5 = vmax.f32 %v2052_v51, %v1959_v20 }
 0x78d   : > { %v2046_v21 = vpop.xlane.xlu1 %2045 }
 0x78e   : > { %v2682_v14 = vpop.eup %2681  ;;  %v2050_v23 = vmul.f32 0.35355338, %v2046_v21 }
 0x78f   : > { %v2684_v49 = vpop.eup %2683  ;;  %v1519_v39 = vpop.xlane.xlu0 %1518 }
 0x790   : > { %v1178_v42 = vadd.f32 %v2684_v49, %v2682_v14  ;;  %v2056_v57 = vmax.f32 %v2054_v5, %v2050_v23  ;;  %v1523_v31 = vmul.f32 0.35355338, %v1519_v39  ;;  %v2686_v15 = vpop.eup %2685 }
 0x791   : > { %v2688_v7 = vpop.eup %2687 }
 0x792   : > { %v1180_v50 = vadd.f32 %v2686_v15, %v1178_v42  ;;  %v2058_v17 = vsub.f32 %v1777_v1, %v2056_v57  ;;  %v2064_v47 = vsub.f32 %v1868_v33, %v2056_v57  ;;  %v2070_v6 = vsub.f32 %v1959_v20, %v2056_v57 }
 0x793   : > { %v2076_v0 = vsub.f32 %v2050_v23, %v2056_v57  ;;  %v1625_v46 = vmax.f32 %v1623_v26, %v1523_v31 }
 0x794   : > { %v1182_v36 = vadd.f32 %v2688_v7, %v1180_v50  ;;  %v2060_v58 = vmul.f32 1.442695, %v2058_v17  ;;  %v2066_v19 = vmul.f32 1.442695, %v2064_v47  ;;  %v2072_v41 = vmul.f32 1.442695, %v2070_v6 }
 0x795   : > { %v1627_v60 = vmax.f32 %v1625_v46, %v1621_v40  ;;  %v1620_v62 = vpop.xlane.xlu1 %1619  ;;  %v2078_v52 = vmul.f32 1.442695, %v2076_v0 }
 0x796   : > { %2689 = vrcp.f32 %v1182_v36  ;;  %v1622_v32 = vmul.f32 0.35355338, %v1620_v62 }
 0x797   : > { %2691 = vpow2.f32 %v2060_v58  ;;  %v1629_v45 = vsub.f32 %v1327_v43, %v1627_v60  ;;  %v1635_v1 = vsub.f32 %v1425_v2, %v1627_v60  ;;  %v1641_v33 = vsub.f32 %v1523_v31, %v1627_v60 }
 0x798   : > { %2693 = vpow2.f32 %v2066_v19  ;;  %v1647_v34 = vsub.f32 %v1621_v40, %v1627_v60  ;;  %v1628_v29 = vmax.f32 %v1626_v61, %v1622_v32 }
 0x799   : > { %2695 = vpow2.f32 %v2072_v41  ;;  %v1631_v51 = vmul.f32 1.442695, %v1629_v45  ;;  %v1637_v20 = vmul.f32 1.442695, %v1635_v1  ;;  %v1643_v21 = vmul.f32 1.442695, %v1641_v33 }
 0x79a   : > { %2697 = vpow2.f32 %v2078_v52  ;;  %v1649_v5 = vmul.f32 1.442695, %v1647_v34  ;;  %v1630_v23 = vsub.f32 %v1328_v53, %v1628_v29  ;;  %v1636_v39 = vsub.f32 %v1426_v16, %v1628_v29 }
 0x79b   : > { %2699 = vpow2.f32 %v1631_v51  ;;  %v1642_v42 = vsub.f32 %v1524_v9, %v1628_v29  ;;  %v1648_v43 = vsub.f32 %v1622_v32, %v1628_v29 }
 0x79c   : > { %v2690_v57 = vpop.eup %2689  ;;  %2701 = vpow2.f32 %v1637_v20  ;;  %v1633_v26 = vmul.f32 1.442695, %v1630_v23  ;;  %v1639_v50 = vmul.f32 1.442695, %v1636_v39 }
 0x79d   : > { %v2692_v2 = vpop.eup %2691  ;;  %2703 = vpow2.f32 %v1643_v21  ;;  %v1186_v31 = vmul.f32 %v2690_v57, %v2682_v14  ;;  %v1645_v47 = vmul.f32 1.442695, %v1642_v42  ;;  %v1188_v6 = vmul.f32 %v2690_v57, %v2684_v49 }
 0x79e   : > { %v2694_v17 = vpop.eup %2693  ;;  %2705 = vpow2.f32 %v1649_v5  ;;  %v1190_v40 = vmul.f32 %v2690_v57, %v2686_v15  ;;  %v1651_v9 = vmul.f32 1.442695, %v1648_v43  ;;  %v1192_v59 = vmul.f32 %v2690_v57, %v2688_v7 }
 0x79f   : > { %v2696_v0 = vpop.eup %2695  ;;  %v2082_v46 = vadd.f32 %v2694_v17, %v2692_v2  ;;  %2707 = vpow2.f32 %v1633_v26  ;;  %v1194_v16 = vmul.f32 %v1186_v31, %v3564_v13  ;;  %v1196_v36 = vmul.f32 %v1188_v6, %v3589_v11 }
 0x7a0   : > { %v2698_v53 = vpop.eup %2697  ;;  %2709 = vpow2.f32 %v1639_v50  ;;  %v1200_v60 = vmul.f32 %v1190_v40, %v3593_v35  ;;  %v1204_v13 = vmul.f32 %v1192_v59, %v3623_v44 }
 0x7a1   : > { %v2700_v58 = vpop.eup %2699  ;;  %v2084_v19 = vadd.f32 %v2696_v0, %v2082_v46  ;;  %2711 = vpow2.f32 %v1645_v47  ;;  %v1198_v14 = vadd.f32 %v1196_v36, %v1194_v16 }
 0x7a2   : > { %v2702_v41 = vpop.eup %2701  ;;  %2713 = vpow2.f32 %v1651_v9 }
 0x7a3   : > { %v2704_v49 = vpop.eup %2703  ;;  %v2086_v15 = vadd.f32 %v2698_v53, %v2084_v19  ;;  %v1653_v62 = vadd.f32 %v2702_v41, %v2700_v58  ;;  %v1202_v52 = vadd.f32 %v1200_v60, %v1198_v14 }
 0x7a4   : > { %v2706_v61 = vpop.eup %2705 }
 0x7a5   : > { %v2708_v32 = vpop.eup %2707  ;;  %2715 = vrcp.f32 %v2086_v15  ;;  %v1655_v7 = vadd.f32 %v2704_v49, %v1653_v62  ;;  %v3704_v11 = vadd.f32 %v1204_v13, %v1202_v52 }
 0x7a6   : > { %v2710_v45 = vpop.eup %2709 }
 0x7a7   : > { %v1657_v1 = vadd.f32 %v2706_v61, %v1655_v7  ;;  %v1654_v33 = vadd.f32 %v2710_v45, %v2708_v32  ;;  %v2712_v34 = vpop.eup %2711  ;;  %v1216_v35 = vmul.f32 %v3164_v38, %v3704_v11 }
 0x7a8   : > { %v2714_v51 = vpop.eup %2713 }
 0x7a9   : > { %2717 = vrcp.f32 %v1657_v1  ;;  %v1656_v29 = vadd.f32 %v2712_v34, %v1654_v33  ;;  %v1220_v20 = vsel %vm842_vm8, %v1216_v35, 0.0 }
 0x7aa   : > { %1221 = vadd.xlane.f32.xlu2 %v1220_v20 }
 0x7ab   : > { %v2716_v21 = vpop.eup %2715  ;;  %v1658_v5 = vadd.f32 %v2714_v51, %v1656_v29 }
 0x7ac   : > { %v2090_v44 = vmul.f32 %v2716_v21, %v2692_v2  ;;  %v2092_v23 = vmul.f32 %v2716_v21, %v2694_v17  ;;  %v2094_v39 = vmul.f32 %v2716_v21, %v2696_v0  ;;  %v2096_v42 = vmul.f32 %v2716_v21, %v2698_v53 }
 0x7ad   : > { %2719 = vrcp.f32 %v1658_v5 }
 0x7ae   : > { %v2098_v57 = vmul.f32 %v2090_v44, %v3638_v24  ;;  %v2100_v26 = vmul.f32 %v2092_v23, %v3653_v4  ;;  %v2104_v43 = vmul.f32 %v2094_v39, %v3657_v55  ;;  %v2108_v9 = vmul.f32 %v2096_v42, %v3661_v56 }
 0x7af   : > { %v2718_v50 = vpop.eup %2717 }
 0x7b0   : > { %v1665_v31 = vmul.f32 %v2718_v50, %v2704_v49  ;;  %v2102_v47 = vadd.f32 %v2100_v26, %v2098_v57  ;;  %v1661_v6 = vmul.f32 %v2718_v50, %v2700_v58  ;;  %v1663_v40 = vmul.f32 %v2718_v50, %v2702_v41 }
 0x7b1   : > { %v1667_v46 = vmul.f32 %v2718_v50, %v2706_v61  ;;  %v1776_v61 = vpop.xlane.xlu2 %1775 }
 0x7b2   : > { %v2106_v16 = vadd.f32 %v2104_v43, %v2102_v47  ;;  %v1669_v2 = vmul.f32 %v1661_v6, %v3610_v18  ;;  %v1671_v17 = vmul.f32 %v1663_v40, %v3625_v54  ;;  %v1675_v24 = vmul.f32 %v1665_v31, %v3632_v27 }
 0x7b3   : > { %v2720_v0 = vpop.eup %2719  ;;  %v1679_v36 = vmul.f32 %v1667_v46, %v3641_v10  ;;  %v1778_v7 = vmul.f32 0.35355338, %v1776_v61 }
 0x7b4   : > { %v3716_v53 = vadd.f32 %v2108_v9, %v2106_v16  ;;  %v1673_v4 = vadd.f32 %v1671_v17, %v1669_v2  ;;  %v1662_v59 = vmul.f32 %v2720_v0, %v2708_v32  ;;  %v1664_v55 = vmul.f32 %v2720_v0, %v2710_v45 }
 0x7b5   : > { %v1666_v58 = vmul.f32 %v2720_v0, %v2712_v34  ;;  %v1668_v19 = vmul.f32 %v2720_v0, %v2714_v51 }
 0x7b6   : > { %v2112_v41 = vmul.f32 %v3716_v53, %v3152_v12  ;;  %v1677_v56 = vadd.f32 %v1675_v24, %v1673_v4  ;;  %v1670_v18 = vmul.f32 %v1662_v59, %v3617_v8  ;;  %v1672_v54 = vmul.f32 %v1664_v55, %v3630_v22 }
 0x7b7   : > { %v1676_v49 = vmul.f32 %v1666_v58, %v3636_v28  ;;  %v1680_v62 = vmul.f32 %v1668_v19, %v3650_v3 }
 0x7b8   : > { %v2114_v14 = vsel %vm842_vm8, %v2112_v41, 0.0  ;;  %v3724_v27 = vadd.f32 %v1679_v36, %v1677_v56  ;;  %v1674_v60 = vadd.f32 %v1672_v54, %v1670_v18 }
 0x7b9   : > { %2115 = vadd.xlane.f32.xlu0 %v2114_v14  ;;  %v1958_v45 = vpop.xlane.xlu2 %1957 }
 0x7ba   : > { %v1683_v10 = vmul.f32 %v3724_v27, %v3152_v12  ;;  %v1678_v15 = vadd.f32 %v1676_v49, %v1674_v60  ;;  %v1960_v1 = vmul.f32 0.35355338, %v1958_v45 }
 0x7bc   : > { %v1685_v52 = vsel %vm842_vm8, %v1683_v10, 0.0  ;;  %v3731_v8 = vadd.f32 %v1680_v62, %v1678_v15 }
 0x7bd   : > { %1686 = vadd.xlane.f32.xlu1 %v1685_v52 }
 0x7be   : > { %v1684_v22 = vmul.f32 %v3731_v8, %v3164_v38 }
 0x7c0   : > { %v1688_v13 = vsel %vm842_vm8, %v1684_v22, 0.0 }
 0x7c1   : > { %1689 = vadd.xlane.f32.xlu2 %v1688_v13  ;;  %v1867_v28 = vpop.xlane.xlu0 %1866 }
 0x7c2   : > { %v1869_v32 = vmul.f32 0.35355338, %v1867_v28 }
 0x7c4   : > { %v2053_v12 = vmax.f32 %v1778_v7, %v1869_v32 }
 0x7c6   : > { %v2055_v3 = vmax.f32 %v2053_v12, %v1960_v1 }
 0x7c9   : > { %v2049_v33 = vpop.xlane.xlu0 %2048 }
 0x7ca   : > { %v2051_v34 = vmul.f32 0.35355338, %v2049_v33 }
 0x7cc   : > { %v2057_v35 = vmax.f32 %v2055_v3, %v2051_v34 }
 0x7ce   : > { %v2059_v29 = vsub.f32 %v1778_v7, %v2057_v35  ;;  %v2065_v51 = vsub.f32 %v1869_v32, %v2057_v35  ;;  %v2071_v20 = vsub.f32 %v1960_v1, %v2057_v35  ;;  %v2077_v21 = vsub.f32 %v2051_v34, %v2057_v35 }
 0x7d0   : > { %v2062_v5 = vmul.f32 1.442695, %v2059_v29  ;;  %v2068_v44 = vmul.f32 1.442695, %v2065_v51  ;;  %v2074_v23 = vmul.f32 1.442695, %v2071_v20 }
 0x7d1   : > { %v2080_v39 = vmul.f32 1.442695, %v2077_v21 }
 0x7d2   : > { %2721 = vpow2.f32 %v2062_v5 }
 0x7d3   : > { %2723 = vpow2.f32 %v2068_v44 }
 0x7d4   : > { %2725 = vpow2.f32 %v2074_v23 }
 0x7d5   : > { %2727 = vpow2.f32 %v2080_v39 }
 0x7d8   : > { %v2722_v42 = vpop.eup %2721 }
 0x7d9   : > { %v2724_v57 = vpop.eup %2723 }
 0x7da   : > { %v2083_v26 = vadd.f32 %v2724_v57, %v2722_v42  ;;  %v2726_v50 = vpop.eup %2725 }
 0x7db   : > { %v2728_v31 = vpop.eup %2727 }
 0x7dc   : > { %v2085_v43 = vadd.f32 %v2726_v50, %v2083_v26 }
 0x7de   : > { %v2087_v47 = vadd.f32 %v2728_v31, %v2085_v43 }
 0x7e0   : > { %2729 = vrcp.f32 %v2087_v47 }
 0x7e6   : > { %v2730_v6 = vpop.eup %2729 }
 0x7e7   : > { %v2091_v40 = vmul.f32 %v2730_v6, %v2722_v42  ;;  %v2093_v46 = vmul.f32 %v2730_v6, %v2724_v57  ;;  %v2095_v16 = vmul.f32 %v2730_v6, %v2726_v50  ;;  %v2097_v9 = vmul.f32 %v2730_v6, %v2728_v31 }
 0x7e9   : > { %v2099_v2 = vmul.f32 %v2091_v40, %v3648_v25  ;;  %v2101_v17 = vmul.f32 %v2093_v46, %v3677_v63  ;;  %v2105_v24 = vmul.f32 %v2095_v16, %v3671_v30  ;;  %v2109_v59 = vmul.f32 %v2097_v9, %v3683_v37  ;;  %v2166_v25 = vld [vmem:[%s3805_s6] sm:$0xff] }
 0x7ea   : > { %2188 = vmatpush.msrb.mxu3 %v2166_v25 }
 0x7eb   : > { %v2103_v0 = vadd.f32 %v2101_v17, %v2099_v2 }
 0x7ed   : > { %v2107_v4 = vadd.f32 %v2105_v24, %v2103_v0 }
 0x7ef   : > { %v3740_v55 = vadd.f32 %v2109_v59, %v2107_v4  ;;  %v2831_v4 = vmov 1   ;;  %v2197_v59 = vstv %s2196_s30  ;;  %s2325_s30 = sshll.u32 %s2322_s29, 4  ;;  %s2326_s30 = int_to_ptr.hbm [resolvable:$true] %s2325_s30 }
 0x7f0   : > { %2570 = vset.pattern.permute.xlu2 %v2831_v4  ;;  %2571 = vset.pattern.permute.xlu0 %v2831_v4 }
 0x7f1   : > { %v2113_v36 = vmul.f32 %v3740_v55, %v3164_v38 }
 0x7f3   : > { %v2117_v58 = vsel %vm842_vm8, %v2113_v36, 0.0 }
 0x7f4   : > { %2118 = vadd.xlane.f32.xlu1 %v2117_v58 }
 0x7f5   : > { %v1219_v19 = vpop.xlane.xlu1 %1218 }
 0x7f6   : > { %v1223_v63 = vmul.f32 0.35355338, %v1219_v19 }
 0x81d   : > { %v1222_v35 = vpop.xlane.xlu2 %1221 }
 0x81e   : > { %v1224_v20 = vmul.f32 0.35355338, %v1222_v35 }
 0x82c   : > { %v2116_v41 = vpop.xlane.xlu0 %2115 }
 0x82d   : > { %v2120_v18 = vmul.f32 0.35355338, %v2116_v41 }
 0x830   : > { %v1687_v56 = vpop.xlane.xlu1 %1686 }
 0x831   : > { %v1691_v30 = vmul.f32 0.35355338, %v1687_v56 }
 0x833   : > { %v2122_v37 = vmax.f32 %v1223_v63, %v1691_v30 }
 0x834   : > { %v1690_v29 = vpop.xlane.xlu2 %1689 }
 0x835   : > { %v2124_v54 = vmax.f32 %v2122_v37, %v2120_v18  ;;  %v1692_v51 = vmul.f32 0.35355338, %v1690_v29 }
 0x837   : > { %v2126_v14 = vsub.f32 %v1223_v63, %v2124_v54  ;;  %v2132_v60 = vsub.f32 %v1691_v30, %v2124_v54  ;;  %v2138_v49 = vsub.f32 %v2120_v18, %v2124_v54  ;;  %v2123_v5 = vmax.f32 %v1224_v20, %v1692_v51 }
 0x838   : > { %v2833_v30 = vmov 0  }
 0x839   : > { %v2128_v38 = vmul.f32 1.442695, %v2126_v14  ;;  %v2134_v10 = vmul.f32 1.442695, %v2132_v60  ;;  %v2140_v15 = vmul.f32 1.442695, %v2138_v49 }
 0x83b   : > { %2731 = vpow2.f32 %v2128_v38 }
 0x83c   : > { %2733 = vpow2.f32 %v2134_v10 }
 0x83d   : > { %2735 = vpow2.f32 %v2140_v15 }
 0x841   : > { %v2732_v62 = vpop.eup %2731 }
 0x842   : > { %v2734_v61 = vpop.eup %2733 }
 0x843   : > { %v2144_v52 = vadd.f32 %v2734_v61, %v2732_v62  ;;  %v2736_v22 = vpop.eup %2735 }
 0x845   : > { %v2146_v13 = vadd.f32 %v2736_v22, %v2144_v52 }
 0x847   : > { %2737 = vrcp.f32 %v2146_v13 }
 0x84d   : > { %v2738_v28 = vpop.eup %2737 }
 0x84e   : > { %v2150_v32 = vmul.f32 %v2738_v28, %v2732_v62  ;;  %v2152_v7 = vmul.f32 %v2738_v28, %v2734_v61  ;;  %v2154_v45 = vmul.f32 %v2738_v28, %v2736_v22 }
 0x850   : > { %v2158_v12 = vmul.f32 %v2152_v7, %v3724_v27  ;;  %v2156_v1 = vmul.f32 %v2150_v32, %v3693_v48  ;;  %v2162_v3 = vmul.f32 %v2154_v45, %v3716_v53 }
 0x852   : > { %v2160_v33 = vadd.f32 %v2158_v12, %v2156_v1 }
 0x854   : > { %v2164_v34 = vadd.f32 %v2162_v3, %v2160_v33 }
 0x856   : > { %2487 = vmatmul.msk.f32.vlgmr.msrb.gmra.mxu3 %vm842_vm8, %v2164_v34 }
 0x867   : > { %v2119_v21 = vpop.xlane.xlu1 %2118 }
 0x868   : > { %v2121_v44 = vmul.f32 0.35355338, %v2119_v21 }
 0x86a   : > { %v2125_v23 = vmax.f32 %v2123_v5, %v2121_v44 }
 0x86c   : > { %v2127_v39 = vsub.f32 %v1224_v20, %v2125_v23  ;;  %v2133_v42 = vsub.f32 %v1692_v51, %v2125_v23  ;;  %v2139_v57 = vsub.f32 %v2121_v44, %v2125_v23 }
 0x86e   : > { %v2130_v27 = vmul.f32 1.442695, %v2127_v39  ;;  %v2136_v26 = vmul.f32 1.442695, %v2133_v42  ;;  %v2142_v48 = vmul.f32 1.442695, %v2139_v57 }
 0x870   : > { %2739 = vpow2.f32 %v2130_v27 }
 0x871   : > { %2741 = vpow2.f32 %v2136_v26 }
 0x872   : > { %2743 = vpow2.f32 %v2142_v48 }
 0x876   : > { %v2740_v53 = vpop.eup %2739 }
 0x877   : > { %v2742_v50 = vpop.eup %2741 }
 0x878   : > { %v2145_v43 = vadd.f32 %v2742_v50, %v2740_v53  ;;  %v2744_v31 = vpop.eup %2743 }
 0x87a   : > { %v2147_v47 = vadd.f32 %v2744_v31, %v2145_v43 }
 0x87c   : > { %2745 = vrcp.f32 %v2147_v47 }
 0x882   : > { %v2746_v6 = vpop.eup %2745 }
 0x883   : > { %v2151_v40 = vmul.f32 %v2746_v6, %v2740_v53  ;;  %v2153_v46 = vmul.f32 %v2746_v6, %v2742_v50  ;;  %v2155_v16 = vmul.f32 %v2746_v6, %v2744_v31 }
 0x885   : > { %v2157_v9 = vmul.f32 %v2151_v40, %v3704_v11  ;;  %v2159_v2 = vmul.f32 %v2153_v46, %v3731_v8  ;;  %v2163_v0 = vmul.f32 %v2155_v16, %v3740_v55 }
 0x887   : > { %v2161_v17 = vadd.f32 %v2159_v2, %v2157_v9 }
 0x889   : > { %v2165_v24 = vadd.f32 %v2163_v0, %v2161_v17 }
 0x88b   : > { %2488 = vmatmul.msk.f32.gmra.mxu3 %vm842_vm8, %v2165_v24 }
 0x8d9   : > { %v2190_v36 = vpop.f32.mrf.mxu3 }
 0x8da   : > { %2208 = vrot.lane.b32.xlu2 %v2190_v36, %s2832_s10  ;;  %v2198_v58 = vadd.f32 %v2197_v59, %v2190_v36 }
 0x8dc   : > { %vm2200_vm11 = vcmp.gt.f32.partialorder %v2198_v58, 0.0  ;;  %v2202_v11 = vmul.f32 0.2, %v2198_v58 }
 0x8de   : > { %v2204_v8 = vsel %vm2200_vm11, %v2198_v58, %v2202_v11 }
 0x8df   : > { %2298 = vst.msk [vmem:[%s364_s22] sm:$0xff] %vm2297_vm9, %v2204_v8 }
 0x8e2   : > { %2247 = vperm.xlu2 %2570, %v2190_v36  }
 0x8ea   : > { %2572 = vset.pattern.permute.xlu2 %v2833_v30 }
 0x90e   : > { %v2193_v55 = vpop.f32.mrf.mxu3 }
 0x90f   : > { %v2199_v19 = vadd.f32 %v2197_v59, %v2193_v55  ;;  %2210 = vrot.lane.b32.xlu0 %v2193_v55, %s2832_s10  ;;  %s2769_s10 = sshra.s32 %s2326_s30, 4  ;;  %s2770_s10 = int_to_ptr.hbm [resolvable:$true] %s2769_s10 }
 0x910   : > { %s2771_s15 = scalar_lea.hbm %s2770_s10, 16  ;;  %p2776_p0 = scmp.lt.s32.totalorder %s2770_s10, %s3808_s9 }
 0x911   : > { %v2203_v41 = vmul.f32 0.2, %v2199_v19  ;;  %vm2201_vm13 = vcmp.gt.f32.partialorder %v2199_v19, 0.0  ;;  %p2772_p11 = scmp.ne.s32.totalorder %s2770_s10, %s2771_s15  ;;  %p2777_p1 = scmp.lt.s32.totalorder %s2775_s27, %s2771_s15 }
 0x913   : > { %v2205_v56 = vsel %vm2201_vm13, %v2199_v19, %v2203_v41  ;;  %p2773_p12 = pnand %p2772_p11, %p2927_p5  ;;  %p2778_p2 = por %p2777_p1, %p2776_p0 }
 0x914   : > { %2299 = vst.msk [vmem:[%s364_s22 + $0x8] sm:$0xff] %vm2297_vm9, %v2205_v56 }
 0x915   : > { %p2774_p13 = pneg %p2773_p12 }
 0x917   : > { %2251 = vperm.xlu0 %2571, %v2193_v55   ;;  %p2779_p3 = pnand %p2778_p2, %p2774_p13 }
 0x91f   : > { %2573 = vset.pattern.permute.xlu0 %v2833_v30 }
 0x934   : > { %v2209_v25 = vpop.permute.xlu2 %2208 }
 0x935   : > { %2214 = vxpose.xlu1.b32.start [1/2] (short) (narrow) %v2209_v25, 8 }
 0x93c   : > { %v2248_v54 = vpop.permute.xlu2 %2247 }
 0x981   : > { %v2211_v63 = vpop.permute.xlu0 %2210 }
 0x982   : > { %2215 = vxpose.xlu1.b32.end [2/2] (short) (narrow) %v2211_v63, 8 }
 0x989   : > { %v2252_v14 = vpop.permute.xlu0 %2251 }
 0xa1e   : > { %v2230_v18 = vpop.trf.xlu1 }
 0xa1f   : > { %v2254_v37 = vperm.slane %v2230_v18, 0 }
 0xa21   : > { %v2255_v60 = vadd.f32 %v2254_v37, %v2248_v54  ;;  %v2256_v49 = vadd.f32 %v2254_v37, %v2252_v14 }
 0xa23   : > { %v2259_v38 = vmul.f32 0.2, %v2255_v60  ;;  %v2260_v10 = vmul.f32 0.2, %v2256_v49  ;;  %vm2257_vm15 = vcmp.gt.f32.partialorder %v2255_v60, 0.0  ;;  %vm2258_vm0 = vcmp.gt.f32.partialorder %v2256_v49, 0.0 }
 0xa25   : > { %v2261_v15 = vsel %vm2257_vm15, %v2255_v60, %v2259_v38  ;;  %v2262_v62 = vsel %vm2258_vm0, %v2256_v49, %v2260_v10 }
 0xa26   : > { %v2263_v61 = vsel %vm788_vm7, %v2261_v15, -inf  ;;  %v2266_v52 = vsel %vm788_vm7, %v2262_v62, -inf }
 0xa27   : > { %2264 = vmax.xlane.f32.xlu2 %v2263_v61  ;;  %2267 = vmax.xlane.f32.xlu0 %v2266_v52 }
 0xa3b   : > { %2292 = vperm.xlu0 %2573, %v2205_v56  }
 0xa9a   : > { %v2265_v22 = vpop.xlane.xlu2 %2264  ;;  %v2268_v13 = vpop.xlane.xlu0 %2267 }
 0xa9b   : > { %v2269_v28 = vsub.f32 %v2261_v15, %v2265_v22  ;;  %v2270_v32 = vsub.f32 %v2262_v62, %v2268_v13 }
 0xa9d   : > { %v2271_v7 = vmul.f32 1.442695, %v2269_v28  ;;  %v2273_v45 = vmul.f32 1.442695, %v2270_v32 }
 0xa9f   : > { %2747 = vpow2.f32 %v2271_v7 }
 0xaa0   : > { %2749 = vpow2.f32 %v2273_v45 }
 0xaa5   : > { %v2748_v12 = vpop.eup %2747 }
 0xaa6   : > { %v2750_v1 = vpop.eup %2749  ;;  %v2275_v33 = vsel %vm788_vm7, %v2748_v12, 0.0 }
 0xaa7   : > { %2276 = vadd.xlane.f32.xlu2 %v2275_v33  ;;  %v2278_v3 = vsel %vm788_vm7, %v2750_v1, 0.0 }
 0xaa8   : > { %2279 = vadd.xlane.f32.xlu1 %v2278_v3 }
 0xaad   : > { %v2293_v44 = vpop.permute.xlu0 %2292 }
 0xabf   : > { %2287 = vperm.xlu2 %2572, %v2204_v8  }
 0xb1a   : > { %v2277_v34 = vpop.xlane.xlu2 %2276 }
 0xb1b   : > { %2751 = vrcp.f32 %v2277_v34  ;;  %v2280_v35 = vpop.xlane.xlu1 %2279 }
 0xb1c   : > { %2753 = vrcp.f32 %v2280_v35 }
 0xb21   : > { %v2752_v29 = vpop.eup %2751 }
 0xb22   : > { %v2754_v51 = vpop.eup %2753  ;;  %v2283_v20 = vmul.f32 %v2752_v29, %v2748_v12  ;;  %v2288_v21 = vpop.permute.xlu2 %2287 }
 0xb23   : > { %v2284_v5 = vmul.f32 %v2754_v51, %v2750_v1 }
 0xb24   : > { %v2295_v23 = vmul.f32 %v2288_v21, %v2283_v20 }
 0xb25   : > { %v2296_v39 = vmul.f32 %v2293_v44, %v2284_v5 }
 0xb26   : > { %2300 = vst.msk [vmem:[%s349_s26] sm:$0xff] %vm788_vm7, %v2295_v23 }
 0xb27   : > { %2301 = vst.msk [vmem:[%s349_s26 + $0x8] sm:$0xff] %vm788_vm7, %v2296_v39 }
 0xb28   : > { %2782 = shalt.err (!%p2779_p3)
}
 0xb29   : > { %s2834_s18 = smov 128   ;;  %s2835_s25 = smov 8  }
 0xb2a   : > { %2510 = dma.vmem_to_hbm [thread:$0]  (%p2927_p5), %s2324_s28, 256, %s2326_s30, %s2308_s7, %s2834_s18, %s2834_s18, %s2835_s25  }
 0xb2b PF: > { %p2516_p4 = scmp.ge.s32.totalorder %s2817_s14, 2  ;;  %s2348_s29 = sand.u32 1, %s2805_s11  }
 0xb2c   : > { %s2349_s26 = scalar_lea.sflag [#allocation4], %s2348_s29 }
 0xb2d   : > { %p2513_p7 = pnand %p2516_p4, %p2931_p6 }
 0xb2f   : > { %p2514_p8 = pneg %p2513_p7 }
 0xb31   : > { %2800 = dma.done.wait (%p2514_p8), %s2349_s26, 256  }
 0xb32   : > { %2802 = vsyncadd (%p2514_p8), %s2349_s26, 4294967040  ;;  %p21_p9 = scmp.ge.s32.totalorder %s2914_s16, 4   ;;  %s3811_s11 = smov %s2809_s12 }
 0xb33   : > { %s3812_s12 = smov %s2813_s13  ;;  %s3813_s13 = smov %s2925_s19 }
 0xb34   : > { %s3814_s14 = smov %s2914_s16  ;;  %23 = sbr.rel (!%p21_p9) target bundleno = 5 (0x5), region = 102 }
 0xb39   :  { %2355 = vsyncpa [#allocation4], 1 }
 0xb3a   :  { %2357 = vsyncpa [#allocation4 + $0x1], 1 }

</bundles_post_ra>
